<compile_context>
chip_gen: v5e
topology: v5e:2x2
jax: 0.10.0
libtpu: 0.0.40
codegen_flags: <defaults>
</compile_context>

<pallas_src>
import functools
import math

import jax
import jax.numpy as jnp
from jax.experimental import pallas as pl
from jax.experimental.pallas import tpu as pltpu


# ----------------------------- in-kernel helpers -----------------------------

def _layernorm(x, g, b, eps=1e-5):
    # PyTorch LayerNorm semantics (biased variance), computed in fp32.
    x32 = x.astype(jnp.float32)
    mu = jnp.mean(x32, axis=-1, keepdims=True)
    var = jnp.mean((x32 - mu) ** 2, axis=-1, keepdims=True)
    return (x32 - mu) * jax.lax.rsqrt(var + eps) * g + b


# --------------------------------- kernel ------------------------------------

def vit_kernel(patches_ref, convw_ref, cls_ref, pos_ref, lnpre_g, lnpre_b,
               ln1g, ln1b, wqkv, bqkv, wo, bo, ln2g, ln2b, wfc, bfc, wpr, bpr,
               lnpost_g, lnpost_b, proj_ref,
               out_ref,
               x_sc,
               *, n_head, n_tokens):
    l = pl.program_id(0)
    n_layers = pl.num_programs(0)

    B, Lp, D = x_sc.shape
    P = patches_ref.shape[1]
    hd = D // n_head
    scale = 1.0 / math.sqrt(hd)

    # ---------------- patch embed + ln_pre (layer 0 only) ----------------
    @pl.when(l == 0)
    def _():
        # conv(k=ps, stride=ps) == patches @ conv_w ; fold B*P into M.
        p = patches_ref[...].astype(jnp.bfloat16).reshape(B * P, -1)
        xp = jnp.dot(p, convw_ref[...],
                     preferred_element_type=jnp.float32).reshape(B, P, D)
        pos = pos_ref[...]                                        # (Lp, D) f32
        cls_row = cls_ref[...] + pos[0:1, :]                      # (1, D)
        # Write rows directly (no token-axis concatenate).
        x_sc[:, 0:1, :] = jnp.broadcast_to(cls_row[None], (B, 1, D))
        x_sc[:, 1:1 + P, :] = xp + pos[1:1 + P, :][None]
        if Lp > 1 + P:
            x_sc[:, 1 + P:, :] = jnp.zeros((B, Lp - 1 - P, D), jnp.float32)
        x_sc[...] = _layernorm(x_sc[...], lnpre_g[...], lnpre_b[...])

    # ---------------- one ResidualAttentionBlock (every grid step) --------
    x = x_sc[...]                                                  # (B, Lp, D) f32
    x2d = x.reshape(B * Lp, D)

    # attention branch
    h = _layernorm(x2d, ln1g[...], ln1b[...])
    qkv = jnp.dot(h.astype(jnp.bfloat16), wqkv[...],
                  preferred_element_type=jnp.float32) + bqkv[...]  # (B*Lp, 3D)
    q = qkv[:, :D]
    k = qkv[:, D:2 * D]
    v = qkv[:, 2 * D:]

    def to_heads(t):
        # (B*Lp, D) -> (B*n_head, Lp, hd)
        t = t.reshape(B, Lp, n_head, hd).transpose(0, 2, 1, 3)
        return t.reshape(B * n_head, Lp, hd)

    qh = to_heads(q * scale).astype(jnp.bfloat16)
    kh = to_heads(k).astype(jnp.bfloat16)
    vh = to_heads(v).astype(jnp.bfloat16)

    s = jnp.einsum('nqd,nkd->nqk', qh, kh,
                   preferred_element_type=jnp.float32)             # (B*H, Lp, Lp)
    if Lp > n_tokens:
        key_ids = jax.lax.broadcasted_iota(jnp.int32, (1, 1, Lp), 2)
        s = jnp.where(key_ids < n_tokens, s, -1e30)                # mask padded keys
    s = s - jnp.max(s, axis=-1, keepdims=True)
    p_att = jnp.exp(s)
    inv = pl.reciprocal(jnp.sum(p_att, axis=-1, keepdims=True), approx=True)
    p_att = p_att * inv

    oh = jnp.einsum('nqk,nkd->nqd', p_att.astype(jnp.bfloat16), vh,
                    preferred_element_type=jnp.float32)            # (B*H, Lp, hd)
    att = oh.reshape(B, n_head, Lp, hd).transpose(0, 2, 1, 3).reshape(B * Lp, D)
    att = jnp.dot(att.astype(jnp.bfloat16), wo[...],
                  preferred_element_type=jnp.float32) + bo[...]
    x1 = x2d + att

    # MLP branch (QuickGELU)
    h2 = _layernorm(x1, ln2g[...], ln2b[...])
    m = jnp.dot(h2.astype(jnp.bfloat16), wfc[...],
                preferred_element_type=jnp.float32) + bfc[...]
    m = m * jax.nn.sigmoid(1.702 * m)
    m = jnp.dot(m.astype(jnp.bfloat16), wpr[...],
                preferred_element_type=jnp.float32) + bpr[...]
    xo = x1 + m                                                    # (B*Lp, D)

    x_sc[...] = xo.reshape(B, Lp, D)

    # ---------------- ln_post + proj head (last layer only) ----------------
    @pl.when(l == n_layers - 1)
    def _():
        cls_tok = xo.reshape(B, Lp, D)[:, 0, :]                    # (B, D)
        hpost = _layernorm(cls_tok, lnpost_g[...], lnpost_b[...])
        out_ref[...] = jnp.dot(hpost.astype(jnp.bfloat16), proj_ref[...],
                               preferred_element_type=jnp.float32)


# ------------------------------ pallas wrapper --------------------------------

def patchify(x_nchw, patch_size):
    """NCHW image -> (B, num_patches, C*ps*ps), matching Conv2d(k=ps, stride=ps)."""
    B, C, H, W = x_nchw.shape
    gh, gw = H // patch_size, W // patch_size
    x = x_nchw.reshape(B, C, gh, patch_size, gw, patch_size)
    x = x.transpose(0, 2, 4, 1, 3, 5)                       # (B, gh, gw, C, ps, ps)
    return x.reshape(B, gh * gw, C * patch_size * patch_size)


def vision_transformer_forward(x_nchw, params, *, patch_size, heads):
    """Matches VisionTransformer.forward; returns (B, output_dim)."""
    patches = patchify(x_nchw, patch_size)                   # (B, P, Cp) f32
    B, P, _ = patches.shape
    layers = params["w_qkv"].shape[0]
    Lp, D = params["pos_pad"].shape
    O = params["proj"].shape[-1]

    def rep(a):        # replicated input: full block, constant index -> fetched once
        return pl.BlockSpec(a.shape, lambda l, nd=a.ndim: (0,) * nd)

    def per_layer(a):  # (layers, r, c): squeeze layer dim, block index l along it
        return pl.BlockSpec((None,) + a.shape[1:],
                            lambda l, nd=a.ndim: (l,) + (0,) * (nd - 1))

    in_arrays = [
        patches, params["conv_w"], params["cls"], params["pos_pad"],
        params["ln_pre_g"], params["ln_pre_b"],
        params["ln1_g"], params["ln1_b"], params["w_qkv"], params["b_qkv"],
        params["w_o"], params["b_o"], params["ln2_g"], params["ln2_b"],
        params["w_fc"], params["b_fc"], params["w_pr"], params["b_pr"],
        params["ln_post_g"], params["ln_post_b"], params["proj"],
    ]
    in_specs = ([rep(a) for a in in_arrays[:6]]
                + [per_layer(a) for a in in_arrays[6:18]]
                + [rep(a) for a in in_arrays[18:]])

    kern = functools.partial(vit_kernel, n_head=heads, n_tokens=P + 1)

    return pl.pallas_call(
        kern,
        out_shape=jax.ShapeDtypeStruct((B, O), jnp.float32),
        grid=(layers,),
        in_specs=in_specs,
        out_specs=pl.BlockSpec((B, O), lambda l: (0, 0)),
        scratch_shapes=[pltpu.VMEM((B, Lp, D), jnp.float32)],   # resident activations
        compiler_params=pltpu.CompilerParams(
            dimension_semantics=("arbitrary",),   # layer axis carries VMEM state
            vmem_limit_bytes=48 * 1024 * 1024,
        ),
        # TODO(synk): for very large D (>=1024) additionally tile the MLP matmuls
        # over a K/N grid axis so per-layer weights fit v7x's 64 MiB VMEM.
    )(*in_arrays)


# ------------------------------- params (glue) ---------------------------------

def init_params(key, *, input_resolution, patch_size, width, layers, heads, output_dim):
    D = width
    P = (input_resolution // patch_size) ** 2
    L = P + 1
    Lp = ((L + 7) // 8) * 8                     # pad token axis to a multiple of 8
    Cp = 3 * patch_size * patch_size
    scale = D ** -0.5
    proj_std = (D ** -0.5) * ((2 * layers) ** -0.5)
    attn_std = D ** -0.5
    fc_std = (2 * D) ** -0.5

    keys = iter(jax.random.split(key, 4 + 4 * layers))

    conv_w = (0.02 * jax.random.normal(next(keys), (D, Cp), jnp.float32)
              ).T.astype(jnp.bfloat16)                                # (Cp, D)
    cls = (scale * jax.random.normal(next(keys), (D,), jnp.float32)).reshape(1, D)
    pos = scale * jax.random.normal(next(keys), (L, D), jnp.float32)
    pos_pad = jnp.zeros((Lp, D), jnp.float32).at[:L].set(pos)
    proj = (scale * jax.random.normal(next(keys), (D, output_dim), jnp.float32)
            ).astype(jnp.bfloat16)

    wqkv_l, wo_l, wfc_l, wpr_l = [], [], [], []
    for _ in range(layers):
        in_proj_w = attn_std * jax.random.normal(next(keys), (3 * D, D), jnp.float32)
        wqkv_l.append(in_proj_w.T.astype(jnp.bfloat16))               # (D, 3D) [q|k|v]
        wo_l.append((proj_std * jax.random.normal(next(keys), (D, D), jnp.float32)
                     ).T.astype(jnp.bfloat16))
        wfc_l.append((fc_std * jax.random.normal(next(keys), (4 * D, D), jnp.float32)
                      ).T.astype(jnp.bfloat16))
        wpr_l.append((proj_std * jax.random.normal(next(keys), (D, 4 * D), jnp.float32)
                      ).T.astype(jnp.bfloat16))

    return dict(
        conv_w=conv_w, cls=cls, pos_pad=pos_pad,
        ln_pre_g=jnp.ones((1, D), jnp.float32), ln_pre_b=jnp.zeros((1, D), jnp.float32),
        ln1_g=jnp.ones((layers, 1, D), jnp.float32),
        ln1_b=jnp.zeros((layers, 1, D), jnp.float32),
        w_qkv=jnp.stack(wqkv_l), b_qkv=jnp.zeros((layers, 1, 3 * D), jnp.float32),
        w_o=jnp.stack(wo_l), b_o=jnp.zeros((layers, 1, D), jnp.float32),
        ln2_g=jnp.ones((layers, 1, D), jnp.float32),
        ln2_b=jnp.zeros((layers, 1, D), jnp.float32),
        w_fc=jnp.stack(wfc_l), b_fc=jnp.zeros((layers, 1, 4 * D), jnp.float32),
        w_pr=jnp.stack(wpr_l), b_pr=jnp.zeros((layers, 1, D), jnp.float32),
        ln_post_g=jnp.ones((1, D), jnp.float32),
        ln_post_b=jnp.zeros((1, D), jnp.float32),
        proj=proj,
    )


# ---------------------------------- main --------------------------------------

if __name__ == "__main__":
    # Small but lane-friendly config: 16x16 image, 8x8 patches -> 4 patches + cls
    # = 5 tokens (padded to 8); width 128, 4 heads (hd=32), 4 layers, out dim 128.
    B = 2
    input_resolution = 16
    patch_size = 8
    width = 128
    layers = 4          # freeze_number = 3 -> detach fires; forward value unchanged
    heads = 4
    output_dim = 128

    key = jax.random.PRNGKey(0)
    k_img, k_par = jax.random.split(key)
    x = jax.random.normal(k_img, (B, 3, input_resolution, input_resolution), jnp.float32)

    params = init_params(k_par, input_resolution=input_resolution,
                         patch_size=patch_size, width=width, layers=layers,
                         heads=heads, output_dim=output_dim)

    fwd = jax.jit(vision_transformer_forward, static_argnames=("patch_size", "heads"))
    out = fwd(x, params, patch_size=patch_size, heads=heads)
    out = jax.block_until_ready(out)

    assert out.shape == (B, output_dim), out.shape
    assert bool(jnp.all(jnp.isfinite(out)))
    print("KERNEL_OK")
</pallas_src>

<mosaic_0001>
module attributes {stable_mosaic.version = 11 : i64} {
  func.func @vit_kernel(%arg0: i32, %arg1: memref<2x4x192xf32, #tpu.memory_space<vmem>>, %arg2: memref<192x128xbf16, #tpu.memory_space<vmem>>, %arg3: memref<1x128xf32, #tpu.memory_space<vmem>>, %arg4: memref<8x128xf32, #tpu.memory_space<vmem>>, %arg5: memref<1x128xf32, #tpu.memory_space<vmem>>, %arg6: memref<1x128xf32, #tpu.memory_space<vmem>>, %arg7: memref<1x1x128xf32, #tpu.memory_space<vmem>>, %arg8: memref<1x1x128xf32, #tpu.memory_space<vmem>>, %arg9: memref<1x128x384xbf16, #tpu.memory_space<vmem>>, %arg10: memref<1x1x384xf32, #tpu.memory_space<vmem>>, %arg11: memref<1x128x128xbf16, #tpu.memory_space<vmem>>, %arg12: memref<1x1x128xf32, #tpu.memory_space<vmem>>, %arg13: memref<1x1x128xf32, #tpu.memory_space<vmem>>, %arg14: memref<1x1x128xf32, #tpu.memory_space<vmem>>, %arg15: memref<1x128x512xbf16, #tpu.memory_space<vmem>>, %arg16: memref<1x1x512xf32, #tpu.memory_space<vmem>>, %arg17: memref<1x512x128xbf16, #tpu.memory_space<vmem>>, %arg18: memref<1x1x128xf32, #tpu.memory_space<vmem>>, %arg19: memref<1x128xf32, #tpu.memory_space<vmem>>, %arg20: memref<1x128xf32, #tpu.memory_space<vmem>>, %arg21: memref<128x128xbf16, #tpu.memory_space<vmem>>, %arg22: memref<2x128xf32, #tpu.memory_space<vmem>>, %arg23: memref<2x8x128xf32, #tpu.memory_space<vmem>>) attributes {dimension_semantics = [#tpu.dimension_semantics<arbitrary>], iteration_bounds = array<i64: 4>, scalar_prefetch = 0 : i64, scratch_operands = 1 : i64, tpu.core_type = #tpu.core_type<tc>, window_params = [{pipeline_mode = #tpu.pipeline_mode<synchronous>, transform_indices = @transform_0, window_bounds = array<i64: 2, 4, 192>}, {pipeline_mode = #tpu.pipeline_mode<synchronous>, transform_indices = @transform_1, window_bounds = array<i64: 192, 128>}, {pipeline_mode = #tpu.pipeline_mode<synchronous>, transform_indices = @transform_2, window_bounds = array<i64: 1, 128>}, {pipeline_mode = #tpu.pipeline_mode<synchronous>, transform_indices = @transform_3, window_bounds = array<i64: 8, 128>}, {pipeline_mode = #tpu.pipeline_mode<synchronous>, transform_indices = @transform_4, window_bounds = array<i64: 1, 128>}, {pipeline_mode = #tpu.pipeline_mode<synchronous>, transform_indices = @transform_5, window_bounds = array<i64: 1, 128>}, {transform_indices = @transform_6, window_bounds = array<i64: 1, 1, 128>}, {transform_indices = @transform_7, window_bounds = array<i64: 1, 1, 128>}, {transform_indices = @transform_8, window_bounds = array<i64: 1, 128, 384>}, {transform_indices = @transform_9, window_bounds = array<i64: 1, 1, 384>}, {transform_indices = @transform_10, window_bounds = array<i64: 1, 128, 128>}, {transform_indices = @transform_11, window_bounds = array<i64: 1, 1, 128>}, {transform_indices = @transform_12, window_bounds = array<i64: 1, 1, 128>}, {transform_indices = @transform_13, window_bounds = array<i64: 1, 1, 128>}, {transform_indices = @transform_14, window_bounds = array<i64: 1, 128, 512>}, {transform_indices = @transform_15, window_bounds = array<i64: 1, 1, 512>}, {transform_indices = @transform_16, window_bounds = array<i64: 1, 512, 128>}, {transform_indices = @transform_17, window_bounds = array<i64: 1, 1, 128>}, {pipeline_mode = #tpu.pipeline_mode<synchronous>, transform_indices = @transform_18, window_bounds = array<i64: 1, 128>}, {pipeline_mode = #tpu.pipeline_mode<synchronous>, transform_indices = @transform_19, window_bounds = array<i64: 1, 128>}, {pipeline_mode = #tpu.pipeline_mode<synchronous>, transform_indices = @transform_20, window_bounds = array<i64: 128, 128>}, {pipeline_mode = #tpu.pipeline_mode<synchronous>, transform_indices = @transform_21, window_bounds = array<i64: 2, 128>}]} {
    %c0_i32 = arith.constant 0 : i32
    %0 = arith.cmpi eq, %arg0, %c0_i32 : i32
    %1 = arith.extui %0 : i1 to i32
    %c0_i32_0 = arith.constant 0 : i32
    %2 = arith.cmpi ne, %1, %c0_i32_0 : i32
    scf.if %2 {
      %c0_64 = arith.constant 0 : index
      %c0_65 = arith.constant 0 : index
      %c0_66 = arith.constant 0 : index
      %144 = vector.load %arg1[%c0_64, %c0_65, %c0_66] : memref<2x4x192xf32, #tpu.memory_space<vmem>>, vector<2x4x192xf32>
      %145 = arith.truncf %144 : vector<2x4x192xf32> to vector<2x4x192xbf16>
      %146 = vector.shape_cast %145 : vector<2x4x192xbf16> to vector<8x192xbf16>
      %c0_67 = arith.constant 0 : index
      %c0_68 = arith.constant 0 : index
      %147 = vector.load %arg2[%c0_67, %c0_68] : memref<192x128xbf16, #tpu.memory_space<vmem>>, vector<192x128xbf16>
      %cst_69 = arith.constant dense<0.000000e+00> : vector<8x128xf32>
      %148 = tpu.matmul %146, %147, %cst_69 {dimension_numbers = #tpu.dot_dimension_numbers<[1], [0], [0], [1], [0, 0, 1, 1], [], []>} : vector<8x192xbf16>, vector<192x128xbf16>, vector<8x128xf32> -> vector<8x128xf32>
      %149 = vector.shape_cast %148 : vector<8x128xf32> to vector<2x4x128xf32>
      %c0_70 = arith.constant 0 : index
      %c0_71 = arith.constant 0 : index
      %150 = vector.load %arg4[%c0_70, %c0_71] : memref<8x128xf32, #tpu.memory_space<vmem>>, vector<8x128xf32>
      %c0_72 = arith.constant 0 : index
      %c0_73 = arith.constant 0 : index
      %151 = vector.load %arg3[%c0_72, %c0_73] : memref<1x128xf32, #tpu.memory_space<vmem>>, vector<1x128xf32>
      %152 = vector.extract_strided_slice %150 {offsets = [0, 0], sizes = [1, 128], strides = [1, 1]} : vector<8x128xf32> to vector<1x128xf32>
      %153 = arith.addf %151, %152 : vector<1x128xf32>
      %154 = vector.shape_cast %153 : vector<1x128xf32> to vector<1x1x128xf32>
      %155 = vector.shape_cast %154 : vector<1x1x128xf32> to vector<1x1x128xf32>
      %156 = vector.broadcast %155 : vector<1x1x128xf32> to vector<2x1x128xf32>
      %c0_74 = arith.constant 0 : index
      %c0_75 = arith.constant 0 : index
      %c0_76 = arith.constant 0 : index
      %157 = vector.load %arg23[%c0_74, %c0_75, %c0_76] : memref<2x8x128xf32, #tpu.memory_space<vmem>>, vector<2x1x128xf32>
      tpu.vector_store %arg23[%c0_74, %c0_75, %c0_76], %156 {strides = array<i32>} : memref<2x8x128xf32, #tpu.memory_space<vmem>>, vector<2x1x128xf32>,
      %158 = vector.extract_strided_slice %150 {offsets = [1, 0], sizes = [4, 128], strides = [1, 1]} : vector<8x128xf32> to vector<4x128xf32>
      %159 = vector.shape_cast %158 : vector<4x128xf32> to vector<1x4x128xf32>
      %160 = vector.broadcast %159 : vector<1x4x128xf32> to vector<2x4x128xf32>
      %161 = arith.addf %149, %160 : vector<2x4x128xf32>
      %c0_77 = arith.constant 0 : index
      %c1 = arith.constant 1 : index
      %c0_78 = arith.constant 0 : index
      %162 = vector.load %arg23[%c0_77, %c1, %c0_78] : memref<2x8x128xf32, #tpu.memory_space<vmem>>, vector<2x4x128xf32>
      tpu.vector_store %arg23[%c0_77, %c1, %c0_78], %161 {strides = array<i32>} : memref<2x8x128xf32, #tpu.memory_space<vmem>>, vector<2x4x128xf32>,
      %cst_79 = arith.constant 0.000000e+00 : f32
      %163 = vector.broadcast %cst_79 : f32 to vector<2x3x128xf32>
      %c0_80 = arith.constant 0 : index
      %c5 = arith.constant 5 : index
      %c0_81 = arith.constant 0 : index
      %164 = vector.load %arg23[%c0_80, %c5, %c0_81] : memref<2x8x128xf32, #tpu.memory_space<vmem>>, vector<2x3x128xf32>
      tpu.vector_store %arg23[%c0_80, %c5, %c0_81], %163 {strides = array<i32>} : memref<2x8x128xf32, #tpu.memory_space<vmem>>, vector<2x3x128xf32>,
      %c0_82 = arith.constant 0 : index
      %c0_83 = arith.constant 0 : index
      %c0_84 = arith.constant 0 : index
      %165 = vector.load %arg23[%c0_82, %c0_83, %c0_84] : memref<2x8x128xf32, #tpu.memory_space<vmem>>, vector<2x8x128xf32>
      %c0_85 = arith.constant 0 : index
      %c0_86 = arith.constant 0 : index
      %166 = vector.load %arg5[%c0_85, %c0_86] : memref<1x128xf32, #tpu.memory_space<vmem>>, vector<1x128xf32>
      %c0_87 = arith.constant 0 : index
      %c0_88 = arith.constant 0 : index
      %167 = vector.load %arg6[%c0_87, %c0_88] : memref<1x128xf32, #tpu.memory_space<vmem>>, vector<1x128xf32>
      %cst_89 = arith.constant dense<0.000000e+00> : vector<2x8xf32>
      %168 = vector.multi_reduction <add>, %165, %cst_89 [2] : vector<2x8x128xf32> to vector<2x8xf32>
      %169 = vector.shape_cast %168 : vector<2x8xf32> to vector<2x8x1xf32>
      %cst_90 = arith.constant 1.280000e+02 : f32
      %170 = vector.broadcast %cst_90 : f32 to vector<2x8x1xf32>
      %171 = arith.divf %169, %170 : vector<2x8x1xf32>
      %172 = vector.broadcast %171 : vector<2x8x1xf32> to vector<2x8x128xf32>
      %173 = arith.subf %165, %172 : vector<2x8x128xf32>
      %174 = arith.mulf %173, %173 : vector<2x8x128xf32>
      %cst_91 = arith.constant dense<0.000000e+00> : vector<2x8xf32>
      %175 = vector.multi_reduction <add>, %174, %cst_91 [2] : vector<2x8x128xf32> to vector<2x8xf32>
      %176 = vector.shape_cast %175 : vector<2x8xf32> to vector<2x8x1xf32>
      %cst_92 = arith.constant 1.280000e+02 : f32
      %177 = vector.broadcast %cst_92 : f32 to vector<2x8x1xf32>
      %178 = arith.divf %176, %177 : vector<2x8x1xf32>
      %179 = vector.broadcast %171 : vector<2x8x1xf32> to vector<2x8x128xf32>
      %180 = arith.subf %165, %179 : vector<2x8x128xf32>
      %cst_93 = arith.constant 9.99999974E-6 : f32
      %181 = vector.broadcast %cst_93 : f32 to vector<2x8x1xf32>
      %182 = arith.addf %178, %181 : vector<2x8x1xf32>
      %183 = math.rsqrt %182 : vector<2x8x1xf32>
      %184 = vector.broadcast %183 : vector<2x8x1xf32> to vector<2x8x128xf32>
      %185 = arith.mulf %180, %184 : vector<2x8x128xf32>
      %186 = vector.shape_cast %166 : vector<1x128xf32> to vector<1x1x128xf32>
      %187 = vector.broadcast %186 : vector<1x1x128xf32> to vector<2x8x128xf32>
      %188 = arith.mulf %185, %187 : vector<2x8x128xf32>
      %189 = vector.shape_cast %167 : vector<1x128xf32> to vector<1x1x128xf32>
      %190 = vector.broadcast %189 : vector<1x1x128xf32> to vector<2x8x128xf32>
      %191 = arith.addf %188, %190 : vector<2x8x128xf32>
      %c0_94 = arith.constant 0 : index
      %c0_95 = arith.constant 0 : index
      %c0_96 = arith.constant 0 : index
      %192 = vector.load %arg23[%c0_94, %c0_95, %c0_96] : memref<2x8x128xf32, #tpu.memory_space<vmem>>, vector<2x8x128xf32>
      tpu.vector_store %arg23[%c0_94, %c0_95, %c0_96], %191 {strides = array<i32>} : memref<2x8x128xf32, #tpu.memory_space<vmem>>, vector<2x8x128xf32>,
    } else {
    }
    %c0 = arith.constant 0 : index
    %c0_1 = arith.constant 0 : index
    %c0_2 = arith.constant 0 : index
    %3 = vector.load %arg23[%c0, %c0_1, %c0_2] : memref<2x8x128xf32, #tpu.memory_space<vmem>>, vector<2x8x128xf32>
    %4 = vector.shape_cast %3 : vector<2x8x128xf32> to vector<16x128xf32>
    %c0_3 = arith.constant 0 : index
    %c0_4 = arith.constant 0 : index
    %c0_5 = arith.constant 0 : index
    %5 = vector.load %arg7[%c0_3, %c0_4, %c0_5] : memref<1x1x128xf32, #tpu.memory_space<vmem>>, vector<1x1x128xf32>
    %6 = vector.shape_cast %5 : vector<1x1x128xf32> to vector<1x128xf32>
    %c0_6 = arith.constant 0 : index
    %c0_7 = arith.constant 0 : index
    %c0_8 = arith.constant 0 : index
    %7 = vector.load %arg8[%c0_6, %c0_7, %c0_8] : memref<1x1x128xf32, #tpu.memory_space<vmem>>, vector<1x1x128xf32>
    %8 = vector.shape_cast %7 : vector<1x1x128xf32> to vector<1x128xf32>
    %cst = arith.constant dense<0.000000e+00> : vector<16xf32>
    %9 = vector.multi_reduction <add>, %4, %cst [1] : vector<16x128xf32> to vector<16xf32>
    %10 = vector.shape_cast %9 : vector<16xf32> to vector<16x1xf32>
    %cst_9 = arith.constant 1.280000e+02 : f32
    %11 = vector.broadcast %cst_9 : f32 to vector<16x1xf32>
    %12 = arith.divf %10, %11 : vector<16x1xf32>
    %13 = vector.broadcast %12 : vector<16x1xf32> to vector<16x128xf32>
    %14 = arith.subf %4, %13 : vector<16x128xf32>
    %15 = arith.mulf %14, %14 : vector<16x128xf32>
    %cst_10 = arith.constant dense<0.000000e+00> : vector<16xf32>
    %16 = vector.multi_reduction <add>, %15, %cst_10 [1] : vector<16x128xf32> to vector<16xf32>
    %17 = vector.shape_cast %16 : vector<16xf32> to vector<16x1xf32>
    %cst_11 = arith.constant 1.280000e+02 : f32
    %18 = vector.broadcast %cst_11 : f32 to vector<16x1xf32>
    %19 = arith.divf %17, %18 : vector<16x1xf32>
    %20 = vector.broadcast %12 : vector<16x1xf32> to vector<16x128xf32>
    %21 = arith.subf %4, %20 : vector<16x128xf32>
    %cst_12 = arith.constant 9.99999974E-6 : f32
    %22 = vector.broadcast %cst_12 : f32 to vector<16x1xf32>
    %23 = arith.addf %19, %22 : vector<16x1xf32>
    %24 = math.rsqrt %23 : vector<16x1xf32>
    %25 = vector.broadcast %24 : vector<16x1xf32> to vector<16x128xf32>
    %26 = arith.mulf %21, %25 : vector<16x128xf32>
    %27 = vector.broadcast %6 : vector<1x128xf32> to vector<16x128xf32>
    %28 = arith.mulf %26, %27 : vector<16x128xf32>
    %29 = vector.broadcast %8 : vector<1x128xf32> to vector<16x128xf32>
    %30 = arith.addf %28, %29 : vector<16x128xf32>
    %31 = arith.truncf %30 : vector<16x128xf32> to vector<16x128xbf16>
    %c0_13 = arith.constant 0 : index
    %c0_14 = arith.constant 0 : index
    %c0_15 = arith.constant 0 : index
    %32 = vector.load %arg9[%c0_13, %c0_14, %c0_15] : memref<1x128x384xbf16, #tpu.memory_space<vmem>>, vector<1x128x384xbf16>
    %33 = vector.shape_cast %32 : vector<1x128x384xbf16> to vector<128x384xbf16>
    %cst_16 = arith.constant dense<0.000000e+00> : vector<16x384xf32>
    %34 = tpu.matmul %31, %33, %cst_16 {dimension_numbers = #tpu.dot_dimension_numbers<[1], [0], [0], [1], [0, 0, 1, 1], [], []>} : vector<16x128xbf16>, vector<128x384xbf16>, vector<16x384xf32> -> vector<16x384xf32>
    %c0_17 = arith.constant 0 : index
    %c0_18 = arith.constant 0 : index
    %c0_19 = arith.constant 0 : index
    %35 = vector.load %arg10[%c0_17, %c0_18, %c0_19] : memref<1x1x384xf32, #tpu.memory_space<vmem>>, vector<1x1x384xf32>
    %36 = vector.shape_cast %35 : vector<1x1x384xf32> to vector<1x384xf32>
    %37 = vector.broadcast %36 : vector<1x384xf32> to vector<16x384xf32>
    %38 = arith.addf %34, %37 : vector<16x384xf32>
    %39 = vector.extract_strided_slice %38 {offsets = [0, 0], sizes = [16, 128], strides = [1, 1]} : vector<16x384xf32> to vector<16x128xf32>
    %40 = vector.extract_strided_slice %38 {offsets = [0, 128], sizes = [16, 128], strides = [1, 1]} : vector<16x384xf32> to vector<16x128xf32>
    %41 = vector.extract_strided_slice %38 {offsets = [0, 256], sizes = [16, 128], strides = [1, 1]} : vector<16x384xf32> to vector<16x128xf32>
    %cst_20 = arith.constant 0.176776692 : f32
    %42 = vector.broadcast %cst_20 : f32 to vector<16x128xf32>
    %43 = arith.mulf %39, %42 : vector<16x128xf32>
    %44 = vector.shape_cast %43 : vector<16x128xf32> to vector<2x8x4x32xf32>
    %45 = tpu.transpose %44, [0, 2, 1, 3] : vector<2x8x4x32xf32> -> vector<2x4x8x32xf32>
    %46 = vector.shape_cast %45 : vector<2x4x8x32xf32> to vector<8x8x32xf32>
    %47 = arith.truncf %46 : vector<8x8x32xf32> to vector<8x8x32xbf16>
    %48 = vector.shape_cast %40 : vector<16x128xf32> to vector<2x8x4x32xf32>
    %49 = tpu.transpose %48, [0, 2, 1, 3] : vector<2x8x4x32xf32> -> vector<2x4x8x32xf32>
    %50 = vector.shape_cast %49 : vector<2x4x8x32xf32> to vector<8x8x32xf32>
    %51 = arith.truncf %50 : vector<8x8x32xf32> to vector<8x8x32xbf16>
    %52 = vector.shape_cast %41 : vector<16x128xf32> to vector<2x8x4x32xf32>
    %53 = tpu.transpose %52, [0, 2, 1, 3] : vector<2x8x4x32xf32> -> vector<2x4x8x32xf32>
    %54 = vector.shape_cast %53 : vector<2x4x8x32xf32> to vector<8x8x32xf32>
    %55 = arith.truncf %54 : vector<8x8x32xf32> to vector<8x8x32xbf16>
    "tpu.trace_start"() <{level = 10 : i32, message = "nqd,nkd->nqk"}> : () -> ()
    %cst_21 = arith.constant dense<0.000000e+00> : vector<8x8x8xf32>
    %56 = tpu.matmul %47, %51, %cst_21 {dimension_numbers = #tpu.dot_dimension_numbers<[2], [2], [1], [1], [0, 0, 0, 1, 1, 1], [0], [0]>} : vector<8x8x32xbf16>, vector<8x8x32xbf16>, vector<8x8x8xf32> -> vector<8x8x8xf32>
    "tpu.trace_stop"() : () -> ()
    %57 = tpu.iota {dimensions = array<i32: 2>} : vector<1x1x8xi32>
    %c5_i32 = arith.constant 5 : i32
    %58 = vector.broadcast %c5_i32 : i32 to vector<1x1x8xi32>
    %59 = arith.cmpi slt, %57, %58 : vector<1x1x8xi32>
    %cst_22 = arith.constant -1.000000e+30 : f32
    %60 = vector.shape_cast %59 : vector<1x1x8xi1> to vector<1x1x8xi1>
    %61 = vector.broadcast %60 : vector<1x1x8xi1> to vector<8x8x8xi1>
    %62 = vector.broadcast %cst_22 : f32 to vector<8x8x8xf32>
    %63 = arith.select %61, %56, %62 : vector<8x8x8xi1>, vector<8x8x8xf32>
    %cst_23 = arith.constant dense<0xFF800000> : vector<8x8xf32>
    %64 = vector.multi_reduction <maximumf>, %63, %cst_23 [2] : vector<8x8x8xf32> to vector<8x8xf32>
    %65 = vector.shape_cast %64 : vector<8x8xf32> to vector<8x8x1xf32>
    %66 = vector.broadcast %65 : vector<8x8x1xf32> to vector<8x8x8xf32>
    %67 = arith.subf %63, %66 : vector<8x8x8xf32>
    %68 = math.exp %67 : vector<8x8x8xf32>
    %cst_24 = arith.constant dense<0.000000e+00> : vector<8x8xf32>
    %69 = vector.multi_reduction <add>, %68, %cst_24 [2] : vector<8x8x8xf32> to vector<8x8xf32>
    %70 = vector.shape_cast %69 : vector<8x8xf32> to vector<8x8x1xf32>
    %71 = tpu.reciprocal %70 {approx = true} : vector<8x8x1xf32> -> vector<8x8x1xf32>
    %72 = vector.broadcast %71 : vector<8x8x1xf32> to vector<8x8x8xf32>
    %73 = arith.mulf %68, %72 : vector<8x8x8xf32>
    %74 = arith.truncf %73 : vector<8x8x8xf32> to vector<8x8x8xbf16>
    "tpu.trace_start"() <{level = 10 : i32, message = "nqk,nkd->nqd"}> : () -> ()
    %cst_25 = arith.constant dense<0.000000e+00> : vector<8x8x32xf32>
    %75 = tpu.matmul %74, %55, %cst_25 {dimension_numbers = #tpu.dot_dimension_numbers<[2], [1], [1], [2], [0, 0, 0, 1, 1, 2], [0], [0]>} : vector<8x8x8xbf16>, vector<8x8x32xbf16>, vector<8x8x32xf32> -> vector<8x8x32xf32>
    "tpu.trace_stop"() : () -> ()
    %76 = vector.shape_cast %75 : vector<8x8x32xf32> to vector<2x4x8x32xf32>
    %77 = tpu.transpose %76, [0, 2, 1, 3] : vector<2x4x8x32xf32> -> vector<2x8x4x32xf32>
    %78 = vector.shape_cast %77 : vector<2x8x4x32xf32> to vector<16x128xf32>
    %79 = arith.truncf %78 : vector<16x128xf32> to vector<16x128xbf16>
    %c0_26 = arith.constant 0 : index
    %c0_27 = arith.constant 0 : index
    %c0_28 = arith.constant 0 : index
    %80 = vector.load %arg11[%c0_26, %c0_27, %c0_28] : memref<1x128x128xbf16, #tpu.memory_space<vmem>>, vector<1x128x128xbf16>
    %81 = vector.shape_cast %80 : vector<1x128x128xbf16> to vector<128x128xbf16>
    %cst_29 = arith.constant dense<0.000000e+00> : vector<16x128xf32>
    %82 = tpu.matmul %79, %81, %cst_29 {dimension_numbers = #tpu.dot_dimension_numbers<[1], [0], [0], [1], [0, 0, 1, 1], [], []>} : vector<16x128xbf16>, vector<128x128xbf16>, vector<16x128xf32> -> vector<16x128xf32>
    %c0_30 = arith.constant 0 : index
    %c0_31 = arith.constant 0 : index
    %c0_32 = arith.constant 0 : index
    %83 = vector.load %arg12[%c0_30, %c0_31, %c0_32] : memref<1x1x128xf32, #tpu.memory_space<vmem>>, vector<1x1x128xf32>
    %84 = vector.shape_cast %83 : vector<1x1x128xf32> to vector<1x128xf32>
    %85 = vector.broadcast %84 : vector<1x128xf32> to vector<16x128xf32>
    %86 = arith.addf %82, %85 : vector<16x128xf32>
    %87 = arith.addf %4, %86 : vector<16x128xf32>
    %c0_33 = arith.constant 0 : index
    %c0_34 = arith.constant 0 : index
    %c0_35 = arith.constant 0 : index
    %88 = vector.load %arg13[%c0_33, %c0_34, %c0_35] : memref<1x1x128xf32, #tpu.memory_space<vmem>>, vector<1x1x128xf32>
    %89 = vector.shape_cast %88 : vector<1x1x128xf32> to vector<1x128xf32>
    %c0_36 = arith.constant 0 : index
    %c0_37 = arith.constant 0 : index
    %c0_38 = arith.constant 0 : index
    %90 = vector.load %arg14[%c0_36, %c0_37, %c0_38] : memref<1x1x128xf32, #tpu.memory_space<vmem>>, vector<1x1x128xf32>
    %91 = vector.shape_cast %90 : vector<1x1x128xf32> to vector<1x128xf32>
    %cst_39 = arith.constant dense<0.000000e+00> : vector<16xf32>
    %92 = vector.multi_reduction <add>, %87, %cst_39 [1] : vector<16x128xf32> to vector<16xf32>
    %93 = vector.shape_cast %92 : vector<16xf32> to vector<16x1xf32>
    %cst_40 = arith.constant 1.280000e+02 : f32
    %94 = vector.broadcast %cst_40 : f32 to vector<16x1xf32>
    %95 = arith.divf %93, %94 : vector<16x1xf32>
    %96 = vector.broadcast %95 : vector<16x1xf32> to vector<16x128xf32>
    %97 = arith.subf %87, %96 : vector<16x128xf32>
    %98 = arith.mulf %97, %97 : vector<16x128xf32>
    %cst_41 = arith.constant dense<0.000000e+00> : vector<16xf32>
    %99 = vector.multi_reduction <add>, %98, %cst_41 [1] : vector<16x128xf32> to vector<16xf32>
    %100 = vector.shape_cast %99 : vector<16xf32> to vector<16x1xf32>
    %cst_42 = arith.constant 1.280000e+02 : f32
    %101 = vector.broadcast %cst_42 : f32 to vector<16x1xf32>
    %102 = arith.divf %100, %101 : vector<16x1xf32>
    %103 = vector.broadcast %95 : vector<16x1xf32> to vector<16x128xf32>
    %104 = arith.subf %87, %103 : vector<16x128xf32>
    %cst_43 = arith.constant 9.99999974E-6 : f32
    %105 = vector.broadcast %cst_43 : f32 to vector<16x1xf32>
    %106 = arith.addf %102, %105 : vector<16x1xf32>
    %107 = math.rsqrt %106 : vector<16x1xf32>
    %108 = vector.broadcast %107 : vector<16x1xf32> to vector<16x128xf32>
    %109 = arith.mulf %104, %108 : vector<16x128xf32>
    %110 = vector.broadcast %89 : vector<1x128xf32> to vector<16x128xf32>
    %111 = arith.mulf %109, %110 : vector<16x128xf32>
    %112 = vector.broadcast %91 : vector<1x128xf32> to vector<16x128xf32>
    %113 = arith.addf %111, %112 : vector<16x128xf32>
    %114 = arith.truncf %113 : vector<16x128xf32> to vector<16x128xbf16>
    %c0_44 = arith.constant 0 : index
    %c0_45 = arith.constant 0 : index
    %c0_46 = arith.constant 0 : index
    %115 = vector.load %arg15[%c0_44, %c0_45, %c0_46] : memref<1x128x512xbf16, #tpu.memory_space<vmem>>, vector<1x128x512xbf16>
    %116 = vector.shape_cast %115 : vector<1x128x512xbf16> to vector<128x512xbf16>
    %cst_47 = arith.constant dense<0.000000e+00> : vector<16x512xf32>
    %117 = tpu.matmul %114, %116, %cst_47 {dimension_numbers = #tpu.dot_dimension_numbers<[1], [0], [0], [1], [0, 0, 1, 1], [], []>} : vector<16x128xbf16>, vector<128x512xbf16>, vector<16x512xf32> -> vector<16x512xf32>
    %c0_48 = arith.constant 0 : index
    %c0_49 = arith.constant 0 : index
    %c0_50 = arith.constant 0 : index
    %118 = vector.load %arg16[%c0_48, %c0_49, %c0_50] : memref<1x1x512xf32, #tpu.memory_space<vmem>>, vector<1x1x512xf32>
    %119 = vector.shape_cast %118 : vector<1x1x512xf32> to vector<1x512xf32>
    %120 = vector.broadcast %119 : vector<1x512xf32> to vector<16x512xf32>
    %121 = arith.addf %117, %120 : vector<16x512xf32>
    %cst_51 = arith.constant 1.702000e+00 : f32
    %122 = vector.broadcast %cst_51 : f32 to vector<16x512xf32>
    %123 = arith.mulf %122, %121 : vector<16x512xf32>
    %124 = arith.negf %123 : vector<16x512xf32>
    %125 = math.exp %124 : vector<16x512xf32>
    %cst_52 = arith.constant 1.000000e+00 : f32
    %126 = vector.broadcast %cst_52 : f32 to vector<16x512xf32>
    %127 = arith.addf %126, %125 : vector<16x512xf32>
    %128 = arith.divf %126, %127 : vector<16x512xf32>
    %129 = arith.mulf %121, %128 : vector<16x512xf32>
    %130 = arith.truncf %129 : vector<16x512xf32> to vector<16x512xbf16>
    %c0_53 = arith.constant 0 : index
    %c0_54 = arith.constant 0 : index
    %c0_55 = arith.constant 0 : index
    %131 = vector.load %arg17[%c0_53, %c0_54, %c0_55] : memref<1x512x128xbf16, #tpu.memory_space<vmem>>, vector<1x512x128xbf16>
    %132 = vector.shape_cast %131 : vector<1x512x128xbf16> to vector<512x128xbf16>
    %cst_56 = arith.constant dense<0.000000e+00> : vector<16x128xf32>
    %133 = tpu.matmul %130, %132, %cst_56 {dimension_numbers = #tpu.dot_dimension_numbers<[1], [0], [0], [1], [0, 0, 1, 1], [], []>} : vector<16x512xbf16>, vector<512x128xbf16>, vector<16x128xf32> -> vector<16x128xf32>
    %c0_57 = arith.constant 0 : index
    %c0_58 = arith.constant 0 : index
    %c0_59 = arith.constant 0 : index
    %134 = vector.load %arg18[%c0_57, %c0_58, %c0_59] : memref<1x1x128xf32, #tpu.memory_space<vmem>>, vector<1x1x128xf32>
    %135 = vector.shape_cast %134 : vector<1x1x128xf32> to vector<1x128xf32>
    %136 = vector.broadcast %135 : vector<1x128xf32> to vector<16x128xf32>
    %137 = arith.addf %133, %136 : vector<16x128xf32>
    %138 = arith.addf %87, %137 : vector<16x128xf32>
    %139 = vector.shape_cast %138 : vector<16x128xf32> to vector<2x8x128xf32>
    %c0_60 = arith.constant 0 : index
    %c0_61 = arith.constant 0 : index
    %c0_62 = arith.constant 0 : index
    %140 = vector.load %arg23[%c0_60, %c0_61, %c0_62] : memref<2x8x128xf32, #tpu.memory_space<vmem>>, vector<2x8x128xf32>
    tpu.vector_store %arg23[%c0_60, %c0_61, %c0_62], %139 {strides = array<i32>} : memref<2x8x128xf32, #tpu.memory_space<vmem>>, vector<2x8x128xf32>,
    %c3_i32 = arith.constant 3 : i32
    %141 = arith.cmpi eq, %arg0, %c3_i32 : i32
    %142 = arith.extui %141 : i1 to i32
    %c0_i32_63 = arith.constant 0 : i32
    %143 = arith.cmpi ne, %142, %c0_i32_63 : i32
    scf.if %143 {
      %144 = vector.shape_cast %138 : vector<16x128xf32> to vector<2x8x128xf32>
      %145 = vector.extract_strided_slice %144 {offsets = [0, 0, 0], sizes = [2, 1, 128], strides = [1, 1, 1]} : vector<2x8x128xf32> to vector<2x1x128xf32>
      %146 = vector.shape_cast %145 : vector<2x1x128xf32> to vector<2x128xf32>
      %c0_64 = arith.constant 0 : index
      %c0_65 = arith.constant 0 : index
      %147 = vector.load %arg19[%c0_64, %c0_65] : memref<1x128xf32, #tpu.memory_space<vmem>>, vector<1x128xf32>
      %c0_66 = arith.constant 0 : index
      %c0_67 = arith.constant 0 : index
      %148 = vector.load %arg20[%c0_66, %c0_67] : memref<1x128xf32, #tpu.memory_space<vmem>>, vector<1x128xf32>
      %cst_68 = arith.constant dense<0.000000e+00> : vector<2xf32>
      %149 = vector.multi_reduction <add>, %146, %cst_68 [1] : vector<2x128xf32> to vector<2xf32>
      %150 = vector.shape_cast %149 : vector<2xf32> to vector<2x1xf32>
      %cst_69 = arith.constant 1.280000e+02 : f32
      %151 = vector.broadcast %cst_69 : f32 to vector<2x1xf32>
      %152 = arith.divf %150, %151 : vector<2x1xf32>
      %153 = vector.broadcast %152 : vector<2x1xf32> to vector<2x128xf32>
      %154 = arith.subf %146, %153 : vector<2x128xf32>
      %155 = arith.mulf %154, %154 : vector<2x128xf32>
      %cst_70 = arith.constant dense<0.000000e+00> : vector<2xf32>
      %156 = vector.multi_reduction <add>, %155, %cst_70 [1] : vector<2x128xf32> to vector<2xf32>
      %157 = vector.shape_cast %156 : vector<2xf32> to vector<2x1xf32>
      %cst_71 = arith.constant 1.280000e+02 : f32
      %158 = vector.broadcast %cst_71 : f32 to vector<2x1xf32>
      %159 = arith.divf %157, %158 : vector<2x1xf32>
      %160 = vector.broadcast %152 : vector<2x1xf32> to vector<2x128xf32>
      %161 = arith.subf %146, %160 : vector<2x128xf32>
      %cst_72 = arith.constant 9.99999974E-6 : f32
      %162 = vector.broadcast %cst_72 : f32 to vector<2x1xf32>
      %163 = arith.addf %159, %162 : vector<2x1xf32>
      %164 = math.rsqrt %163 : vector<2x1xf32>
      %165 = vector.broadcast %164 : vector<2x1xf32> to vector<2x128xf32>
      %166 = arith.mulf %161, %165 : vector<2x128xf32>
      %167 = vector.broadcast %147 : vector<1x128xf32> to vector<2x128xf32>
      %168 = arith.mulf %166, %167 : vector<2x128xf32>
      %169 = vector.broadcast %148 : vector<1x128xf32> to vector<2x128xf32>
      %170 = arith.addf %168, %169 : vector<2x128xf32>
      %171 = arith.truncf %170 : vector<2x128xf32> to vector<2x128xbf16>
      %c0_73 = arith.constant 0 : index
      %c0_74 = arith.constant 0 : index
      %172 = vector.load %arg21[%c0_73, %c0_74] : memref<128x128xbf16, #tpu.memory_space<vmem>>, vector<128x128xbf16>
      %cst_75 = arith.constant dense<0.000000e+00> : vector<2x128xf32>
      %173 = tpu.matmul %171, %172, %cst_75 {dimension_numbers = #tpu.dot_dimension_numbers<[1], [0], [0], [1], [0, 0, 1, 1], [], []>} : vector<2x128xbf16>, vector<128x128xbf16>, vector<2x128xf32> -> vector<2x128xf32>
      %c0_76 = arith.constant 0 : index
      %c0_77 = arith.constant 0 : index
      %174 = vector.load %arg22[%c0_76, %c0_77] : memref<2x128xf32, #tpu.memory_space<vmem>>, vector<2x128xf32>
      tpu.vector_store %arg22[%c0_76, %c0_77], %173 {strides = array<i32>} : memref<2x128xf32, #tpu.memory_space<vmem>>, vector<2x128xf32>,
    } else {
    }
    return
  }
  func.func @transform_0(%arg0: i32) -> (i32, i32, i32) {
    %c0_i32 = arith.constant 0 : i32
    %c0_i32_0 = arith.constant 0 : i32
    %c0_i32_1 = arith.constant 0 : i32
    %c0_i32_2 = arith.constant 0 : i32
    return %c0_i32, %c0_i32_0, %c0_i32_1 : i32, i32, i32
  }
  func.func @transform_1(%arg0: i32) -> (i32, i32) {
    %c0_i32 = arith.constant 0 : i32
    %c0_i32_0 = arith.constant 0 : i32
    %c0_i32_1 = arith.constant 0 : i32
    return %c0_i32, %c0_i32_0 : i32, i32
  }
  func.func @transform_2(%arg0: i32) -> (i32, i32) {
    %c0_i32 = arith.constant 0 : i32
    %c0_i32_0 = arith.constant 0 : i32
    %c0_i32_1 = arith.constant 0 : i32
    return %c0_i32, %c0_i32_0 : i32, i32
  }
  func.func @transform_3(%arg0: i32) -> (i32, i32) {
    %c0_i32 = arith.constant 0 : i32
    %c0_i32_0 = arith.constant 0 : i32
    %c0_i32_1 = arith.constant 0 : i32
    return %c0_i32, %c0_i32_0 : i32, i32
  }
  func.func @transform_4(%arg0: i32) -> (i32, i32) {
    %c0_i32 = arith.constant 0 : i32
    %c0_i32_0 = arith.constant 0 : i32
    %c0_i32_1 = arith.constant 0 : i32
    return %c0_i32, %c0_i32_0 : i32, i32
  }
  func.func @transform_5(%arg0: i32) -> (i32, i32) {
    %c0_i32 = arith.constant 0 : i32
    %c0_i32_0 = arith.constant 0 : i32
    %c0_i32_1 = arith.constant 0 : i32
    return %c0_i32, %c0_i32_0 : i32, i32
  }
  func.func @transform_6(%arg0: i32) -> (i32, i32, i32) {
    %c0_i32 = arith.constant 0 : i32
    %c0_i32_0 = arith.constant 0 : i32
    %c0_i32_1 = arith.constant 0 : i32
    return %arg0, %c0_i32, %c0_i32_0 : i32, i32, i32
  }
  func.func @transform_7(%arg0: i32) -> (i32, i32, i32) {
    %c0_i32 = arith.constant 0 : i32
    %c0_i32_0 = arith.constant 0 : i32
    %c0_i32_1 = arith.constant 0 : i32
    return %arg0, %c0_i32, %c0_i32_0 : i32, i32, i32
  }
  func.func @transform_8(%arg0: i32) -> (i32, i32, i32) {
    %c0_i32 = arith.constant 0 : i32
    %c0_i32_0 = arith.constant 0 : i32
    %c0_i32_1 = arith.constant 0 : i32
    return %arg0, %c0_i32, %c0_i32_0 : i32, i32, i32
  }
  func.func @transform_9(%arg0: i32) -> (i32, i32, i32) {
    %c0_i32 = arith.constant 0 : i32
    %c0_i32_0 = arith.constant 0 : i32
    %c0_i32_1 = arith.constant 0 : i32
    return %arg0, %c0_i32, %c0_i32_0 : i32, i32, i32
  }
  func.func @transform_10(%arg0: i32) -> (i32, i32, i32) {
    %c0_i32 = arith.constant 0 : i32
    %c0_i32_0 = arith.constant 0 : i32
    %c0_i32_1 = arith.constant 0 : i32
    return %arg0, %c0_i32, %c0_i32_0 : i32, i32, i32
  }
  func.func @transform_11(%arg0: i32) -> (i32, i32, i32) {
    %c0_i32 = arith.constant 0 : i32
    %c0_i32_0 = arith.constant 0 : i32
    %c0_i32_1 = arith.constant 0 : i32
    return %arg0, %c0_i32, %c0_i32_0 : i32, i32, i32
  }
  func.func @transform_12(%arg0: i32) -> (i32, i32, i32) {
    %c0_i32 = arith.constant 0 : i32
    %c0_i32_0 = arith.constant 0 : i32
    %c0_i32_1 = arith.constant 0 : i32
    return %arg0, %c0_i32, %c0_i32_0 : i32, i32, i32
  }
  func.func @transform_13(%arg0: i32) -> (i32, i32, i32) {
    %c0_i32 = arith.constant 0 : i32
    %c0_i32_0 = arith.constant 0 : i32
    %c0_i32_1 = arith.constant 0 : i32
    return %arg0, %c0_i32, %c0_i32_0 : i32, i32, i32
  }
  func.func @transform_14(%arg0: i32) -> (i32, i32, i32) {
    %c0_i32 = arith.constant 0 : i32
    %c0_i32_0 = arith.constant 0 : i32
    %c0_i32_1 = arith.constant 0 : i32
    return %arg0, %c0_i32, %c0_i32_0 : i32, i32, i32
  }
  func.func @transform_15(%arg0: i32) -> (i32, i32, i32) {
    %c0_i32 = arith.constant 0 : i32
    %c0_i32_0 = arith.constant 0 : i32
    %c0_i32_1 = arith.constant 0 : i32
    return %arg0, %c0_i32, %c0_i32_0 : i32, i32, i32
  }
  func.func @transform_16(%arg0: i32) -> (i32, i32, i32) {
    %c0_i32 = arith.constant 0 : i32
    %c0_i32_0 = arith.constant 0 : i32
    %c0_i32_1 = arith.constant 0 : i32
    return %arg0, %c0_i32, %c0_i32_0 : i32, i32, i32
  }
  func.func @transform_17(%arg0: i32) -> (i32, i32, i32) {
    %c0_i32 = arith.constant 0 : i32
    %c0_i32_0 = arith.constant 0 : i32
    %c0_i32_1 = arith.constant 0 : i32
    return %arg0, %c0_i32, %c0_i32_0 : i32, i32, i32
  }
  func.func @transform_18(%arg0: i32) -> (i32, i32) {
    %c0_i32 = arith.constant 0 : i32
    %c0_i32_0 = arith.constant 0 : i32
    %c0_i32_1 = arith.constant 0 : i32
    return %c0_i32, %c0_i32_0 : i32, i32
  }
  func.func @transform_19(%arg0: i32) -> (i32, i32) {
    %c0_i32 = arith.constant 0 : i32
    %c0_i32_0 = arith.constant 0 : i32
    %c0_i32_1 = arith.constant 0 : i32
    return %c0_i32, %c0_i32_0 : i32, i32
  }
  func.func @transform_20(%arg0: i32) -> (i32, i32) {
    %c0_i32 = arith.constant 0 : i32
    %c0_i32_0 = arith.constant 0 : i32
    %c0_i32_1 = arith.constant 0 : i32
    return %c0_i32, %c0_i32_0 : i32, i32
  }
  func.func @transform_21(%arg0: i32) -> (i32, i32) {
    %c0_i32 = arith.constant 0 : i32
    %c0_i32_0 = arith.constant 0 : i32
    %c0_i32_1 = arith.constant 0 : i32
    return %c0_i32, %c0_i32_0 : i32, i32
  }
}

</mosaic_0001>

<bundles_post_ra>
// kernel: vision_transformer_forward.1
= control target key start
LH: loop header
LB: loop body
LE: loop exit
PB: predicated region body
PF: predicated region fallthrough
CT: control target
= control target key end

     0   :  { %s7114_s0 = inlined_call_operand.vmem [shape: f32[2,4,192], index: 0, kind: input, shape index: {}]   ;;  %s7115_s1 = inlined_call_operand.vmem [shape: bf16[192,128], index: 1, kind: input, shape index: {}]   ;;  %s7116_s2 = inlined_call_operand.vmem [shape: f32[1,128], index: 2, kind: input, shape index: {}]   ;;  %s7117_s3 = inlined_call_operand.hbm [shape: f32[8,128], index: 3, kind: input, shape index: {}]   ;;  %s7118_s4 = inlined_call_operand.vmem [shape: f32[1,128], index: 4, kind: input, shape index: {}]   ;;  %s7119_s5 = inlined_call_operand.vmem [shape: f32[1,128], index: 5, kind: input, shape index: {}]   ;;  %s7120_s6 = inlined_call_operand.vmem [shape: f32[4,1,128], index: 6, kind: input, shape index: {}]   ;;  %s7121_s7 = inlined_call_operand.hbm [shape: f32[4,1,128], index: 7, kind: input, shape index: {}]   ;;  %s7122_s8 = inlined_call_operand.vmem [shape: bf16[4,128,384], index: 8, kind: input, shape index: {}]   ;;  %s7123_s9 = inlined_call_operand.vmem [shape: f32[4,1,384], index: 9, kind: input, shape index: {}]   ;;  %s7124_s10 = inlined_call_operand.hbm [shape: bf16[4,128,128], index: 10, kind: input, shape index: {}]   ;;  %s7125_s11 = inlined_call_operand.hbm [shape: f32[4,1,128], index: 11, kind: input, shape index: {}]   ;;  %s7126_s12 = inlined_call_operand.hbm [shape: f32[4,1,128], index: 12, kind: input, shape index: {}]   ;;  %s7127_s13 = inlined_call_operand.hbm [shape: f32[4,1,128], index: 13, kind: input, shape index: {}]   ;;  %s7128_s14 = inlined_call_operand.hbm [shape: bf16[4,128,512], index: 14, kind: input, shape index: {}]   ;;  %s7129_s15 = inlined_call_operand.vmem [shape: f32[4,1,512], index: 15, kind: input, shape index: {}]   ;;  %s7130_s16 = inlined_call_operand.hbm [shape: bf16[4,512,128], index: 16, kind: input, shape index: {}]   ;;  %s7131_s17 = inlined_call_operand.hbm [shape: f32[4,1,128], index: 17, kind: input, shape index: {}]   ;;  %s7132_s18 = inlined_call_operand.hbm [shape: f32[1,128], index: 18, kind: input, shape index: {}]   ;;  %s7133_s19 = inlined_call_operand.hbm [shape: f32[1,128], index: 19, kind: input, shape index: {}]   ;;  %s7134_s20 = inlined_call_operand.hbm [shape: bf16[128,128], index: 20, kind: input, shape index: {}]   ;;  %s7135_s21 = inlined_call_operand.hbm [shape: f32[2,128], index: 21, kind: output, shape index: {}]  }
   0x1   :  { %7151 = sst [smem:[#allocation39_spill]] %s7114_s0 }
   0x2   :  { %7152 = sst [smem:[#allocation40_spill]] %s7115_s1 }
   0x3   :  { %7153 = sst [smem:[#allocation41_spill]] %s7116_s2 }
   0x4   :  { %7154 = sst [smem:[#allocation42_spill]] %s7117_s3 }
   0x5   :  { %7155 = sst [smem:[#allocation43_spill]] %s7118_s4 }
   0x6   :  { %7156 = sst [smem:[#allocation44_spill]] %s7119_s5 }
   0x7   :  { %7157 = sst [smem:[#allocation45_spill]] %s7120_s6 }
   0x8   :  { %7158 = sst [smem:[#allocation46_spill]] %s7121_s7 }
   0x9   :  { %7159 = sst [smem:[#allocation47_spill]] %s7122_s8 }
   0xa   :  { %7160 = sst [smem:[#allocation48_spill]] %s7123_s9 }
   0xb   :  { %7161 = sst [smem:[#allocation49_spill]] %s7125_s11 }
   0xc   :  { %7162 = sst [smem:[#allocation50_spill]] %s7127_s13 }
   0xd   :  { %7163 = sst [smem:[#allocation51_spill]] %s7129_s15 }
   0xe   :  { %7164 = sst [smem:[#allocation52_spill]] %s7132_s18 }
   0xf   :  { %7165 = sst [smem:[#allocation53_spill]] %s7135_s21 }
  0x10   :  { %26 = vsyncpa [#allocation4], 0 }
  0x11   :  { %27 = vsyncpa [#allocation7], 0 }
  0x12   :  { %29 = vsyncpa [#allocation7 + $0x1], 0 }
  0x13   :  { %30 = vsyncpa [#allocation10], 0 }
  0x14   :  { %32 = vsyncpa [#allocation10 + $0x1], 0 }
  0x15   :  { %33 = vsyncpa [#allocation13], 0 }
  0x16   :  { %35 = vsyncpa [#allocation13 + $0x1], 0 }
  0x17   :  { %36 = vsyncpa [#allocation16], 0 }
  0x18   :  { %38 = vsyncpa [#allocation16 + $0x1], 0 }
  0x19   :  { %39 = vsyncpa [#allocation19], 0 }
  0x1a   :  { %40 = vsyncpa [#allocation22], 0 }
  0x1b   :  { %41 = vsyncpa [#allocation5], 0  ;;  %s5771_s2 = smov 0   ;;  %s5773_s25 = smov 0  }
  0x1c   :  { %s5775_s26 = smov 0   ;;  %s5777_s27 = smov 0  }
  0x1d LB: > { %7166 = sst [smem:[#allocation32_spill]] %s5634_s25  ;;  %s5790_s3 = sadd.s32 4294967295, %s5642_s27   ;;  %s5642_s27 = sphi %s5777_s27, %s7225_s27   ;;  %s5638_s26 = sphi %s5775_s26, %s7228_s26   ;;  %s5634_s25 = sphi %s5773_s25, %s7227_s25   ;;  %s5630_s2 = sphi %s5771_s2, %s7226_s2  }
  0x1e   : > { %7167 = sst [smem:[#allocation33_spill]] %s5638_s26  ;;  %s5793_s28 = sadd.s32 1, %s5642_s27  }
  0x1f   : > { %7168 = sst [smem:[#allocation34_spill]] %s5790_s3  ;;  %s203_s29 = ssub.s32 %s5642_s27, %s5793_s28 }
  0x20   : > { %7169 = sst [smem:[#allocation35_spill]] %s5793_s28  ;;  %s206_s0 = sadd.s32 1, %s5638_s26 }
  0x21   : > { %p204_p0 = scmp.eq.s32.totalorder %s203_s29, 0  ;;  %p213_p1 = scmp.ne.s32.totalorder %s5638_s26, %s5634_s25 }
  0x22   : > { %p214_p2 = scmp.eq.s32.totalorder %s5642_s27, 0  ;;  %p219_p3 = scmp.ne.s32.totalorder %s5634_s25, %s5630_s2 }
  0x23   : > { %s5803_s4 = scalar_select %p204_p0, %s5638_s26, %s206_s0  }
  0x24   : > { %p5805_p4 = por %p214_p2, %p213_p1  ;;  %p220_p5 = scmp.eq.s32.totalorder %s5790_s3, 0 }
  0x25   : > { %7170 = sst [smem:[#allocation36_spill]] %s5803_s4  ;;  %p4291_p6 = scmp.ge.s32.totalorder %s5642_s27, 1 }
  0x26   : > { %p574_p7 = scmp.lt.s32.totalorder %s5642_s27, 5  ;;  %p5814_p8 = por %p220_p5, %p219_p3 }
  0x27   : > { %p4292_p9 = scmp.ne.s32.totalorder %s5790_s3, 0  ;;  %s7176_s18 = sld [smem:[#allocation52_spill]] }
  0x28   : > { %s7172_s5 = scalar_select %p5814_p8, 1, 0 }
  0x29   : > { %p5819_p10 = pnand %p4291_p6, %p574_p7  ;;  %s5644_s2 = smov [#allocation18]  }
  0x2a   : > { %7173 = sst [smem:[#allocation37_spill]] %s7172_s5  ;;  %s615_s29 = sshll.u32 %s5644_s2, 4  ;;  %s616_s29 = int_to_ptr.vmem [resolvable:$true] %s615_s29 }
  0x2b   : > { %s7174_s22 = scalar_select %p5819_p10, 1, 0 }
  0x2c   : > { %p4970_p11 = pneg %p5819_p10  ;;  %p5012_p13 = scmp.lt.s32.totalorder %s5642_s27, 4 }
  0x2d   : > { %7175 = sst [smem:[#allocation38_spill]] %s7174_s22  ;;  %s613_s24 = sshll.u32 %s7176_s18, 4  ;;  %s614_s24 = int_to_ptr.hbm [resolvable:$true] %s613_s24 }
  0x2e   : > { %p5830_p12 = pnand %p4970_p11, %p220_p5  ;;  %s5836_s4 = sand.u32 1, %s5642_s27  }
  0x2f   : > { %s5839_s28 = sand.u32 1, %s5638_s26   ;;  %p5843_p0 = pnand %p5012_p13, %p5805_p4 }
  0x30   : > { %4976 = dma.hbm_to_vmem [thread:$0]  (!%p5830_p12), %s614_s24, 16, %s616_s29, [#allocation19]  }
  0x31   : > { %s7179_s7 = sld [smem:[#allocation46_spill]]  ;;  %s661_s9 = scalar_lea.vmem [#allocation6], %s5839_s28 }
  0x32   : > { %s668_s15 = sshll.u32 %s661_s9, 4  ;;  %s7144_s26 = scalar_lea.sflag [#allocation7], %s5836_s4  ;;  %s669_s15 = int_to_ptr.vmem [resolvable:$true] %s668_s15 }
  0x33   : > { %p5857_p2 = pneg %p5843_p0 }
  0x37   : > { %s664_s18 = scalar_lea.hbm %s7179_s7, %s5642_s27  ;;  %s5229_s9 = scalar_lea.hbm %s7179_s7, 4 }
  0x38   : > { %s666_s21 = sshll.u32 %s664_s18, 4  ;;  %s667_s21 = int_to_ptr.hbm [resolvable:$true] %s666_s21 }
  0x39   : > { %s5222_s8 = sshra.s32 %s667_s21, 4  ;;  %s5223_s8 = int_to_ptr.hbm [resolvable:$true] %s5222_s8 }
  0x3a   : > { %s5224_s30 = scalar_lea.hbm %s5223_s8, 1  ;;  %p5230_p6 = scmp.lt.s32.totalorder %s5223_s8, %s7179_s7 }
  0x3b   : > { %p5225_p1 = scmp.ne.s32.totalorder %s5223_s8, %s5224_s30  ;;  %p5231_p7 = scmp.lt.s32.totalorder %s5229_s9, %s5224_s30 }
  0x3d   : > { %p5227_p3 = pnand %p5857_p2, %p5225_p1  ;;  %p5232_p11 = por %p5231_p7, %p5230_p6 }
  0x3f   : > { %p5228_p4 = pneg %p5227_p3 }
  0x41   : > { %p5233_p13 = pnand %p5232_p11, %p5228_p4 }
  0x43   : > { %5236 = shalt.err (!%p5233_p13)
}
  0x44   : > { %4986 = dma.hbm_to_vmem [thread:$0]  (!%p5843_p0), %s667_s21, 16, %s669_s15, %s7144_s26  }
  0x45   : > { %s7181_s11 = sld [smem:[#allocation49_spill]]  ;;  %s715_s5 = scalar_lea.vmem [#allocation9], %s5839_s28 }
  0x46   : > { %s722_s29 = sshll.u32 %s715_s5, 4  ;;  %s7145_s30 = scalar_lea.sflag [#allocation10], %s5836_s4  ;;  %s723_s29 = int_to_ptr.vmem [resolvable:$true] %s722_s29 }
  0x4b   : > { %s718_s18 = scalar_lea.hbm %s7181_s11, %s5642_s27  ;;  %s5259_s15 = scalar_lea.hbm %s7181_s11, 4 }
  0x4c   : > { %s720_s8 = sshll.u32 %s718_s18, 4  ;;  %s721_s8 = int_to_ptr.hbm [resolvable:$true] %s720_s8 }
  0x4d   : > { %s5252_s9 = sshra.s32 %s721_s8, 4  ;;  %s5253_s9 = int_to_ptr.hbm [resolvable:$true] %s5252_s9 }
  0x4e   : > { %s5254_s1 = scalar_lea.hbm %s5253_s9, 1  ;;  %p5260_p6 = scmp.lt.s32.totalorder %s5253_s9, %s7181_s11 }
  0x4f   : > { %p5255_p1 = scmp.ne.s32.totalorder %s5253_s9, %s5254_s1  ;;  %p5261_p7 = scmp.lt.s32.totalorder %s5259_s15, %s5254_s1 }
  0x51   : > { %p5257_p3 = pnand %p5255_p1, %p5857_p2  ;;  %p5262_p11 = por %p5261_p7, %p5260_p6 }
  0x53   : > { %p5258_p4 = pneg %p5257_p3 }
  0x55   : > { %p5263_p13 = pnand %p5262_p11, %p5258_p4 }
  0x57   : > { %5266 = shalt.err (!%p5263_p13)
}
  0x58   : > { %4992 = dma.hbm_to_vmem [thread:$0]  (!%p5843_p0), %s721_s8, 16, %s723_s29, %s7145_s30  }
  0x59   : > { %s7182_s13 = sld [smem:[#allocation50_spill]]  ;;  %s749_s18 = scalar_lea.vmem [#allocation12], %s5839_s28 }
  0x5a   : > { %s756_s9 = sshll.u32 %s749_s18, 4  ;;  %s7146_s1 = scalar_lea.sflag [#allocation13], %s5836_s4  ;;  %s757_s9 = int_to_ptr.vmem [resolvable:$true] %s756_s9 }
  0x5f   : > { %s752_s25 = scalar_lea.hbm %s7182_s13, %s5642_s27  ;;  %s5289_s29 = scalar_lea.hbm %s7182_s13, 4 }
  0x60   : > { %s754_s24 = sshll.u32 %s752_s25, 4  ;;  %s755_s24 = int_to_ptr.hbm [resolvable:$true] %s754_s24 }
  0x61   : > { %s5282_s15 = sshra.s32 %s755_s24, 4  ;;  %s5283_s15 = int_to_ptr.hbm [resolvable:$true] %s5282_s15 }
  0x62   : > { %s5284_s21 = scalar_lea.hbm %s5283_s15, 1  ;;  %p5290_p6 = scmp.lt.s32.totalorder %s5283_s15, %s7182_s13 }
  0x63   : > { %p5285_p1 = scmp.ne.s32.totalorder %s5283_s15, %s5284_s21  ;;  %p5291_p7 = scmp.lt.s32.totalorder %s5289_s29, %s5284_s21 }
  0x65   : > { %p5287_p3 = pnand %p5285_p1, %p5857_p2  ;;  %p5292_p11 = por %p5291_p7, %p5290_p6 }
  0x67   : > { %p5288_p4 = pneg %p5287_p3 }
  0x69   : > { %p5293_p13 = pnand %p5292_p11, %p5288_p4 }
  0x6b   : > { %5296 = shalt.err (!%p5293_p13)
}
  0x6c   : > { %4998 = dma.hbm_to_vmem [thread:$0]  (!%p5843_p0), %s755_s24, 16, %s757_s9, %s7146_s1  }
  0x6d   : > { %s4300_s7 = sshll.u32 %s5839_s28, 8  ;;  %s4814_s25 = sshll.u32 %s5642_s27, 8 }
  0x6e   : > { %s772_s2 = scalar_lea.hbm %s7128_s14, %s4814_s25  ;;  %s767_s15 = scalar_lea.vmem [#allocation14], %s4300_s7 }
  0x6f   : > { %s773_s8 = sshll.u32 %s772_s2, 4  ;;  %s775_s21 = sshll.u32 %s767_s15, 4  ;;  %s5914_s8 = int_to_ptr.hbm [resolvable:$true] %s773_s8  ;;  %s5916_s21 = int_to_ptr.vmem [resolvable:$true] %s775_s21 }
  0x70   : > { %s801_s30 = scalar_lea.hbm %s7130_s16, %s4814_s25  ;;  %s796_s24 = scalar_lea.vmem [#allocation15], %s4300_s7 }
  0x71   : > { %s804_s9 = sshll.u32 %s796_s24, 4  ;;  %s802_s1 = sshll.u32 %s801_s30, 4  ;;  %s805_s9 = int_to_ptr.vmem [resolvable:$true] %s804_s9  ;;  %s803_s1 = int_to_ptr.hbm [resolvable:$true] %s802_s1 }
  0x72   : > { %s7183_s18 = sld [smem:[#allocation42_spill]]  ;;  %s7150_s13 = scalar_lea.sflag [#allocation16], %s5836_s4 }
  0x73   : > { %s5312_s3 = sshra.s32 %s803_s1, 4  ;;  %s5319_s7 = scalar_lea.hbm %s7130_s16, 1024  ;;  %s5313_s3 = int_to_ptr.hbm [resolvable:$true] %s5312_s3 }
  0x74   : > { %s5314_s15 = scalar_lea.hbm %s5313_s3, 256  ;;  %p5320_p6 = scmp.lt.s32.totalorder %s5313_s3, %s7130_s16 }
  0x75   : > { %p5315_p1 = scmp.ne.s32.totalorder %s5313_s3, %s5314_s15  ;;  %p5321_p7 = scmp.lt.s32.totalorder %s5319_s7, %s5314_s15 }
  0x77   : > { %p5317_p3 = pnand %p5315_p1, %p5857_p2  ;;  %p5322_p11 = por %p5321_p7, %p5320_p6 }
  0x78   : > { %s595_s2 = sshll.u32 %s7183_s18, 4  ;;  %s596_s2 = int_to_ptr.hbm [resolvable:$true] %s595_s2 }
  0x79   : > { %p5318_p4 = pneg %p5317_p3 }
  0x7b   : > { %p5323_p13 = pnand %p5322_p11, %p5318_p4 }
  0x7d   : > { %5326 = shalt.err (!%p5323_p13)
}
  0x7e   : > { %s5645_s11 = smov 64   ;;  %s5646_s5 = smov 4  }
  0x7f   : > { %5004 = dma.hbm_to_vmem [thread:$0]  (!%p5843_p0), %s803_s1, 4096, %s805_s9, %s7150_s13, %s5645_s11, %s5645_s11, %s5646_s5  }
  0x80   : > { %s5647_s22 = smov [#allocation3]   ;;  %s625_s18 = sshll.u32 %s7133_s19, 4  ;;  %s626_s18 = int_to_ptr.hbm [resolvable:$true] %s625_s18 }
  0x81   : > { %s597_s3 = sshll.u32 %s5647_s22, 4  ;;  %s636_s7 = sshll.u32 %s7134_s20, 4  ;;  %s598_s3 = int_to_ptr.vmem [resolvable:$true] %s597_s3  ;;  %s637_s7 = int_to_ptr.hbm [resolvable:$true] %s636_s7 }
  0x82   : > { %4973 = dma.hbm_to_vmem [thread:$0]  (!%p5830_p12), %s596_s2, 128, %s598_s3, [#allocation4]  }
  0x83   : > { %s5648_s25 = smov [#allocation20]   ;;  %s5649_s9 = smov [#allocation21]  }
  0x84   : > { %s627_s1 = sshll.u32 %s5648_s25, 4  ;;  %s638_s30 = sshll.u32 %s5649_s9, 4  ;;  %s628_s1 = int_to_ptr.vmem [resolvable:$true] %s627_s1  ;;  %s639_s30 = int_to_ptr.vmem [resolvable:$true] %s638_s30 }
  0x85   : > { %4979 = dma.hbm_to_vmem [thread:$0]  (!%p5830_p12), %s626_s18, 16, %s628_s1, [#allocation19]  }
  0x86   : > { %s4297_s22 = sshll.u32 %s5839_s28, 6  ;;  %s4813_s2 = sshll.u32 %s5642_s27, 6 }
  0x87   : > { %4982 = dma.hbm_to_vmem [thread:$0]  (!%p5830_p12), %s637_s7, 1024, %s639_s30, [#allocation22], %s5645_s11, %s5645_s11, %s5646_s5  }
  0x88   : > { %s694_s3 = scalar_lea.vmem [#allocation8], %s4297_s22  ;;  %s699_s29 = scalar_lea.hbm %s7124_s10, %s4813_s2 }
  0x89   : > { %s702_s24 = sshll.u32 %s694_s3, 4  ;;  %s700_s25 = sshll.u32 %s699_s29, 4  ;;  %s703_s24 = int_to_ptr.vmem [resolvable:$true] %s702_s24  ;;  %s701_s25 = int_to_ptr.hbm [resolvable:$true] %s700_s25 }
  0x8a   : > { %s735_s9 = scalar_lea.hbm %s7126_s12, %s5642_s27  ;;  %s5432_s13 = sshra.s32 %s701_s25, 4  ;;  %s5433_s13 = int_to_ptr.hbm [resolvable:$true] %s5432_s13 }
  0x8b   : > { %s5434_s0 = scalar_lea.hbm %s5433_s13, 64  ;;  %s5439_s22 = scalar_lea.hbm %s7124_s10, 256 }
  0x8c   : > { %p5435_p1 = scmp.ne.s32.totalorder %s5433_s13, %s5434_s0  ;;  %p5440_p4 = scmp.lt.s32.totalorder %s5433_s13, %s7124_s10 }
  0x8d   : > { %p5441_p6 = scmp.lt.s32.totalorder %s5439_s22, %s5434_s0 }
  0x8e   : > { %p5437_p12 = pnand %p5435_p1, %p5857_p2 }
  0x8f   : > { %p5442_p7 = por %p5441_p6, %p5440_p4 }
  0x90   : > { %p5438_p3 = pneg %p5437_p12 }
  0x92   : > { %p5443_p11 = pnand %p5442_p7, %p5438_p3 }
  0x94   : > { %5446 = shalt.err (!%p5443_p11)
}
  0x95   : > { %s7184_s26 = scalar_lea.sflag [#allocation7], %s5836_s4  ;;  %s737_s15 = sshll.u32 %s735_s9, 4  ;;  %s738_s15 = int_to_ptr.hbm [resolvable:$true] %s737_s15 }
  0x96   : > { %4989 = dma.hbm_to_vmem [thread:$0]  (!%p5843_p0), %s701_s25, 1024, %s703_s24, %s7184_s26, %s5645_s11, %s5645_s11, %s5646_s5  }
  0x97   : > { %s732_s29 = scalar_lea.vmem [#allocation11], %s5839_s28  ;;  %s5462_s13 = sshra.s32 %s738_s15, 4  ;;  %s5463_s13 = int_to_ptr.hbm [resolvable:$true] %s5462_s13 }
  0x98   : > { %s739_s18 = sshll.u32 %s732_s29, 4  ;;  %s5464_s1 = scalar_lea.hbm %s5463_s13, 1  ;;  %s740_s18 = int_to_ptr.vmem [resolvable:$true] %s739_s18 }
  0x99   : > { %p5465_p13 = scmp.ne.s32.totalorder %s5463_s13, %s5464_s1  ;;  %s5469_s30 = scalar_lea.hbm %s7126_s12, 4 }
  0x9a   : > { %p5470_p3 = scmp.lt.s32.totalorder %s5463_s13, %s7126_s12  ;;  %p5471_p4 = scmp.lt.s32.totalorder %s5469_s30, %s5464_s1 }
  0x9b   : > { %p5467_p1 = pnand %p5465_p13, %p5857_p2 }
  0x9c   : > { %p5472_p6 = por %p5471_p4, %p5470_p3 }
  0x9d   : > { %p5468_p12 = pneg %p5467_p1 }
  0x9f   : > { %p5473_p7 = pnand %p5472_p6, %p5468_p12 }
  0xa1   : > { %5476 = shalt.err (!%p5473_p7)
}
  0xa2   : > { %s7185_s11 = scalar_lea.sflag [#allocation10], %s5836_s4  ;;  %s5492_s5 = sshra.s32 %s5914_s8, 4  ;;  %s5493_s5 = int_to_ptr.hbm [resolvable:$true] %s5492_s5 }
  0xa3   : > { %4995 = dma.hbm_to_vmem [thread:$0]  (!%p5843_p0), %s738_s15, 16, %s740_s18, %s7185_s11  }
  0xa4   : > { %s5494_s24 = scalar_lea.hbm %s5493_s5, 256  ;;  %s5499_s2 = scalar_lea.hbm %s7128_s14, 1024 }
  0xa5   : > { %p5495_p11 = scmp.ne.s32.totalorder %s5493_s5, %s5494_s24  ;;  %p5500_p12 = scmp.lt.s32.totalorder %s5493_s5, %s7128_s14 }
  0xa6   : > { %p5501_p3 = scmp.lt.s32.totalorder %s5499_s2, %s5494_s24 }
  0xa7   : > { %p5497_p13 = pnand %p5495_p11, %p5857_p2 }
  0xa8   : > { %p5502_p4 = por %p5501_p3, %p5500_p12 }
  0xa9   : > { %p5498_p1 = pneg %p5497_p13 }
  0xab   : > { %p5503_p6 = pnand %p5502_p4, %p5498_p1 }
  0xad   : > { %5506 = shalt.err (!%p5503_p6)
}
  0xae   : > { %s5650_s15 = smov 256   ;;  %s5651_s18 = smov 16  }
  0xaf   : > { %s7186_s13 = scalar_lea.sflag [#allocation13], %s5836_s4  ;;  %s820_s7 = scalar_lea.hbm %s7131_s17, %s5642_s27 }
  0xb0   : > { %5001 = dma.hbm_to_vmem [thread:$0]  (!%p5843_p0), %s5914_s8, 4096, %s5916_s21, %s7186_s13, %s5650_s15, %s5650_s15, %s5651_s18  }
  0xb1   : > { %s822_s30 = sshll.u32 %s820_s7, 4  ;;  %s817_s22 = scalar_lea.vmem [#allocation17], %s5839_s28  ;;  %s823_s30 = int_to_ptr.hbm [resolvable:$true] %s822_s30 }
  0xb2   : > { %s824_s3 = sshll.u32 %s817_s22, 4  ;;  %s5522_s11 = sshra.s32 %s823_s30, 4  ;;  %s825_s3 = int_to_ptr.vmem [resolvable:$true] %s824_s3  ;;  %s5523_s11 = int_to_ptr.hbm [resolvable:$true] %s5522_s11 }
  0xb3   : > { %s5524_s5 = scalar_lea.hbm %s5523_s11, 1  ;;  %s5529_s8 = scalar_lea.hbm %s7131_s17, 4 }
  0xb4   : > { %p5525_p7 = scmp.ne.s32.totalorder %s5523_s11, %s5524_s5  ;;  %p5530_p1 = scmp.lt.s32.totalorder %s5523_s11, %s7131_s17 }
  0xb5   : > { %p5531_p12 = scmp.lt.s32.totalorder %s5529_s8, %s5524_s5 }
  0xb6   : > { %p5527_p11 = pnand %p5525_p7, %p5857_p2 }
  0xb7   : > { %p5532_p3 = por %p5531_p12, %p5530_p1 }
  0xb8   : > { %p5528_p13 = pneg %p5527_p11 }
  0xba   : > { %p5533_p4 = pnand %p5532_p3, %p5528_p13 }
  0xbc   : > { %5536 = shalt.err (!%p5533_p4)
}
  0xbd   : > { %s7187_s27 = scalar_lea.sflag [#allocation16], %s5836_s4  ;;  %833 = sbr.rel (%p5819_p10) target bundleno = 3136 (0xc40), region = 104 }
  0xbe   : > { %5007 = dma.hbm_to_vmem [thread:$0]  (!%p5843_p0), %s823_s30, 16, %s825_s3, %s7187_s27  }
  0xbf   : > { %s7189_s28 = sld [smem:[#allocation34_spill]] (!%p5819_p10) }
  0xc2   : > { %5597 = dma.done.wait (%p220_p5), [#allocation4], 128  }
  0xc3   : > { %5599 = vsyncadd (%p220_p5), [#allocation4], 4294967168  ;;  %s7190_s2 = sld [smem:[#allocation32_spill]] }
  0xc5   : > { %s840_s29 = sand.u32 1, %s7189_s28  }
  0xc6   : > { %s841_s23 = scalar_lea.sflag [#allocation7], %s840_s29 }
  0xc9   : > { %s6032_s15 = sand.u32 1, %s7190_s2  }
  0xca   : > { %5601 = dma.done.wait (%p5814_p8), %s841_s23, 1040  }
  0xcb   : > { %5603 = vsyncadd (%p5814_p8), %s841_s23, 4294966256  ;;  %s4308_s4 = sshll.u32 %s6032_s15, 6  ;;  %s860_s1 = scalar_lea.sflag [#allocation10], %s840_s29 }
  0xcc   : > { %s6040_s13 = scalar_lea.vmem [#allocation8], %s4308_s4 }
  0xcd   : > { %5605 = dma.done.wait (%p5814_p8), %s860_s1, 32  }
  0xce   : > { %5607 = vsyncadd (%p5814_p8), %s860_s1, 4294967264  ;;  %s878_s30 = scalar_lea.sflag [#allocation13], %s840_s29 }
  0xcf   : > { %5609 = dma.done.wait (%p5814_p8), %s878_s30, 4112  }
  0xd0   : > { %5611 = vsyncadd (%p5814_p8), %s878_s30, 4294963184  ;;  %s4309_s3 = sshll.u32 %s6032_s15, 8  ;;  %s897_s5 = scalar_lea.sflag [#allocation16], %s840_s29 }
  0xd1   : > { %s6054_s11 = scalar_lea.vmem [#allocation14], %s4309_s3  ;;  %s6056_s24 = scalar_lea.vmem [#allocation15], %s4309_s3 }
  0xd2   : > { %5613 = dma.done.wait (%p5814_p8), %s897_s5, 4112  }
  0xd3   : > { %5615 = vsyncadd (%p5814_p8), %s897_s5, 4294963184 }
  0xd4   : > { %5617 = dma.done.wait (%p220_p5), [#allocation19], 32  }
  0xd5   : > { %5619 = vsyncadd (%p220_p5), [#allocation19], 4294967264 }
  0xd6   : > { %5621 = dma.done.wait (%p220_p5), [#allocation22], 1024  }
  0xd7   : > { %5623 = vsyncadd (%p220_p5), [#allocation22], 4294966272  ;;  %p1025_p10 = scmp.lt.s32.totalorder %s7189_s28, 3  ;;  %s7193_s1 = sld [smem:[#allocation47_spill]] }
  0xd8   : > { %s7194_s25 = sld [smem:[#allocation51_spill]] }
  0xd9   : > { %s6073_s8 = scalar_select %p1025_p10, %s7189_s28, 3 }
  0xda   : > { %s7195_s21 = sld [smem:[#allocation48_spill]] }
  0xdb   : > { %s4932_s2 = smul.u32 192, %s6073_s8  ;;  %s4315_s29 = sshll.u32 %s6073_s8, 2 }
  0xdc   : > { %s4933_s26 = smul.u32 3, %s6073_s8  ;;  %s7196_s6 = sld [smem:[#allocation40_spill]] (!%p4292_p9) }
  0xdd   : > { %s6085_s30 = scalar_lea.vmem %s7193_s1, %s4932_s2  ;;  %1045 = sbr.rel (%p4292_p9) target bundleno = 671 (0x29f), region = 156 }
  0xde   : > { %s6090_s22 = scalar_lea.vmem %s7194_s25, %s4315_s29  ;;  %s7197_s29 = sld [smem:[#allocation39_spill]] (!%p4292_p9) }
  0xdf   : > { %s7198_s23 = sld [smem:[#allocation41_spill]] (!%p4292_p9) }
  0xe0   : > { %s6095_s9 = scalar_lea.vmem %s7195_s21, %s4933_s26  ;;  %s7199_s25 = sld [smem:[#allocation43_spill]] (!%p4292_p9) }
  0xe1   : > { %s7200_s28 = sld [smem:[#allocation44_spill]] (!%p4292_p9) }
  0xe2   : > { %v4823_v0 = vld [vmem:[%s7196_s6 + $0x38] sm:$0xff]  ;;  %v4822_v2 = vld [vmem:[%s7196_s6 + $0x30] sm:$0xff]  ;;  %v4821_v6 = vld [vmem:[%s7196_s6 + $0x28] sm:$0xff]  ;;  %vm1067_vm0 = vcmask 1041408   ;;  %vm1176_vm1 = vcmask 523264   ;;  %v5652_v29 = vmov 0.0  }
  0xe3   : > { %v4827_v1 = vld [vmem:[%s7196_s6 + $0x58] sm:$0xff]  ;;  %1179 = vmatpush.bf16.msra.mxu0 %v4823_v0  ;;  %v4826_v3 = vld [vmem:[%s7196_s6 + $0x50] sm:$0xff]  ;;  %v4825_v7 = vld [vmem:[%s7196_s6 + $0x48] sm:$0xff]  ;;  %1227 = vst [vmem:[#allocation2 + $0x5] sm:$0x7] %v5652_v29  ;;  %v5653_v41 = vmov 128.0  }
  0xe4   : > { %1196 = vmatpush.bf16.msra.mxu1 %v4827_v1  ;;  %v1046_v4 = vld [vmem:[%s7197_s29] sm:$0xff]  ;;  %v1047_v5 = vld [vmem:[%s7197_s29 + $0x8] sm:$0xff]  ;;  %v4819_v16 = vld [vmem:[%s7196_s6 + $0x18] sm:$0xff]  ;;  %1228 = vst [vmem:[#allocation2 + $0xd] sm:$0x7] %v5652_v29  ;;  %5070 = vrcp.f32 %v5653_v41 }
  0xe5   : > { %1050 = vst [vmem:[#allocation1] ss:$2 sm:$0xff] %v1046_v4  ;;  %v4820_v8 = vld [vmem:[%s7196_s6 + $0x20] sm:$0xff]  ;;  %v4818_v21 = vld [vmem:[%s7196_s6 + $0x10] sm:$0xff]  ;;  %v4817_v22 = vld [vmem:[%s7196_s6 + $0x8] sm:$0xff] }
  0xe6   : > { %1054 = vst [vmem:[#allocation1 + $0x10] ss:$2 sm:$0xff] %v1047_v5  ;;  %v4824_v9 = vld [vmem:[%s7196_s6 + $0x40] sm:$0xff]  ;;  %v1208_v26 = vld [vmem:[#allocation3] sm:$0xff] }
  0xe7   : > { %1180 = vmatpush.bf16.msra.mxu0 %v4822_v2  ;;  %v4816_v24 = vld [vmem:[%s7196_s6] sm:$0xff]  ;;  %v4366_v31 = vrot.slane %v1208_v26, 9 }
  0xe8   : > { %1197 = vmatpush.bf16.msra.mxu1 %v4826_v3  ;;  %v1209_v27 = vld [vmem:[%s7198_s23] sm:$0x1] }
  0xe9   : > { %v1210_v28 = vadd.f32 %v1209_v27, %v1208_v26 }
  0xea   : > { %v5071_v42 = vpop.eup %5070 }
  0xeb   : > { %1181 = vmatpush.bf16.msra.mxu0 %v4821_v6  ;;  %1211 = vst [vmem:[#allocation2] sm:$0x1] %v1210_v28  ;;  %v1238_v43 = vmul.f32 128.0, %v5071_v42  ;;  %vm1242_vm2 = vweird.f32 %v5071_v42  ;;  %v5068_v6 = vld [vmem:[%s7199_s25] ss:$0 sm:$0xff] }
  0xec   : > { %1198 = vmatpush.bf16.msra.mxu1 %v4825_v7  ;;  %v1051_v10 = vld.sshfl [vmem:[#allocation1] sm:$0xff pattern:$0x75316420]  ;;  %v1052_v11 = vld.sshfl [vmem:[#allocation1 + $0x8] sm:$0xff pattern:$0x75316420] }
  0xed   : > { %v1055_v12 = vld.sshfl [vmem:[#allocation1 + $0x10] sm:$0xff pattern:$0x75316420]  ;;  %v1056_v13 = vld.sshfl [vmem:[#allocation1 + $0x18] sm:$0xff pattern:$0x75316420]  ;;  %v1061_v14 = vpack.c.bf16 %v1052_v11, %v1051_v10 }
  0xee   : > { %v1062_v15 = vpack.c.bf16 %v1056_v13, %v1055_v12  ;;  %1212 = vst [vmem:[#allocation2 + $0x8] sm:$0x1] %v1210_v28  ;;  %v1239_v44 = vsub.f32 1.0, %v1238_v43 }
  0xef   : > { %1182 = vmatpush.bf16.msra.mxu0 %v4820_v8  ;;  %v1065_v17 = vrot.slane %v1061_v14, 2 }
  0xf0   : > { %1199 = vmatpush.bf16.msra.mxu1 %v4824_v9  ;;  %v1066_v18 = vrot.slane %v1062_v15, 2  ;;  %v1240_v45 = vmul.f32 %v5071_v42, %v1239_v44  ;;  %v5069_v9 = vld [vmem:[%s7200_s28] ss:$0 sm:$0xff] }
  0xf1   : > { %v1070_v19 = vsel %vm1067_vm0, %v1061_v14, %v1065_v17 }
  0xf2   : > { %v1073_v20 = vsel %vm1067_vm0, %v1062_v15, %v1066_v18  ;;  %1098 = vst [vmem:[#allocation1] ss:$4 sm:$0xff] %v1070_v19  ;;  %v1241_v46 = vadd.f32 %v5071_v42, %v1240_v45 }
  0xf3   : > { %1183 = vmatpush.bf16.msra.mxu0 %v4819_v16  ;;  %1100 = vst [vmem:[#allocation1 + $0x1] ss:$4 sm:$0xff] %v1073_v20 }
  0xf4   : > { %v1243_v47 = vsel %vm1242_vm2, %v5071_v42, %v1241_v46 }
  0xf7   : > { %1184 = vmatpush.bf16.msra.mxu0 %v4818_v21 }
  0xfa   : > { %v1102_v23 = vld.sshfl [vmem:[#allocation1 + $0x8] sm:$0xff pattern:$0x73625140]  ;;  %v1101_v25 = vld.sshfl [vmem:[#allocation1] sm:$0xff pattern:$0x73625140] }
  0xfb   : > { %4365 = vmatmul.msk.bf16.vlgmr.msra.gmra.mxu1 %vm1176_vm1, %v1102_v23  ;;  %1185 = vmatpush.bf16.msra.mxu0 %v4817_v22 }
  0xff   : > { %1186 = vmatpush.bf16.msra.mxu0 %v4816_v24 }
 0x102   : > { %1187 = vmatmul.bf16.vlgmr.msra.gmra.mxu0 %v1101_v25 }
 0x178   : > { %v1201_v30 = vpop.f32.mrf.mxu1 }
 0x17f   : > { %v1188_v32 = vpop.f32.mrf.mxu0 }
 0x180   : > { %v1202_v33 = vadd.f32 %v1201_v30, %v1188_v32  ;;  %v1203_v34 = vpop.f32.mrf.mxu1 }
 0x182   : > { %v1206_v35 = vrot.slane %v1202_v33, 4  ;;  %v1223_v36 = vadd.f32 %v4366_v31, %v1202_v33 }
 0x184   : > { %v1224_v37 = vadd.f32 %v4366_v31, %v1206_v35  ;;  %1225 = vst [vmem:[#allocation2 + $0x1] sm:$0xf] %v1223_v36 }
 0x186   : > { %1226 = vst [vmem:[#allocation2 + $0x9] sm:$0xf] %v1224_v37 }
 0x187   : > { %v1190_v38 = vpop.f32.mrf.mxu0 }
 0x18b   : > { %v1229_v39 = vld [vmem:[#allocation2] sm:$0xff] }
 0x18c   : > { %1233 = vadd.xlane.f32.xlu0 %v1229_v39 }
 0x18d   : > { %v1230_v40 = vld [vmem:[#allocation2 + $0x8] sm:$0xff] }
 0x194   : > { %1235 = vadd.xlane.f32.xlu0 %v1230_v40 }
 0x1ff   : > { %v1234_v48 = vpop.xlane.xlu0 %1233 }
 0x200   : > { %v1244_v49 = vmul.f32 %v1243_v47, %v1234_v48 }
 0x202   : > { %v1246_v50 = vsub.f32 %v1229_v39, %v1244_v49 }
 0x204   : > { %v1248_v51 = vmul.f32 %v1246_v50, %v1246_v50 }
 0x206   : > { %1250 = vadd.xlane.f32.xlu1 %v1248_v51 }
 0x207   : > { %v1236_v52 = vpop.xlane.xlu0 %1235 }
 0x208   : > { %v1245_v53 = vmul.f32 %v1243_v47, %v1236_v52 }
 0x20a   : > { %v1247_v54 = vsub.f32 %v1230_v40, %v1245_v53 }
 0x20c   : > { %v1249_v55 = vmul.f32 %v1247_v54, %v1247_v54 }
 0x20e   : > { %1252 = vadd.xlane.f32.xlu1 %v1249_v55 }
 0x279   : > { %v1251_v56 = vpop.xlane.xlu1 %1250 }
 0x27a   : > { %v1254_v57 = vmul.f32 %v1251_v56, %v1243_v47 }
 0x27c   : > { %v1256_v58 = vadd.f32 1e-05, %v1254_v57 }
 0x27e   : > { %5072 = vrsqrt.f32 %v1256_v58  ;;  %vm1264_vm4 = vweird.f32 %v1256_v58 }
 0x281   : > { %v1253_v59 = vpop.xlane.xlu1 %1252 }
 0x282   : > { %v1255_v60 = vmul.f32 %v1253_v59, %v1243_v47 }
 0x284   : > { %v5073_v61 = vpop.eup %5072  ;;  %v1257_v62 = vadd.f32 1e-05, %v1255_v60 }
 0x285   : > { %v1259_v63 = vmul.f32 %v5073_v61, %v1256_v58  ;;  %vm1265_vm3 = vweird.f32 %v5073_v61 }
 0x286   : > { %5074 = vrsqrt.f32 %v1257_v62  ;;  %vm1266_vm5 = vmor %vm1264_vm4, %vm1265_vm3  ;;  %vm1274_vm7 = vweird.f32 %v1257_v62 }
 0x287   : > { %v1260_v0 = vmul.f32 %v5073_v61, %v1259_v63 }
 0x289   : > { %v1261_v1 = vmul.f32 0.5, %v1260_v0 }
 0x28b   : > { %v1262_v2 = vsub.f32 1.5, %v1261_v1 }
 0x28c   : > { %v5075_v3 = vpop.eup %5074 }
 0x28d   : > { %v1263_v4 = vmul.f32 %v5073_v61, %v1262_v2  ;;  %v1269_v5 = vmul.f32 %v5075_v3, %v1257_v62  ;;  %vm1275_vm6 = vweird.f32 %v5075_v3 }
 0x28e   : > { %vm1276_vm8 = vmor %vm1274_vm7, %vm1275_vm6 }
 0x28f   : > { %v1267_v7 = vsel %vm1266_vm5, %v5073_v61, %v1263_v4  ;;  %v1270_v8 = vmul.f32 %v5075_v3, %v1269_v5 }
 0x290   : > { %v1278_v10 = vmul.f32 %v1267_v7, %v1246_v50 }
 0x291   : > { %v1271_v11 = vmul.f32 0.5, %v1270_v8 }
 0x292   : > { %v1283_v12 = vmul.f32 %v5068_v6, %v1278_v10 }
 0x293   : > { %v1272_v13 = vsub.f32 1.5, %v1271_v11 }
 0x294   : > { %v1288_v14 = vadd.f32 %v5069_v9, %v1283_v12 }
 0x295   : > { %v1273_v15 = vmul.f32 %v5075_v3, %v1272_v13 }
 0x296   : > { %1290 = vst [vmem:[#allocation2] sm:$0xff] %v1288_v14 }
 0x297   : > { %v1277_v16 = vsel %vm1276_vm8, %v5075_v3, %v1273_v15 }
 0x298   : > { %v1279_v17 = vmul.f32 %v1277_v16, %v1247_v54 }
 0x29a   : > { %v1284_v18 = vmul.f32 %v5068_v6, %v1279_v17 }
 0x29c   : > { %v1289_v19 = vadd.f32 %v5069_v9, %v1284_v18 }
 0x29e   : > { %1291 = vst [vmem:[#allocation2 + $0x8] sm:$0xff] %v1289_v19 }
 0x29f PF: > { %v1292_v20 = vld [vmem:[#allocation2] sm:$0xff]  ;;  %v5654_v22 = vmov 128.0   ;;  %v4850_v38 = vld [vmem:[%s6085_s30 + $0xb0] sm:$0xf0]  ;;  %v4456_v41 = vld [vmem:[%s6085_s30 + $0xb4] sm:$0xf0] }
 0x2a0   : > { %1296 = vadd.xlane.f32.xlu0 %v1292_v20  ;;  %5112 = vrcp.f32 %v5654_v22  ;;  %v4454_v37 = vld [vmem:[%s6085_s30 + $0xa8] sm:$0xf]  ;;  %v4849_v39 = vld [vmem:[%s6085_s30 + $0xac] sm:$0xf]  ;;  %v4462_v42 = vld [vmem:[%s6085_s30 + $0xb0] sm:$0xf] }
 0x2a1   : > { %v4455_v40 = vor.u32 %v4850_v38, %v4454_v37  ;;  %v4851_v43 = vld [vmem:[%s6085_s30 + $0xb8] sm:$0xf0]  ;;  %v4459_v44 = vor.u32 %v4849_v39, %v4456_v41  ;;  %v4442_v46 = vld [vmem:[%s6085_s30 + $0x90] sm:$0xf]  ;;  %v4846_v48 = vld [vmem:[%s6085_s30 + $0x94] sm:$0xf] }
 0x2a2   : > { %v4463_v45 = vor.u32 %v4851_v43, %v4462_v42  ;;  %v4847_v47 = vld [vmem:[%s6085_s30 + $0x98] sm:$0xf0]  ;;  %v4444_v50 = vld [vmem:[%s6085_s30 + $0x9c] sm:$0xf0]  ;;  %v4450_v51 = vld [vmem:[%s6085_s30 + $0x98] sm:$0xf] }
 0x2a3   : > { %1522 = vmatpush.bf16.msra.mxu0 %v4455_v40  ;;  %1536 = vmatpush.bf16.msra.mxu1 %v4459_v44  ;;  %v4443_v49 = vor.u32 %v4847_v47, %v4442_v46  ;;  %v4848_v52 = vld [vmem:[%s6085_s30 + $0xa0] sm:$0xf0]  ;;  %v4447_v53 = vor.u32 %v4846_v48, %v4444_v50  ;;  %v4430_v55 = vld [vmem:[%s6085_s30 + $0x78] sm:$0xf]  ;;  %v4843_v57 = vld [vmem:[%s6085_s30 + $0x7c] sm:$0xf] }
 0x2a4   : > { %1550 = vmatpush.bf16.msra.mxu2 %v4463_v45  ;;  %v4451_v54 = vor.u32 %v4848_v52, %v4450_v51  ;;  %v4844_v56 = vld [vmem:[%s6085_s30 + $0x80] sm:$0xf0]  ;;  %v4432_v59 = vld [vmem:[%s6085_s30 + $0x84] sm:$0xf0]  ;;  %v4438_v60 = vld [vmem:[%s6085_s30 + $0x80] sm:$0xf] }
 0x2a5   : > { %v1293_v21 = vld [vmem:[#allocation2 + $0x8] sm:$0xff]  ;;  %v4431_v58 = vor.u32 %v4844_v56, %v4430_v55  ;;  %v4845_v61 = vld [vmem:[%s6085_s30 + $0x88] sm:$0xf0]  ;;  %v4435_v62 = vor.u32 %v4843_v57, %v4432_v59  ;;  %v4418_v0 = vld [vmem:[%s6085_s30 + $0x60] sm:$0xf]  ;;  %s7201_s18 = sld [smem:[#allocation45_spill]] }
 0x2a6   : > { %v5113_v23 = vpop.eup %5112  ;;  %v4439_v63 = vor.u32 %v4845_v61, %v4438_v60  ;;  %v4841_v1 = vld [vmem:[%s6085_s30 + $0x68] sm:$0xf0]  ;;  %v4840_v2 = vld [vmem:[%s6085_s30 + $0x64] sm:$0xf]  ;;  %v4420_v4 = vld [vmem:[%s6085_s30 + $0x6c] sm:$0xf0] }
 0x2a7   : > { %v1301_v24 = vmul.f32 128.0, %v5113_v23  ;;  %vm1305_vm9 = vweird.f32 %v5113_v23  ;;  %1523 = vmatpush.bf16.msra.mxu0 %v4443_v49  ;;  %1537 = vmatpush.bf16.msra.mxu1 %v4447_v53  ;;  %v4419_v3 = vor.u32 %v4841_v1, %v4418_v0  ;;  %v4426_v5 = vld [vmem:[%s6085_s30 + $0x68] sm:$0xf]  ;;  %v4842_v6 = vld [vmem:[%s6085_s30 + $0x70] sm:$0xf0]  ;;  %v4423_v7 = vor.u32 %v4840_v2, %v4420_v4  ;;  %s7203_s3 = scalar_lea.vmem [#allocation6], %s6032_s15 }
 0x2a8   : > { %1298 = vadd.xlane.f32.xlu0 %v1293_v21  ;;  %1551 = vmatpush.bf16.msra.mxu2 %v4451_v54  ;;  %v4427_v8 = vor.u32 %v4842_v6, %v4426_v5  ;;  %v4406_v9 = vld [vmem:[%s6085_s30 + $0x48] sm:$0xf]  ;;  %v4838_v10 = vld [vmem:[%s6085_s30 + $0x50] sm:$0xf0]  ;;  %v4837_v11 = vld [vmem:[%s6085_s30 + $0x4c] sm:$0xf] }
 0x2a9   : > { %v1302_v25 = vsub.f32 1.0, %v1301_v24  ;;  %v4407_v12 = vor.u32 %v4838_v10, %v4406_v9  ;;  %v4408_v13 = vld [vmem:[%s6085_s30 + $0x54] sm:$0xf0]  ;;  %v4414_v14 = vld [vmem:[%s6085_s30 + $0x50] sm:$0xf]  ;;  %s5656_s5 = smov 96  }
 0x2aa   : > { %v4839_v15 = vld [vmem:[%s6085_s30 + $0x58] sm:$0xf0]  ;;  %v4411_v16 = vor.u32 %v4837_v11, %v4408_v13  ;;  %v4394_v18 = vld [vmem:[%s6085_s30 + $0x30] sm:$0xf]  ;;  %v4396_v22 = vld [vmem:[%s6085_s30 + $0x3c] sm:$0xf0] }
 0x2ab   : > { %v1303_v26 = vmul.f32 %v5113_v23, %v1302_v25  ;;  %1524 = vmatpush.bf16.msra.mxu0 %v4431_v58  ;;  %1538 = vmatpush.bf16.msra.mxu1 %v4435_v62  ;;  %v4415_v17 = vor.u32 %v4839_v15, %v4414_v14  ;;  %v4835_v19 = vld [vmem:[%s6085_s30 + $0x38] sm:$0xf0]  ;;  %v4836_v24 = vld [vmem:[%s6085_s30 + $0x40] sm:$0xf0]  ;;  %v4370_v39 = vld [vmem:[%s6085_s30] sm:$0xf]  ;;  %s7202_s1 = scalar_lea.vmem %s7201_s18, %s6073_s8 }
 0x2ac   : > { %1552 = vmatpush.bf16.msra.mxu2 %v4439_v63  ;;  %v4829_v40 = vld [vmem:[%s6085_s30 + $0x8] sm:$0xf0]  ;;  %v4828_v41 = vld [vmem:[%s6085_s30 + $0x4] sm:$0xf]  ;;  %v4372_v44 = vld [vmem:[%s6085_s30 + $0xc] sm:$0xf0] }
 0x2ad   : > { %v1304_v27 = vadd.f32 %v5113_v23, %v1303_v26  ;;  %v4371_v43 = vor.u32 %v4829_v40, %v4370_v39  ;;  %v4378_v45 = vld [vmem:[%s6085_s30 + $0x8] sm:$0xf]  ;;  %v4830_v46 = vld [vmem:[%s6085_s30 + $0x10] sm:$0xf0]  ;;  %v4375_v48 = vor.u32 %v4828_v41, %v4372_v44  ;;  %s5655_s8 = smov 32   ;;  %vm1587_vm0 = vcmask 1047556  }
 0x2ae   : > { %v4379_v49 = vor.u32 %v4830_v46, %v4378_v45  ;;  %v5659_v39 = vmov 1934713408   ;;  %vm2311_vm1 = vcmask 261120   ;;  %vm2477_vm3 = vcmask 64512   ;;  %s7206_s21 = scalar_lea.vmem [#allocation12], %s6032_s15 }
 0x2af   : > { %v6150_v28 = vsel %vm1305_vm9, %v5113_v23, %v1304_v27  ;;  %1525 = vmatpush.bf16.msra.mxu0 %v4419_v3  ;;  %1539 = vmatpush.bf16.msra.mxu1 %v4423_v7  ;;  %v4402_v23 = vld [vmem:[%s6085_s30 + $0x38] sm:$0xf]  ;;  %v5106_v3 = vld [vmem:[%s7202_s1] ss:$0 sm:$0xff]  ;;  %v1616_v40 = vunpack.c.l.s4 %v5659_v39  ;;  %vm2577_vm4 = vcmask 1043456   ;;  %vm2973_vm5 = vcmask 523264  }
 0x2b0   : > { %1553 = vmatpush.bf16.msra.mxu2 %v4427_v8  ;;  %v4403_v26 = vor.u32 %v4836_v24, %v4402_v23  ;;  %v4382_v27 = vld [vmem:[%s6085_s30 + $0x18] sm:$0xf]  ;;  %v5107_v8 = vld [vmem:[%s7203_s3] ss:$0 sm:$0xff]  ;;  %vm2976_vm6 = vcmask 785408  }
 0x2b3   : > { %1526 = vmatpush.bf16.msra.mxu0 %v4407_v12  ;;  %1540 = vmatpush.bf16.msra.mxu1 %v4411_v16 }
 0x2b4   : > { %1554 = vmatpush.bf16.msra.mxu2 %v4415_v17 }
 0x2b8   : > { %1555 = vmatpush.bf16.msra.mxu2 %v4403_v26  ;;  %v5658_v26 = vmov 1983009808  }
 0x313   : > { %v1297_v29 = vpop.xlane.xlu0 %1296 }
 0x314   : > { %v1307_v30 = vmul.f32 %v6150_v28, %v1297_v29  ;;  %v4832_v29 = vld [vmem:[%s6085_s30 + $0x20] sm:$0xf0] }
 0x316   : > { %v6153_v31 = vsub.f32 %v1292_v20, %v1307_v30  ;;  %v4834_v20 = vld [vmem:[%s6085_s30 + $0x34] sm:$0xf]  ;;  %v4831_v30 = vld [vmem:[%s6085_s30 + $0x1c] sm:$0xf] }
 0x317   : > { %v4399_v25 = vor.u32 %v4834_v20, %v4396_v22 }
 0x318   : > { %v1311_v32 = vmul.f32 %v6153_v31, %v6153_v31 }
 0x319   : > { %1541 = vmatpush.bf16.msra.mxu1 %v4399_v25 }
 0x31a   : > { %1313 = vadd.xlane.f32.xlu1 %v1311_v32  ;;  %v4383_v32 = vor.u32 %v4832_v29, %v4382_v27  ;;  %v1592_v27 = vunpack.c.l.s4 %v5658_v26 }
 0x31b   : > { %v1299_v33 = vpop.xlane.xlu0 %1298 }
 0x31c   : > { %v1308_v34 = vmul.f32 %v6150_v28, %v1299_v33  ;;  %v4384_v33 = vld [vmem:[%s6085_s30 + $0x24] sm:$0xf0] }
 0x31d   : > { %v4387_v37 = vor.u32 %v4831_v30, %v4384_v33  ;;  %v6248_v33 = vunpack.c.0.s8 %v1592_v27 }
 0x31e   : > { %v6158_v35 = vsub.f32 %v1293_v21, %v1308_v34  ;;  %v4395_v21 = vor.u32 %v4835_v19, %v4394_v18  ;;  %v4390_v34 = vld [vmem:[%s6085_s30 + $0x20] sm:$0xf] }
 0x31f   : > { %1542 = vmatpush.bf16.msra.mxu1 %v4387_v37 }
 0x320   : > { %v1312_v36 = vmul.f32 %v6158_v35, %v6158_v35  ;;  %1527 = vmatpush.bf16.msra.mxu0 %v4395_v21 }
 0x322   : > { %1315 = vadd.xlane.f32.xlu1 %v1312_v36  ;;  %v4833_v36 = vld [vmem:[%s6085_s30 + $0x28] sm:$0xf0] }
 0x323   : > { %v4391_v38 = vor.u32 %v4833_v36, %v4390_v34  ;;  %1543 = vmatpush.bf16.msra.mxu1 %v4375_v48 }
 0x324   : > { %1528 = vmatpush.bf16.msra.mxu0 %v4383_v32 }
 0x325   : > { %1556 = vmatpush.bf16.msra.mxu2 %v4391_v38 }
 0x328   : > { %1529 = vmatpush.bf16.msra.mxu0 %v4371_v43 }
 0x329   : > { %1557 = vmatpush.bf16.msra.mxu2 %v4379_v49 }
 0x38d   : > { %v1314_v42 = vpop.xlane.xlu1 %1313 }
 0x38e   : > { %v1317_v47 = vmul.f32 %v1314_v42, %v6150_v28 }
 0x390   : > { %v1319_v50 = vadd.f32 1e-05, %v1317_v47  ;;  %v6257_v47 = vunpack.c.0.s8 %v1616_v40 }
 0x392   : > { %5114 = vrsqrt.f32 %v1319_v50  ;;  %vm1327_vm11 = vweird.f32 %v1319_v50 }
 0x395   : > { %v1316_v51 = vpop.xlane.xlu1 %1315 }
 0x396   : > { %v1318_v52 = vmul.f32 %v1316_v51, %v6150_v28 }
 0x398   : > { %v5115_v53 = vpop.eup %5114  ;;  %v1320_v54 = vadd.f32 1e-05, %v1318_v52 }
 0x399   : > { %v1322_v55 = vmul.f32 %v5115_v53, %v1319_v50  ;;  %vm1328_vm10 = vweird.f32 %v5115_v53 }
 0x39a   : > { %5116 = vrsqrt.f32 %v1320_v54  ;;  %vm1329_vm12 = vmor %vm1327_vm11, %vm1328_vm10  ;;  %vm1337_vm14 = vweird.f32 %v1320_v54 }
 0x39b   : > { %v1323_v56 = vmul.f32 %v5115_v53, %v1322_v55 }
 0x39d   : > { %v1324_v57 = vmul.f32 0.5, %v1323_v56 }
 0x39f   : > { %v1325_v58 = vsub.f32 1.5, %v1324_v57 }
 0x3a0   : > { %v5117_v59 = vpop.eup %5116 }
 0x3a1   : > { %v1326_v60 = vmul.f32 %v5115_v53, %v1325_v58  ;;  %v1332_v61 = vmul.f32 %v5117_v59, %v1320_v54  ;;  %vm1338_vm13 = vweird.f32 %v5117_v59 }
 0x3a2   : > { %vm1339_vm15 = vmor %vm1337_vm14, %vm1338_vm13 }
 0x3a3   : > { %v1333_v62 = vmul.f32 %v5117_v59, %v1332_v61  ;;  %v1330_v63 = vsel %vm1329_vm12, %v5115_v53, %v1326_v60 }
 0x3a4   : > { %v1341_v2 = vmul.f32 %v1330_v63, %v6153_v31  ;;  %v6222_v31 = vld [vmem:[%s6095_s9] sm:$0x7]  ;;  %s5657_s9 = smov 64  }
 0x3a5   : > { %v1334_v0 = vmul.f32 0.5, %v1333_v62  ;;  %v1388_v13 = vperm.slane %v6222_v31, 0  ;;  %v1389_v14 = vperm.slane %v6222_v31, 1 }
 0x3a6   : > { %v1346_v7 = vmul.f32 %v5106_v3, %v1341_v2 }
 0x3a7   : > { %v1335_v1 = vsub.f32 1.5, %v1334_v0 }
 0x3a8   : > { %v1351_v10 = vadd.f32 %v5107_v8, %v1346_v7 }
 0x3a9   : > { %v1336_v4 = vmul.f32 %v5117_v59, %v1335_v1 }
 0x3ab   : > { %v1340_v5 = vsel %vm1339_vm15, %v5117_v59, %v1336_v4 }
 0x3ac   : > { %v1342_v6 = vmul.f32 %v1340_v5, %v6158_v35 }
 0x3ae   : > { %v1347_v9 = vmul.f32 %v5106_v3, %v1342_v6 }
 0x3b0   : > { %v1352_v11 = vadd.f32 %v5107_v8, %v1347_v9 }
 0x3b2   : > { %v1353_v12 = vpack.c.bf16 %v1352_v11, %v1351_v10 }
 0x3b4   : > { %1530 = vmatmul.bf16.vlgmr.msra.gmra.mxu0 %v1353_v12  ;;  %1544 = vmatmul.bf16.vlgmr.msra.gmra.mxu1 %v1353_v12 }
 0x3b5   : > { %1558 = vmatmul.bf16.vlgmr.msra.gmra.mxu2 %v1353_v12 }
 0x431   : > { %v1531_v15 = vpop.f32.mrf.mxu0  ;;  %v1545_v16 = vpop.f32.mrf.mxu1 }
 0x432   : > { %v1532_v17 = vadd.f32 %v1531_v15, %v1388_v13  ;;  %v1546_v35 = vadd.f32 %v1545_v16, %v1389_v14 }
 0x434   : > { %v1564_v18 = vmul.f32 0.17677669, %v1532_v17  ;;  %1829 = vrot.lane.b32.xlu0 %v1546_v35, %s5655_s8  ;;  %1817 = vrot.lane.b32.xlu2 %v1546_v35, %s5656_s5  ;;  %v1837_v32 = vrot.slane %v1546_v35, 4 }
 0x436   : > { %1568 = vrot.lane.b32.xlu1 %v1564_v18, %s5656_s5  ;;  %v1589_v37 = vrot.slane %v1564_v18, 4 }
 0x439   : > { %v1533_v19 = vpop.f32.mrf.mxu0  ;;  %v1547_v20 = vpop.f32.mrf.mxu1 }
 0x43a   : > { %v1534_v21 = vadd.f32 %v1533_v19, %v1388_v13  ;;  %v6229_v22 = vadd.f32 %v1547_v20, %v1389_v14 }
 0x43c   : > { %v6231_v23 = vmul.f32 0.17677669, %v1534_v21  ;;  %1825 = vrot.lane.b32.xlu0 %v6229_v22, %s5657_s9  ;;  %1823 = vrot.lane.b32.xlu2 %v1546_v35, %s5657_s9  ;;  %v1893_v27 = vrot.slane %v6229_v22, 4 }
 0x43e   : > { %1570 = vrot.lane.b32.xlu1 %v6231_v23, %s5656_s5 }
 0x444   : > { %1576 = vrot.lane.b32.xlu0 %v6231_v23, %s5657_s9  ;;  %1574 = vrot.lane.b32.xlu2 %v1564_v18, %s5657_s9 }
 0x44c   : > { %1580 = vrot.lane.b32.xlu2 %v1564_v18, %s5655_s8 }
 0x454   : > { %1819 = vrot.lane.b32.xlu2 %v6229_v22, %s5656_s5 }
 0x45c   : > { %1831 = vrot.lane.b32.xlu2 %v6229_v22, %s5655_s8 }
 0x464   : > { %1582 = vrot.lane.b32.xlu2 %v6231_v23, %s5655_s8 }
 0x48e   : > { %v1818_v24 = vpop.permute.xlu2 %1817 }
 0x48f   : > { %v1849_v44 = vrot.slane %v1818_v24, 4 }
 0x496   : > { %v1824_v25 = vpop.permute.xlu2 %1823 }
 0x497   : > { %v1835_v29 = vrot.slane %v1824_v25, 4  ;;  %v1838_v36 = vsel %vm1587_vm0, %v1824_v25, %v1837_v32 }
 0x498   : > { %v1846_v42 = vperm.slane %v1838_v36, %v6248_v33 }
 0x499   : > { %v1836_v38 = vsel %vm1587_vm0, %v1835_v29, %v1546_v35  ;;  %v1645_v29 = vrot.slane %v6231_v23, 4 }
 0x49a   : > { %v1842_v45 = vperm.slane %v1836_v38, %v6248_v33  ;;  %v1873_v54 = vrot.slane %v1846_v42, 4 }
 0x49c   : > { %v1861_v57 = vrot.slane %v1842_v45, 4 }
 0x49e   : > { %v1575_v30 = vpop.permute.xlu2 %1574 }
 0x49f   : > { %v1586_v34 = vrot.slane %v1575_v30, 4  ;;  %v1590_v41 = vsel %vm1587_vm0, %v1575_v30, %v1589_v37 }
 0x4a0   : > { %v1598_v46 = vperm.slane %v1590_v41, %v6248_v33 }
 0x4a1   : > { %v1588_v43 = vsel %vm1587_vm0, %v1586_v34, %v1564_v18 }
 0x4a2   : > { %v1594_v50 = vperm.slane %v1588_v43, %v6248_v33  ;;  %v1625_v2 = vrot.slane %v1598_v46, 4 }
 0x4a4   : > { %v1613_v1 = vrot.slane %v1594_v50, 4 }
 0x4a6   : > { %v1830_v48 = vpop.permute.xlu0 %1829  ;;  %v1581_v49 = vpop.permute.xlu2 %1580 }
 0x4a7   : > { %v1847_v51 = vrot.slane %v1830_v48, 4  ;;  %v1850_v52 = vsel %vm1587_vm0, %v1830_v48, %v1849_v44  ;;  %v1599_v53 = vrot.slane %v1581_v49, 4 }
 0x4a8   : > { %v1858_v55 = vperm.slane %v1850_v52, %v6248_v33  ;;  %v1569_v56 = vpop.permute.xlu1 %1568 }
 0x4a9   : > { %v1848_v58 = vsel %vm1587_vm0, %v1847_v51, %v1818_v24  ;;  %v1600_v59 = vsel %vm1587_vm0, %v1599_v53, %v1569_v56  ;;  %v1601_v60 = vrot.slane %v1569_v56, 4 }
 0x4aa   : > { %v1854_v61 = vperm.slane %v1848_v58, %v6248_v33  ;;  %v1871_v62 = vrot.slane %v1858_v55, 4  ;;  %v1874_v63 = vsel %vm1587_vm0, %v1858_v55, %v1873_v54  ;;  %v1606_v0 = vperm.slane %v1600_v59, %v6248_v33 }
 0x4ab   : > { %v1882_v3 = vperm.slane %v1874_v63, %v6257_v47  ;;  %v1602_v4 = vsel %vm1587_vm0, %v1581_v49, %v1601_v60 }
 0x4ac   : > { %v1859_v5 = vrot.slane %v1854_v61, 4  ;;  %v1862_v6 = vsel %vm1587_vm0, %v1854_v61, %v1861_v57  ;;  %v1872_v7 = vsel %vm1587_vm0, %v1871_v62, %v1846_v42  ;;  %v1610_v8 = vperm.slane %v1602_v4, %v6248_v33 }
 0x4ad   : > { %v1870_v9 = vperm.slane %v1862_v6, %v6257_v47  ;;  %v1878_v10 = vperm.slane %v1872_v7, %v6257_v47  ;;  %v1889_v11 = vrot.slane %v1882_v3, 4  ;;  %v1611_v12 = vrot.slane %v1606_v0, 4 }
 0x4ae   : > { %v1860_v13 = vsel %vm1587_vm0, %v1859_v5, %v1842_v45  ;;  %v1614_v14 = vsel %vm1587_vm0, %v1606_v0, %v1613_v1  ;;  %v1623_v15 = vrot.slane %v1610_v8, 4  ;;  %v1826_v16 = vpop.permute.xlu0 %1825  ;;  %v1820_v17 = vpop.permute.xlu2 %1819  ;;  %v1626_v20 = vsel %vm1587_vm0, %v1610_v8, %v1625_v2 }
 0x4af   : > { %v6276_v35 = vrot.slane %v1870_v9, 4  ;;  %v1887_v18 = vrot.slane %v1878_v10, 4  ;;  %v1890_v19 = vsel %vm1587_vm0, 0.0, %v1889_v11  ;;  %v1612_v21 = vsel %vm1587_vm0, %v1611_v12, %v1594_v50 }
 0x4b0   : > { %v1622_v24 = vperm.slane %v1614_v14, %v6257_v47  ;;  %v1866_v25 = vperm.slane %v1860_v13, %v6257_v47  ;;  %v1618_v26 = vperm.slane %v1612_v21, %v6257_v47  ;;  %v1963_v32 = vrot.slane %v1890_v19, 4  ;;  %v1571_v45 = vpop.permute.xlu1 %1570 }
 0x4b1   : > { %v1886_v30 = vsel %vm1587_vm0, 0.0, %v6276_v35  ;;  %v1624_v34 = vsel %vm1587_vm0, %v1623_v15, %v1598_v46  ;;  %v1634_v36 = vperm.slane %v1626_v20, %v6257_v47  ;;  %v1888_v37 = vsel %vm1587_vm0, 0.0, %v1887_v18 }
 0x4b2   : > { %v6292_v38 = vperm.slane %v1624_v34, %v6257_v47  ;;  %v1637_v39 = vrot.slane %v1622_v24, 4  ;;  %v1891_v40 = vrot.slane %v1826_v16, 4  ;;  %v6295_v41 = vsel %vm1587_vm0, %v1889_v11, %v1878_v10 }
 0x4b3   : > { %v1635_v42 = vrot.slane %v1618_v26, 4  ;;  %v6297_v43 = vrot.slane %v1634_v36, 4  ;;  %v1894_v44 = vsel %vm1587_vm0, %v1826_v16, %v1893_v27  ;;  %v1883_v48 = vrot.slane %v1866_v25, 4 }
 0x4b4   : > { %v1952_v46 = vrot.slane %v1886_v30, 4  ;;  %v1638_v49 = vsel %vm1587_vm0, 0.0, %v1637_v39  ;;  %v1639_v50 = vrot.slane %v6292_v38, 4  ;;  %v1964_v51 = vsel %vm1587_vm0, %v1963_v32, %v1888_v37 }
 0x4b5   : > { %v6305_v52 = vsel %vm1587_vm0, 0.0, %v6297_v43  ;;  %v1892_v53 = vsel %vm1587_vm0, %v1891_v40, %v6229_v22  ;;  %v1902_v54 = vperm.slane %v1894_v44, %v6248_v33  ;;  %v1905_v58 = vrot.slane %v1820_v17, 4 }
 0x4b6   : > { %v1577_v55 = vpop.permute.xlu0 %1576  ;;  %v1832_v56 = vpop.permute.xlu2 %1831  ;;  %v1898_v57 = vperm.slane %v1892_v53, %v6248_v33  ;;  %v1657_v59 = vrot.slane %v1571_v45, 4  ;;  %v1636_v61 = vsel %vm1587_vm0, 0.0, %v1635_v42  ;;  %v6313_v62 = vsel %vm1587_vm0, %v1637_v39, %v1618_v26 }
 0x4b7   : > { %v1643_v60 = vrot.slane %v1577_v55, 4  ;;  %v1704_v63 = vrot.slane %v1638_v49, 4  ;;  %v1903_v0 = vrot.slane %v1832_v56, 4  ;;  %v6316_v1 = vsel %vm1587_vm0, 0.0, %v1639_v50 }
 0x4b8   : > { %v1715_v22 = vrot.slane %v6305_v52, 4  ;;  %v1646_v2 = vsel %vm1587_vm0, %v1577_v55, %v1645_v29  ;;  %v1906_v3 = vsel %vm1587_vm0, %v1832_v56, %v1905_v58  ;;  %v1929_v4 = vrot.slane %v1902_v54, 4 }
 0x4b9   : > { %v1904_v5 = vsel %vm1587_vm0, %v1903_v0, %v1820_v17  ;;  %v1914_v6 = vperm.slane %v1906_v3, %v6248_v33  ;;  %v1884_v7 = vsel %vm1587_vm0, 0.0, %v1883_v48  ;;  %v1917_v8 = vrot.slane %v1898_v57, 4 }
 0x4ba   : > { %v1644_v9 = vsel %vm1587_vm0, %v1643_v60, %v6231_v23  ;;  %v1910_v10 = vperm.slane %v1904_v5, %v6248_v33  ;;  %v1953_v11 = vsel %vm1587_vm0, %v1952_v46, %v1884_v7  ;;  %v6329_v12 = vsel %vm1587_vm0, %v1704_v63, %v1636_v61 }
 0x4bb   : > { %v1654_v13 = vperm.slane %v1646_v2, %v6248_v33  ;;  %v1927_v14 = vrot.slane %v1914_v6, 4  ;;  %v1930_v15 = vsel %vm1587_vm0, %v1914_v6, %v1929_v4  ;;  %v1957_v19 = vperm.slane %v1953_v11, %v6248_v33 }
 0x4bc   : > { %v1915_v16 = vrot.slane %v1910_v10, 4  ;;  %v1918_v17 = vsel %vm1587_vm0, %v1910_v10, %v1917_v8  ;;  %v1938_v18 = vperm.slane %v1930_v15, %v6257_v47  ;;  %v1650_v23 = vperm.slane %v1644_v9, %v6248_v33 }
 0x4bd   : > { %v1926_v20 = vperm.slane %v1918_v17, %v6257_v47  ;;  %v1928_v21 = vsel %vm1587_vm0, %v1927_v14, %v1902_v54  ;;  %v1947_v26 = vsel %vm1587_vm0, %v6276_v35, %v1866_v25  ;;  %v1968_v37 = vperm.slane %v1964_v51, %v6248_v33 }
 0x4be   : > { %v1583_v24 = vpop.permute.xlu2 %1582  ;;  %v1916_v27 = vsel %vm1587_vm0, %v1915_v16, %v1898_v57  ;;  %v1934_v29 = vperm.slane %v1928_v21, %v6257_v47  ;;  %v1945_v30 = vrot.slane %v1938_v18, 4  ;;  %v1969_v39 = vrot.slane %v1957_v19, 4 }
 0x4bf   : > { %v1655_v32 = vrot.slane %v1583_v24, 4  ;;  %v6343_v34 = vrot.slane %v1926_v20, 4  ;;  %v1658_v36 = vsel %vm1587_vm0, %v1583_v24, %v1657_v59  ;;  %v1951_v35 = vperm.slane %v1947_v26, %v6248_v33 }
 0x4c0   : > { %v1943_v40 = vrot.slane %v1934_v29, 4  ;;  %v1946_v42 = vsel %vm1587_vm0, 0.0, %v1945_v30  ;;  %v1669_v25 = vrot.slane %v1650_v23, 4  ;;  %v1681_v48 = vrot.slane %v1654_v13, 4 }
 0x4c1   : > { %v1656_v44 = vsel %vm1587_vm0, %v1655_v32, %v1571_v45  ;;  %v6351_v46 = vperm.slane %v1916_v27, %v6257_v47  ;;  %v1962_v49 = vperm.slane %v6295_v41, %v6248_v33  ;;  %v6357_v50 = vsel %vm1587_vm0, 0.0, %v6343_v34 }
 0x4c2   : > { %v2012_v51 = vsel %vm1587_vm0, %v1945_v30, %v1934_v29  ;;  %v1662_v53 = vperm.slane %v1656_v44, %v6248_v33  ;;  %v1666_v45 = vperm.slane %v1658_v36, %v6248_v33  ;;  %v1944_v54 = vsel %vm1587_vm0, 0.0, %v1943_v40 }
 0x4c3   : > { %v2017_v55 = vrot.slane %v1946_v42, 4  ;;  %v1970_v56 = vsel %vm1587_vm0, %v1969_v39, %v1951_v35  ;;  %v1981_v57 = vrot.slane %v1968_v37, 4  ;;  %v1971_v60 = vrot.slane %v1951_v35, 4 }
 0x4c4   : > { %v1667_v58 = vrot.slane %v1662_v53, 4  ;;  %v1670_v59 = vsel %vm1587_vm0, %v1662_v53, %v1669_v25  ;;  %v1679_v41 = vrot.slane %v1666_v45, 4  ;;  %v1682_v63 = vsel %vm1587_vm0, %v1666_v45, %v1681_v48 }
 0x4c5   : > { %v1678_v61 = vperm.slane %v1670_v59, %v6257_v47  ;;  %v1976_v0 = vperm.slane %v1970_v56, %v6257_v47  ;;  %v1982_v2 = vsel %vm1587_vm0, %v1981_v57, %v1962_v49  ;;  %v1690_v5 = vperm.slane %v1682_v63, %v6257_v47 }
 0x4c6   : > { %v1668_v3 = vsel %vm1587_vm0, %v1667_v58, %v1650_v23  ;;  %v1680_v4 = vsel %vm1587_vm0, %v1679_v41, %v1654_v13  ;;  %v1988_v6 = vperm.slane %v1982_v2, %v6257_v47  ;;  %v2018_v7 = vsel %vm1587_vm0, %v2017_v55, %v1944_v54 }
 0x4c7   : > { %v1674_v8 = vperm.slane %v1668_v3, %v6257_v47  ;;  %v1686_v9 = vperm.slane %v1680_v4, %v6257_v47  ;;  %v1693_v10 = vrot.slane %v1678_v61, 4  ;;  %v1939_v11 = vrot.slane %v6351_v46, 4 }
 0x4c8   : > { %v1697_v14 = vrot.slane %v1690_v5, 4  ;;  %v1993_v15 = vrot.slane %v1988_v6, 4  ;;  %v1983_v16 = vrot.slane %v1962_v49, 4  ;;  %v2006_v17 = vrot.slane %v6357_v50, 4 }
 0x4c9   : > { %v6379_v13 = vperm.slane %v2012_v51, %v6248_v33  ;;  %v1695_v18 = vrot.slane %v1686_v9, 4  ;;  %v1972_v23 = vsel %vm1587_vm0, %v1957_v19, %v1971_v60  ;;  %v6383_v20 = vperm.slane %v2018_v7, %v6248_v33 }
 0x4ca   : > { %v1694_v21 = vsel %vm1587_vm0, 0.0, %v1693_v10  ;;  %v1698_v24 = vsel %vm1587_vm0, 0.0, %v1697_v14  ;;  %v1994_v26 = vsel %vm1587_vm0, %v1993_v15, %v1976_v0  ;;  %v1691_v27 = vrot.slane %v1674_v8, 4 }
 0x4cb   : > { %v1696_v29 = vsel %vm1587_vm0, 0.0, %v1695_v18  ;;  %v1769_v30 = vrot.slane %v1698_v24, 4  ;;  %v6390_v32 = vsel %vm1587_vm0, %v1693_v10, %v1674_v8  ;;  %v2055_v36 = vpack.c.bf16 %v1994_v26, %v1994_v26 }
 0x4cc   : > { %v1980_v19 = vperm.slane %v1972_v23, %v6257_v47  ;;  %v1984_v39 = vsel %vm1587_vm0, %v1968_v37, %v1983_v16  ;;  %v1758_v40 = vrot.slane %v1694_v21, 4  ;;  %v1764_v42 = vsel %vm1587_vm0, %v1697_v14, %v1686_v9 }
 0x4cd   : > { %v1992_v44 = vperm.slane %v1984_v39, %v6257_v47  ;;  %v1995_v35 = vrot.slane %v1976_v0, 4  ;;  %v1770_v25 = vsel %vm1587_vm0, %v1769_v30, %v1696_v29  ;;  %v2316_v48 = vsel %vm2311_vm1, %v2055_v36, 0 }
 0x4ce   : > { %v1999_v49 = vrot.slane %v1980_v19, 4  ;;  %v1703_v50 = vperm.slane %v6313_v62, %v6248_v33  ;;  %v1692_v51 = vsel %vm1587_vm0, 0.0, %v1691_v27  ;;  %2325 = vmatpush.bf16.xpose.msra.mxu3 %v2316_v48  ;;  %v1709_v37 = vperm.slane %v6329_v12, %v6248_v33 }
 0x4cf   : > { %v1996_v53 = vsel %vm1587_vm0, %v1988_v6, %v1995_v35  ;;  %v1710_v45 = vsel %vm1587_vm0, %v6297_v43, %v6292_v38  ;;  %v1997_v54 = vrot.slane %v1992_v44, 4  ;;  %v6410_v62 = vperm.slane %v1770_v25, %v6248_v33 }
 0x4d0   : > { %v2000_v55 = vsel %vm1587_vm0, %v1992_v44, %v1999_v49  ;;  %v2056_v56 = vpack.c.bf16 %v1996_v53, %v1996_v53  ;;  %v1714_v57 = vperm.slane %v1710_v45, %v6248_v33  ;;  %v1716_v59 = vsel %vm1587_vm0, %v1715_v22, %v6316_v1 }
 0x4d1   : > { %v2058_v58 = vpack.c.bf16 %v2000_v55, %v2000_v55  ;;  %v1723_v12 = vrot.slane %v1703_v50, 4  ;;  %v1720_v38 = vperm.slane %v1716_v59, %v6248_v33  ;;  %v1721_v43 = vrot.slane %v1709_v37, 4 }
 0x4d2   : > { %v2335_v41 = vsel %vm2311_vm1, %v2056_v56, 0  ;;  %v1735_v60 = vrot.slane %v1714_v57, 4  ;;  %v1759_v61 = vsel %vm1587_vm0, %v1758_v40, %v1692_v51  ;;  %v6420_v63 = vperm.slane %v1764_v42, %v6248_v33 }
 0x4d3   : > { %v2373_v0 = vsel %vm2311_vm1, %v2058_v58, 0  ;;  %v1724_v2 = vsel %vm1587_vm0, %v1709_v37, %v1723_v12  ;;  %v1733_v52 = vrot.slane %v1720_v38, 4  ;;  %v1998_v3 = vsel %vm1587_vm0, %v1997_v54, %v1980_v19 }
 0x4d4   : > { %2382 = vmatpush.bf16.xpose.msrb.mxu0 %v2373_v0  ;;  %v6425_v1 = vperm.slane %v1724_v2, %v6257_v47  ;;  %v1736_v22 = vsel %vm1587_vm0, %v1720_v38, %v1735_v60  ;;  %v1787_v4 = vrot.slane %v6410_v62, 4  ;;  %v1940_v6 = vsel %vm1587_vm0, 0.0, %v1939_v11 }
 0x4d5   : > { %v6431_v5 = vperm.slane %v1736_v22, %v6257_v47  ;;  %v2001_v7 = vsel %vm1587_vm0, %v6343_v34, %v6351_v46  ;;  %v1722_v8 = vsel %vm1587_vm0, %v1721_v43, %v1703_v50  ;;  %v1734_v9 = vsel %vm1587_vm0, %v1733_v52, %v1714_v57 }
 0x4d6   : > { %2344 = vmatpush.bf16.xpose.msrb.mxu3 %v2335_v41  ;;  %v1751_v10 = vrot.slane %v6425_v1, 4  ;;  %v2005_v14 = vperm.slane %v2001_v7, %v6248_v33  ;;  %v6442_v15 = vperm.slane %v1734_v9, %v6257_v47  ;;  %v2057_v16 = vpack.c.bf16 %v1998_v3, %v1998_v3 }
 0x4d7   : > { %v2007_v18 = vsel %vm1587_vm0, %v2006_v17, %v1940_v6  ;;  %v2035_v11 = vrot.slane %v6383_v20, 4  ;;  %v2037_v21 = vrot.slane %v6379_v13, 4  ;;  %v1728_v24 = vperm.slane %v1722_v8, %v6257_v47 }
 0x4d8   : > { %v1752_v23 = vsel %vm1587_vm0, %v6431_v5, %v1751_v10  ;;  %v2011_v34 = vperm.slane %v2007_v18, %v6248_v33  ;;  %v2025_v46 = vrot.slane %v2005_v14, 4  ;;  %v1745_v26 = vrot.slane %v6442_v15, 4 }
 0x4d9   : > { %v1810_v27 = vpack.c.bf16 %v1752_v23, %v1752_v23  ;;  %v2036_v29 = vsel %vm1587_vm0, %v2035_v11, %v6379_v13  ;;  %v2038_v19 = vsel %vm1587_vm0, %v6383_v20, %v2037_v21  ;;  %v1789_v39 = vrot.slane %v6420_v63, 4 }
 0x4da   : > { %v2023_v30 = vrot.slane %v2011_v34, 4  ;;  %v2042_v17 = vperm.slane %v2036_v29, %v6257_v47  ;;  %v2026_v36 = vsel %vm1587_vm0, %v2011_v34, %v2025_v46  ;;  %v1746_v40 = vsel %vm1587_vm0, %v1745_v26, %v1728_v24 }
 0x4db   : > { %4467 = vmatmul.msk.bf16.vlgmr.msrb.gmra.mxu0 %vm2311_vm1, %v1810_v27  ;;  %v2034_v42 = vperm.slane %v2026_v36, %v6257_v47  ;;  %v2046_v44 = vperm.slane %v2038_v19, %v6257_v47  ;;  %v1807_v35 = vpack.c.bf16 %v1746_v40, %v1746_v40  ;;  %v1757_v48 = vperm.slane %v6390_v32, %v6248_v33  ;;  %v1559_v19 = vpop.f32.mrf.mxu2 }
 0x4dc   : > { %v2024_v13 = vsel %vm1587_vm0, %v2023_v30, %v2005_v14  ;;  %v2047_v25 = vrot.slane %v2042_v17, 4  ;;  %v1763_v50 = vperm.slane %v1759_v61, %v6248_v33  ;;  %v1788_v51 = vsel %vm1587_vm0, %v1787_v4, %v6420_v63 }
 0x4dd   : > { %v2030_v49 = vperm.slane %v2024_v13, %v6257_v47  ;;  %v2053_v20 = vrot.slane %v2034_v42, 4  ;;  %4464 = vmatmul.msk.bf16.vlgmr.msra.gmra.mxu3 %vm2311_vm1, %v1807_v35  ;;  %v2354_v53 = vsel %vm2311_vm1, %v2057_v16, 0  ;;  %v1777_v37 = vrot.slane %v1757_v48, 4 }
 0x4de   : > { %v1794_v45 = vperm.slane %v1788_v51, %v6257_v47  ;;  %2363 = vmatpush.bf16.xpose.msra.mxu3 %v2354_v53  ;;  %v1775_v56 = vrot.slane %v1763_v50, 4  ;;  %v1790_v43 = vsel %vm1587_vm0, %v6410_v62, %v1789_v39  ;;  %v2051_v2 = vrot.slane %v2046_v44, 4 }
 0x4df   : > { %v2048_v54 = vsel %vm1587_vm0, %v2047_v25, %v2030_v49  ;;  %v2049_v55 = vrot.slane %v2030_v49, 4  ;;  %v2054_v32 = vsel %vm1587_vm0, %v2046_v44, %v2053_v20  ;;  %v1778_v38 = vsel %vm1587_vm0, %v1763_v50, %v1777_v37 }
 0x4e0   : > { %v2059_v57 = vpack.c.bf16 %v2048_v54, %v2048_v54  ;;  %v2062_v58 = vpack.c.bf16 %v2054_v32, %v2054_v32  ;;  %v1799_v59 = vrot.slane %v1794_v45, 4  ;;  %v1776_v41 = vsel %vm1587_vm0, %v1775_v56, %v1757_v48 }
 0x4e1   : > { %v2050_v12 = vsel %vm1587_vm0, %v2042_v17, %v2049_v55  ;;  %v1782_v0 = vperm.slane %v1776_v41, %v6257_v47  ;;  %v1786_v52 = vperm.slane %v1778_v38, %v6257_v47  ;;  %v1747_v4 = vrot.slane %v1728_v24, 4 }
 0x4e2   : > { %v2392_v60 = vsel %vm2311_vm1, %v2059_v57, 0  ;;  %v2449_v61 = vsel %vm2311_vm1, %v2062_v58, 0  ;;  %v2060_v63 = vpack.c.bf16 %v2050_v12, %v2050_v12  ;;  %v1798_v62 = vperm.slane %v1790_v43, %v6257_v47 }
 0x4e3   : > { %2401 = vmatpush.bf16.xpose.msrb.mxu2 %v2392_v60  ;;  %2458 = vmatpush.bf16.xpose.msra.mxu0 %v2449_v61  ;;  %v1800_v3 = vsel %vm1587_vm0, %v1799_v59, %v1782_v0  ;;  %v1805_v6 = vrot.slane %v1786_v52, 4  ;;  %v2052_v8 = vsel %vm1587_vm0, %v2051_v2, %v2034_v42  ;;  %v1748_v14 = vsel %vm1587_vm0, %v6442_v15, %v1747_v4  ;;  %v1561_v35 = vpop.f32.mrf.mxu2 }
 0x4e4   : > { %v2411_v22 = vsel %vm2311_vm1, %v2060_v63, 0  ;;  %v1811_v7 = vpack.c.bf16 %v1800_v3, %v1800_v3  ;;  %v2061_v16 = vpack.c.bf16 %v2052_v8, %v2052_v8  ;;  %v1808_v18 = vpack.c.bf16 %v1748_v14, %v1748_v14 }
 0x4e5   : > { %v1806_v9 = vsel %vm1587_vm0, %v1798_v62, %v1805_v6  ;;  %v1801_v23 = vrot.slane %v1782_v0, 4  ;;  %v1749_v34 = vrot.slane %v6431_v5, 4  ;;  %v1803_v26 = vrot.slane %v1798_v62, 4 }
 0x4e6   : > { %v1814_v10 = vpack.c.bf16 %v1806_v9, %v1806_v9  ;;  %v2430_v11 = vsel %vm2311_vm1, %v2061_v16, 0  ;;  %v2464_v30 = vlaneseq  ;;  %v1390_v60 = vperm.slane %v6222_v31, 2 }
 0x4e7   : > { %v1802_v46 = vsel %vm1587_vm0, %v1794_v45, %v1801_v23  ;;  %v1750_v15 = vsel %vm1587_vm0, %v1749_v34, %v6425_v1  ;;  %v1804_v27 = vsel %vm1587_vm0, %v1803_v26, %v1786_v52 }
 0x4e8   : > { %v1812_v21 = vpack.c.bf16 %v1802_v46, %v1802_v46  ;;  %v1809_v24 = vpack.c.bf16 %v1750_v15, %v1750_v15  ;;  %v1813_v29 = vpack.c.bf16 %v1804_v27, %v1804_v27  ;;  %v2465_v17 = vand.u32 127, %v2464_v30 }
 0x4e9   : > { %v6527_v63 = vadd.f32 %v1561_v35, %v1390_v60  ;;  %v6531_v52 = vadd.f32 %v1559_v19, %v1390_v60 }
 0x4ea   : > { %4468 = vmatmul.msk.bf16.vlgmr.msrb.gmra.mxu2 %vm2311_vm1, %v1811_v7  ;;  %vm2466_vm2 = vcmp.lt.s32.totalorder %v2465_v17, 5 }
 0x4eb   : > { %2420 = vmatpush.bf16.xpose.msra.mxu2 %v2411_v22  ;;  %4471 = vmatmul.msk.bf16.vlgmr.msra.gmra.mxu0 %vm2311_vm1, %v1814_v10  ;;  %v5076_v22 = vpack.i.bf16 %v6527_v63, %v6531_v52 }
 0x4ed   : > { %4465 = vmatmul.msk.bf16.vlgmr.msrb.gmra.mxu3 %vm2311_vm1, %v1808_v18 }
 0x4ee   : > { %2439 = vmatpush.bf16.xpose.msrb.mxu3 %v2430_v11 }
 0x4fa   : > { %4469 = vmatmul.msk.bf16.vlgmr.msra.gmra.mxu2 %vm2311_vm1, %v1812_v21 }
 0x4fd   : > { %4466 = vmatmul.msk.bf16.vlgmr.msra.gmra.mxu3 %vm2311_vm1, %v1809_v24 }
 0x50d   : > { %4470 = vmatmul.msk.bf16.vlgmr.msrb.gmra.mxu3 %vm2311_vm1, %v1813_v29 }
 0x558   : > { %v2384_v5 = vpop.f32.mrf.mxu0 }
 0x559   : > { %v6504_v36 = vsel %vm2466_vm2, %v2384_v5, -1e+30 }
 0x55a   : > { %v2487_v1 = vsel %vm2477_vm3, %v6504_v36, -inf }
 0x55b   : > { %2488 = vmax.xlane.f32.xlu1 %v2487_v1 }
 0x560   : > { %v2386_v39 = vpop.f32.mrf.mxu0  ;;  %v2327_v40 = vpop.f32.mrf.mxu3 }
 0x561   : > { %v2469_v42 = vsel %vm2466_vm2, %v2327_v40, -1e+30 }
 0x562   : > { %v2478_v44 = vsel %vm2477_vm3, %v2469_v42, -inf }
 0x563   : > { %2479 = vmax.xlane.f32.xlu2 %v2478_v44 }
 0x568   : > { %v2460_v13 = vpop.f32.mrf.mxu0  ;;  %v2329_v25 = vpop.f32.mrf.mxu3 }
 0x569   : > { %v6511_v48 = vsel %vm2466_vm2, %v2460_v13, -1e+30 }
 0x56a   : > { %v2499_v49 = vsel %vm2477_vm3, %v6511_v48, -inf }
 0x56b   : > { %2500 = vmax.xlane.f32.xlu0 %v2499_v49 }
 0x56d   : > { %v2403_v20 = vpop.f32.mrf.mxu2 }
 0x56e   : > { %v6516_v50 = vsel %vm2466_vm2, %v2403_v20, -1e+30 }
 0x56f   : > { %v2490_v51 = vsel %vm2477_vm3, %v6516_v50, -inf }
 0x570   : > { %v2462_v53 = vpop.f32.mrf.mxu0  ;;  %2491 = vmax.xlane.f32.xlu1 %v2490_v51  ;;  %v2346_v37 = vpop.f32.mrf.mxu3 }
 0x571   : > { %v2470_v45 = vsel %vm2466_vm2, %v2346_v37, -1e+30 }
 0x572   : > { %v2481_v54 = vsel %vm2477_vm3, %v2470_v45, -inf }
 0x573   : > { %2482 = vmax.xlane.f32.xlu0 %v2481_v54 }
 0x575   : > { %v2405_v55 = vpop.f32.mrf.mxu2 }
 0x576   : > { %v2141_v55 = vrot.slane %v6527_v63, 4 }
 0x578   : > { %v2348_v32 = vpop.f32.mrf.mxu3 }
 0x57d   : > { %v2422_v56 = vpop.f32.mrf.mxu2 }
 0x57e   : > { %v2474_v57 = vsel %vm2466_vm2, %v2422_v56, -1e+30 }
 0x57f   : > { %v2493_v58 = vsel %vm2477_vm3, %v2474_v57, -inf }
 0x580   : > { %2494 = vmax.xlane.f32.xlu2 %v2493_v58  ;;  %v2365_v59 = vpop.f32.mrf.mxu3  ;;  %v2085_v58 = vrot.slane %v6531_v52, 4 }
 0x581   : > { %v2471_v12 = vsel %vm2466_vm2, %v2365_v59, -1e+30 }
 0x582   : > { %v2484_v41 = vsel %vm2477_vm3, %v2471_v12, -inf }
 0x583   : > { %2485 = vmax.xlane.f32.xlu1 %v2484_v41 }
 0x585   : > { %v2424_v38 = vpop.f32.mrf.mxu2 }
 0x588   : > { %v2367_v43 = vpop.f32.mrf.mxu3 }
 0x590   : > { %v2441_v61 = vpop.f32.mrf.mxu3 }
 0x591   : > { %v2475_v0 = vsel %vm2466_vm2, %v2441_v61, -1e+30 }
 0x592   : > { %v2496_v2 = vsel %vm2477_vm3, %v2475_v0, -inf }
 0x593   : > { %2497 = vmax.xlane.f32.xlu0 %v2496_v2 }
 0x598   : > { %5077 = vrot.lane.b32.xlu2 %v5076_v22, %s5656_s5  ;;  %v2443_v3 = vpop.f32.mrf.mxu3 }
 0x59c   : > { %5082 = vrot.lane.b32.xlu1 %v5076_v22, %s5657_s9 }
 0x5a7   : > { %5087 = vrot.lane.b32.xlu0 %v5076_v22, %s5655_s8 }
 0x5ce   : > { %v2489_v9 = vpop.xlane.xlu1 %2488 }
 0x5cf   : > { %v2505_v26 = vsub.f32 %v6504_v36, %v2489_v9 }
 0x5d1   : > { %v2516_v30 = vmul.f32 1.442695, %v2505_v26 }
 0x5d6   : > { %v2480_v31 = vpop.xlane.xlu2 %2479 }
 0x5d7   : > { %v2502_v4 = vsub.f32 %v2469_v42, %v2480_v31 }
 0x5d9   : > { %v2510_v62 = vmul.f32 1.442695, %v2502_v4 }
 0x5db   : > { %5118 = vpow2.f32 %v2510_v62 }
 0x5de   : > { %v2501_v6 = vpop.xlane.xlu0 %2500 }
 0x5df   : > { %v2509_v44 = vsub.f32 %v6511_v48, %v2501_v6 }
 0x5e1   : > { %v6538_v7 = vpop.eup %5118  ;;  %v2524_v25 = vmul.f32 1.442695, %v2509_v44 }
 0x5e2   : > { %v2526_v8 = vsel %vm2477_vm3, %v6538_v7, 0.0 }
 0x5e3   : > { %2527 = vadd.xlane.f32.xlu1 %v2526_v8  ;;  %v2492_v18 = vpop.xlane.xlu1 %2491 }
 0x5e4   : > { %v2506_v1 = vsub.f32 %v6516_v50, %v2492_v18 }
 0x5e6   : > { %v2483_v10 = vpop.xlane.xlu0 %2482  ;;  %v2518_v39 = vmul.f32 1.442695, %v2506_v1 }
 0x5e7   : > { %v2503_v14 = vsub.f32 %v2470_v45, %v2483_v10 }
 0x5e9   : > { %v2512_v16 = vmul.f32 1.442695, %v2503_v14 }
 0x5eb   : > { %5120 = vpow2.f32 %v2512_v16 }
 0x5f1   : > { %v6542_v11 = vpop.eup %5120 }
 0x5f2   : > { %v2529_v23 = vsel %vm2477_vm3, %v6542_v11, 0.0 }
 0x5f3   : > { %v2495_v34 = vpop.xlane.xlu2 %2494  ;;  %2530 = vadd.xlane.f32.xlu0 %v2529_v23 }
 0x5f4   : > { %v2507_v46 = vsub.f32 %v2474_v57, %v2495_v34 }
 0x5f6   : > { %v2520_v21 = vmul.f32 1.442695, %v2507_v46  ;;  %v2486_v15 = vpop.xlane.xlu1 %2485 }
 0x5f7   : > { %v2504_v24 = vsub.f32 %v2471_v12, %v2486_v15 }
 0x5f8   : > { %5122 = vpow2.f32 %v2520_v21 }
 0x5f9   : > { %v2514_v27 = vmul.f32 1.442695, %v2504_v24 }
 0x5fb   : > { %5124 = vpow2.f32 %v2514_v27  ;;  %v5078_v37 = vpop.permute.xlu2 %5077 }
 0x5fc   : > { %5126 = vpow2.f32 %v2516_v30  ;;  %v5080_v56 = vunpack.i.h.bf16 %v5078_v37  ;;  %v5079_v57 = vunpack.i.l.bf16 %v5078_v37 }
 0x5fd   : > { %5128 = vpow2.f32 %v2518_v39 }
 0x5fe   : > { %v6547_v29 = vpop.eup %5122  ;;  %v2153_v60 = vrot.slane %v5080_v56, 4  ;;  %v2097_v61 = vrot.slane %v5079_v57, 4 }
 0x5ff   : > { %v2541_v17 = vsel %vm2477_vm3, %v6547_v29, 0.0 }
 0x600   : > { %2542 = vadd.xlane.f32.xlu1 %v2541_v17 }
 0x601   : > { %v6551_v5 = vpop.eup %5124 }
 0x602   : > { %v2532_v19 = vsel %vm2477_vm3, %v6551_v5, 0.0  ;;  %v6556_v40 = vpop.eup %5126 }
 0x603   : > { %2533 = vadd.xlane.f32.xlu2 %v2532_v19  ;;  %v2535_v13 = vsel %vm2477_vm3, %v6556_v40, 0.0  ;;  %v6561_v20 = vpop.eup %5128 }
 0x604   : > { %v2538_v48 = vsel %vm2477_vm3, %v6561_v20, 0.0 }
 0x606   : > { %v2498_v36 = vpop.xlane.xlu0 %2497 }
 0x607   : > { %v2508_v42 = vsub.f32 %v2475_v0, %v2498_v36 }
 0x609   : > { %v2522_v35 = vmul.f32 1.442695, %v2508_v42 }
 0x60b   : > { %5130 = vpow2.f32 %v2522_v35  ;;  %2536 = vadd.xlane.f32.xlu2 %v2535_v13 }
 0x60c   : > { %5132 = vpow2.f32 %v2524_v25 }
 0x60e   : > { %v5083_v49 = vpop.permute.xlu1 %5082 }
 0x60f   : > { %v5085_v50 = vunpack.i.h.bf16 %v5083_v49  ;;  %v5084_v51 = vunpack.i.l.bf16 %v5083_v49 }
 0x611   : > { %v6563_v53 = vpop.eup %5130  ;;  %v2139_v54 = vrot.slane %v5085_v50, 4  ;;  %v2083_v32 = vrot.slane %v5084_v51, 4  ;;  %v2142_v12 = vsel %vm1587_vm0, %v5085_v50, %v2141_v55  ;;  %v2086_v38 = vsel %vm1587_vm0, %v5084_v51, %v2085_v58 }
 0x612   : > { %v2544_v45 = vsel %vm2477_vm3, %v6563_v53, 0.0  ;;  %v6571_v59 = vpop.eup %5132  ;;  %v2150_v0 = vperm.slane %v2142_v12, %v6248_v33  ;;  %v2094_v31 = vperm.slane %v2086_v38, %v6248_v33 }
 0x613   : > { %2539 = vadd.xlane.f32.xlu2 %v2538_v48  ;;  %2545 = vadd.xlane.f32.xlu0 %v2544_v45  ;;  %v2140_v41 = vsel %vm1587_vm0, %v2139_v54, %v6527_v63  ;;  %v2084_v43 = vsel %vm1587_vm0, %v2083_v32, %v6531_v52  ;;  %v2547_v22 = vsel %vm2477_vm3, %v6571_v59, 0.0 }
 0x614   : > { %v2146_v3 = vperm.slane %v2140_v41, %v6248_v33  ;;  %v2090_v63 = vperm.slane %v2084_v43, %v6248_v33  ;;  %v2177_v10 = vrot.slane %v2150_v0, 4  ;;  %v2121_v23 = vrot.slane %v2094_v31, 4 }
 0x616   : > { %v2165_v18 = vrot.slane %v2146_v3, 4  ;;  %v2109_v27 = vrot.slane %v2090_v63, 4 }
 0x619   : > { %v5088_v2 = vpop.permute.xlu0 %5087 }
 0x61a   : > { %v5090_v4 = vunpack.i.h.bf16 %v5088_v2  ;;  %v5089_v62 = vunpack.i.l.bf16 %v5088_v2 }
 0x61b   : > { %2548 = vadd.xlane.f32.xlu0 %v2547_v22 }
 0x61c   : > { %v2151_v6 = vrot.slane %v5090_v4, 4  ;;  %v2154_v52 = vsel %vm1587_vm0, %v5090_v4, %v2153_v60  ;;  %v2095_v8 = vrot.slane %v5089_v62, 4  ;;  %v2098_v9 = vsel %vm1587_vm0, %v5089_v62, %v2097_v61 }
 0x61d   : > { %v2162_v14 = vperm.slane %v2154_v52, %v6248_v33  ;;  %v2106_v16 = vperm.slane %v2098_v9, %v6248_v33 }
 0x61e   : > { %v2152_v34 = vsel %vm1587_vm0, %v2151_v6, %v5080_v56  ;;  %v2096_v46 = vsel %vm1587_vm0, %v2095_v8, %v5079_v57 }
 0x61f   : > { %v2158_v21 = vperm.slane %v2152_v34, %v6248_v33  ;;  %v2175_v15 = vrot.slane %v2162_v14, 4  ;;  %v2178_v24 = vsel %vm1587_vm0, %v2162_v14, %v2177_v10  ;;  %v2102_v26 = vperm.slane %v2096_v46, %v6248_v33 }
 0x620   : > { %v2186_v30 = vperm.slane %v2178_v24, %v6257_v47  ;;  %v2119_v17 = vrot.slane %v2106_v16, 4  ;;  %v2122_v1 = vsel %vm1587_vm0, %v2106_v16, %v2121_v23 }
 0x621   : > { %v2163_v19 = vrot.slane %v2158_v21, 4  ;;  %v2166_v39 = vsel %vm1587_vm0, %v2158_v21, %v2165_v18  ;;  %v2176_v36 = vsel %vm1587_vm0, %v2175_v15, %v2150_v0  ;;  %v2107_v42 = vrot.slane %v2102_v26, 4 }
 0x622   : > { %v2174_v44 = vperm.slane %v2166_v39, %v6257_v47  ;;  %v2182_v35 = vperm.slane %v2176_v36, %v6257_v47  ;;  %v2193_v13 = vrot.slane %v2186_v30, 4  ;;  %v2110_v25 = vsel %vm1587_vm0, %v2102_v26, %v2109_v27 }
 0x623   : > { %v2164_v49 = vsel %vm1587_vm0, %v2163_v19, %v2146_v3  ;;  %v2108_v50 = vsel %vm1587_vm0, %v2107_v42, %v2090_v63  ;;  %v2118_v51 = vperm.slane %v2110_v25, %v6257_v47  ;;  %v2120_v37 = vsel %vm1587_vm0, %v2119_v17, %v2094_v31 }
 0x624   : > { %v2170_v48 = vperm.slane %v2164_v49, %v6257_v47  ;;  %v2189_v45 = vrot.slane %v2174_v44, 4  ;;  %v2191_v54 = vrot.slane %v2182_v35, 4  ;;  %v2194_v55 = vsel %vm1587_vm0, 0.0, %v2193_v13 }
 0x625   : > { %v2260_v32 = vsel %vm1587_vm0, %v2193_v13, %v2182_v35  ;;  %v2265_v56 = vrot.slane %v2194_v55, 4  ;;  %v2114_v57 = vperm.slane %v2108_v50, %v6257_v47  ;;  %v2126_v58 = vperm.slane %v2120_v37, %v6257_v47 }
 0x626   : > { %v2187_v12 = vrot.slane %v2170_v48, 4  ;;  %v2190_v41 = vsel %vm1587_vm0, 0.0, %v2189_v45  ;;  %v2192_v38 = vsel %vm1587_vm0, 0.0, %v2191_v54  ;;  %v2264_v43 = vperm.slane %v2260_v32, %v6248_v33 }
 0x627   : > { %v2254_v60 = vrot.slane %v2190_v41, 4  ;;  %v2130_v61 = vperm.slane %v2122_v1, %v6257_v47  ;;  %v2131_v0 = vrot.slane %v2114_v57, 4  ;;  %v2133_v2 = vrot.slane %v2118_v51, 4 }
 0x628   : > { %v2135_v22 = vrot.slane %v2126_v58, 4  ;;  %v2188_v3 = vsel %vm1587_vm0, 0.0, %v2187_v12  ;;  %v2249_v31 = vsel %vm1587_vm0, %v2189_v45, %v2170_v48  ;;  %v2266_v4 = vsel %vm1587_vm0, %v2265_v56, %v2192_v38 }
 0x629   : > { %v2134_v62 = vsel %vm1587_vm0, 0.0, %v2133_v2  ;;  %v2137_v63 = vrot.slane %v2130_v61, 4  ;;  %v2132_v6 = vsel %vm1587_vm0, 0.0, %v2131_v0  ;;  %v2195_v52 = vsel %vm1587_vm0, %v2133_v2, %v2114_v57 }
 0x62a   : > { %v2136_v8 = vsel %vm1587_vm0, 0.0, %v2135_v22  ;;  %v2200_v9 = vrot.slane %v2134_v62, 4  ;;  %v2199_v10 = vperm.slane %v2195_v52, %v6248_v33  ;;  %v2253_v14 = vperm.slane %v2249_v31, %v6248_v33 }
 0x62b   : > { %v2138_v16 = vsel %vm1587_vm0, 0.0, %v2137_v63  ;;  %v2206_v18 = vsel %vm1587_vm0, %v2137_v63, %v2126_v58  ;;  %v2255_v23 = vsel %vm1587_vm0, %v2254_v60, %v2188_v3  ;;  %v2270_v34 = vperm.slane %v2266_v4, %v6248_v33 }
 0x62c   : > { %v2210_v46 = vperm.slane %v2206_v18, %v6248_v33  ;;  %v2211_v21 = vrot.slane %v2138_v16, 4  ;;  %v2201_v15 = vsel %vm1587_vm0, %v2200_v9, %v2132_v6  ;;  %v2219_v24 = vrot.slane %v2199_v10, 4 }
 0x62d   : > { %v2205_v26 = vperm.slane %v2201_v15, %v6248_v33  ;;  %v2259_v27 = vperm.slane %v2255_v23, %v6248_v33  ;;  %v2273_v30 = vrot.slane %v2253_v14, 4  ;;  %v2285_v17 = vrot.slane %v2264_v43, 4 }
 0x62e   : > { %v2212_v1 = vsel %vm1587_vm0, %v2211_v21, %v2136_v8  ;;  %v2231_v19 = vrot.slane %v2210_v46, 4  ;;  %v2283_v39 = vrot.slane %v2270_v34, 4 }
 0x62f   : > { %v2216_v36 = vperm.slane %v2212_v1, %v6248_v33  ;;  %v2220_v42 = vsel %vm1587_vm0, %v2205_v26, %v2219_v24  ;;  %v2274_v44 = vsel %vm1587_vm0, %v2259_v27, %v2273_v30  ;;  %v2286_v35 = vsel %vm1587_vm0, %v2270_v34, %v2285_v17 }
 0x630   : > { %v2228_v13 = vperm.slane %v2220_v42, %v6257_v47  ;;  %v2282_v25 = vperm.slane %v2274_v44, %v6257_v47  ;;  %v2294_v49 = vperm.slane %v2286_v35, %v6257_v47  ;;  %v2217_v50 = vrot.slane %v2205_v26, 4 }
 0x631   : > { %v2232_v51 = vsel %vm1587_vm0, %v2216_v36, %v2231_v19  ;;  %v2229_v37 = vrot.slane %v2216_v36, 4  ;;  %v2271_v48 = vrot.slane %v2259_v27, 4  ;;  %v2284_v45 = vsel %vm1587_vm0, %v2283_v39, %v2264_v43 }
 0x632   : > { %v2240_v54 = vperm.slane %v2232_v51, %v6257_v47  ;;  %v2299_v55 = vrot.slane %v2294_v49, 4  ;;  %v2218_v32 = vsel %vm1587_vm0, %v2217_v50, %v2199_v10  ;;  %v2247_v56 = vrot.slane %v2228_v13, 4 }
 0x633   : > { %v2224_v57 = vperm.slane %v2218_v32, %v6257_v47  ;;  %v2230_v58 = vsel %vm1587_vm0, %v2229_v37, %v2210_v46  ;;  %v2272_v12 = vsel %vm1587_vm0, %v2271_v48, %v2253_v14  ;;  %v2290_v41 = vperm.slane %v2284_v45, %v6257_v47 }
 0x634   : > { %v2245_v38 = vrot.slane %v2240_v54, 4  ;;  %v2300_v60 = vsel %vm1587_vm0, %v2299_v55, %v2282_v25  ;;  %v2236_v61 = vperm.slane %v2230_v58, %v6257_v47  ;;  %v2248_v43 = vsel %vm1587_vm0, %v2240_v54, %v2247_v56 }
 0x635   : > { %v2309_v0 = vpack.c.bf16 %v2300_v60, %v2300_v60  ;;  %v2243_v2 = vrot.slane %v2224_v57, 4  ;;  %v2306_v22 = vpack.c.bf16 %v2248_v43, %v2248_v43  ;;  %v2278_v3 = vperm.slane %v2272_v12, %v6257_v47 }
 0x636   : > { %v2246_v31 = vsel %vm1587_vm0, %v2245_v38, %v2228_v13  ;;  %v2241_v4 = vrot.slane %v2236_v61, 4  ;;  %v2295_v62 = vrot.slane %v2290_v41, 4  ;;  %v2301_v63 = vrot.slane %v2282_v25, 4 }
 0x637   : > { %v2305_v6 = vpack.c.bf16 %v2246_v31, %v2246_v31  ;;  %v2693_v52 = vsel %vm2577_vm4, %v2309_v0, 0  ;;  %v2636_v8 = vsel %vm2577_vm4, %v2306_v22, 0  ;;  %v2244_v9 = vsel %vm1587_vm0, %v2236_v61, %v2243_v2 }
 0x638   : > { %v2242_v10 = vsel %vm1587_vm0, %v2241_v4, %v2224_v57  ;;  %2645 = vmatpush.bf16.msrb.mxu0 %v2636_v8  ;;  %v2296_v14 = vsel %vm1587_vm0, %v2295_v62, %v2278_v3  ;;  %v2302_v16 = vsel %vm1587_vm0, %v2294_v49, %v2301_v63  ;;  %v2304_v18 = vpack.c.bf16 %v2244_v9, %v2244_v9 }
 0x639   : > { %v2617_v23 = vsel %vm2577_vm4, %v2305_v6, 0  ;;  %v2303_v34 = vpack.c.bf16 %v2242_v10, %v2242_v10  ;;  %v2307_v46 = vpack.c.bf16 %v2296_v14, %v2296_v14  ;;  %v2310_v21 = vpack.c.bf16 %v2302_v16, %v2302_v16 }
 0x63a   : > { %2626 = vmatpush.bf16.msra.mxu3 %v2617_v23  ;;  %v2598_v15 = vsel %vm2577_vm4, %v2304_v18, 0  ;;  %v2297_v24 = vrot.slane %v2278_v3, 4 }
 0x63b   : > { %v2579_v26 = vsel %vm2577_vm4, %v2303_v34, 0  ;;  %v2655_v27 = vsel %vm2577_vm4, %v2307_v46, 0  ;;  %v2712_v30 = vsel %vm2577_vm4, %v2310_v21, 0  ;;  %2607 = vmatpush.bf16.msrb.mxu2 %v2598_v15 }
 0x63c   : > { %2588 = vmatpush.bf16.msrb.mxu1 %v2579_v26  ;;  %2721 = vmatpush.bf16.msra.mxu0 %v2712_v30  ;;  %v2298_v17 = vsel %vm1587_vm0, %v2290_v41, %v2297_v24 }
 0x63d   : > { %v2308_v1 = vpack.c.bf16 %v2298_v17, %v2298_v17 }
 0x63e   : > { %2702 = vmatpush.bf16.msrb.mxu3 %v2693_v52 }
 0x63f   : > { %v2674_v19 = vsel %vm2577_vm4, %v2308_v1, 0 }
 0x640   : > { %2664 = vmatpush.bf16.msra.mxu1 %v2655_v27  ;;  %2683 = vmatpush.bf16.msra.mxu2 %v2674_v19 }
 0x656   : > { %v2528_v39 = vpop.xlane.xlu1 %2527 }
 0x657   : > { %5134 = vrcp.f32 %v2528_v39 }
 0x65d   : > { %v5135_v36 = vpop.eup %5134 }
 0x65e   : > { %v2558_v42 = vmul.f32 %v5135_v36, %v6538_v7 }
 0x660   : > { %v2566_v44 = vpack.c.bf16 %v2558_v42, %v2558_v42 }
 0x662   : > { %4472 = vmatmul.msk.bf16.vlgmr.msrb.gmra.mxu1 %vm2477_vm3, %v2566_v44 }
 0x666   : > { %v2531_v35 = vpop.xlane.xlu0 %2530 }
 0x667   : > { %5136 = vrcp.f32 %v2531_v35 }
 0x66d   : > { %v5137_v13 = vpop.eup %5136 }
 0x66e   : > { %v2559_v25 = vmul.f32 %v5137_v13, %v6542_v11 }
 0x670   : > { %v2567_v49 = vpack.c.bf16 %v2559_v25, %v2559_v25 }
 0x672   : > { %4473 = vmatmul.msk.bf16.vlgmr.msrb.gmra.mxu2 %vm2477_vm3, %v2567_v49 }
 0x673   : > { %v2543_v50 = vpop.xlane.xlu1 %2542 }
 0x674   : > { %5138 = vrcp.f32 %v2543_v50 }
 0x676   : > { %v2534_v51 = vpop.xlane.xlu2 %2533 }
 0x677   : > { %5140 = vrcp.f32 %v2534_v51 }
 0x67a   : > { %v5139_v37 = vpop.eup %5138 }
 0x67b   : > { %v2563_v48 = vmul.f32 %v5139_v37, %v6547_v29 }
 0x67d   : > { %v5141_v45 = vpop.eup %5140  ;;  %v2571_v32 = vpack.c.bf16 %v2563_v48, %v2563_v48 }
 0x67e   : > { %v2560_v7 = vmul.f32 %v5141_v45, %v6551_v5  ;;  %v2537_v54 = vpop.xlane.xlu2 %2536 }
 0x67f   : > { %5142 = vrcp.f32 %v2537_v54 }
 0x680   : > { %v2568_v55 = vpack.c.bf16 %v2560_v7, %v2560_v7 }
 0x682   : > { %4474 = vmatmul.msk.bf16.vlgmr.msra.gmra.mxu3 %vm2477_vm3, %v2568_v55  ;;  %4477 = vmatmul.msk.bf16.vlgmr.msra.gmra.mxu2 %vm2477_vm3, %v2571_v32 }
 0x685   : > { %v5143_v11 = vpop.eup %5142 }
 0x686   : > { %v2561_v56 = vmul.f32 %v5143_v11, %v6556_v40  ;;  %v2540_v57 = vpop.xlane.xlu2 %2539  ;;  %v2546_v58 = vpop.xlane.xlu0 %2545 }
 0x687   : > { %5144 = vrcp.f32 %v2540_v57 }
 0x688   : > { %v2569_v12 = vpack.c.bf16 %v2561_v56, %v2561_v56  ;;  %5146 = vrcp.f32 %v2546_v58 }
 0x68a   : > { %4475 = vmatmul.msk.bf16.vlgmr.msrb.gmra.mxu0 %vm2477_vm3, %v2569_v12 }
 0x68d   : > { %v5145_v29 = vpop.eup %5144 }
 0x68e   : > { %v5147_v5 = vpop.eup %5146  ;;  %v2562_v41 = vmul.f32 %v5145_v29, %v6561_v20  ;;  %v2549_v38 = vpop.xlane.xlu0 %2548 }
 0x68f   : > { %v2564_v60 = vmul.f32 %v5147_v5, %v6563_v53  ;;  %5148 = vrcp.f32 %v2549_v38 }
 0x690   : > { %v2570_v61 = vpack.c.bf16 %v2562_v41, %v2562_v41 }
 0x691   : > { %v2572_v43 = vpack.c.bf16 %v2564_v60, %v2564_v60 }
 0x692   : > { %4476 = vmatmul.msk.bf16.vlgmr.msra.gmra.mxu1 %vm2477_vm3, %v2570_v61 }
 0x693   : > { %4478 = vmatmul.msk.bf16.vlgmr.msrb.gmra.mxu3 %vm2477_vm3, %v2572_v43 }
 0x695   : > { %v5149_v40 = vpop.eup %5148 }
 0x696   : > { %v2565_v0 = vmul.f32 %v5149_v40, %v6571_v59 }
 0x698   : > { %v2573_v2 = vpack.c.bf16 %v2565_v0, %v2565_v0 }
 0x69a   : > { %4479 = vmatmul.msk.bf16.vlgmr.msra.gmra.mxu0 %vm2477_vm3, %v2573_v2 }
 0x6df   : > { %v2590_v22 = vpop.f32.mrf.mxu1 }
 0x6e0   : > { %v2729_v4 = vrot.slane %v2590_v22, 4 }
 0x6e7   : > { %v2592_v3 = vpop.f32.mrf.mxu1 }
 0x6f5   : > { %v2609_v31 = vpop.f32.mrf.mxu2 }
 0x6f6   : > { %v2741_v63 = vrot.slane %v2609_v31, 4 }
 0x6fd   : > { %v2611_v20 = vpop.f32.mrf.mxu2 }
 0x705   : > { %v2628_v62 = vpop.f32.mrf.mxu3  ;;  %v6681_v53 = vpop.f32.mrf.mxu2 }
 0x706   : > { %v2727_v6 = vrot.slane %v2628_v62, 4  ;;  %v2730_v52 = vsel %vm1587_vm0, %v2628_v62, %v2729_v4  ;;  %v2797_v5 = vrot.slane %v6681_v53, 4 }
 0x707   : > { %v2738_v8 = vperm.slane %v2730_v52, %v6248_v33  ;;  %v2647_v9 = vpop.f32.mrf.mxu0 }
 0x708   : > { %v2728_v59 = vsel %vm1587_vm0, %v2727_v6, %v2590_v22  ;;  %v2739_v10 = vrot.slane %v2647_v9, 4  ;;  %v2742_v14 = vsel %vm1587_vm0, %v2647_v9, %v2741_v63 }
 0x709   : > { %v2734_v16 = vperm.slane %v2728_v59, %v6248_v33  ;;  %v2765_v18 = vrot.slane %v2738_v8, 4  ;;  %v2750_v23 = vperm.slane %v2742_v14, %v6248_v33 }
 0x70a   : > { %v2740_v34 = vsel %vm1587_vm0, %v2739_v10, %v2609_v31 }
 0x70b   : > { %v2753_v46 = vrot.slane %v2734_v16, 4  ;;  %v2746_v21 = vperm.slane %v2740_v34, %v6248_v33  ;;  %v2763_v15 = vrot.slane %v2750_v23, 4  ;;  %v2766_v24 = vsel %vm1587_vm0, %v2750_v23, %v2765_v18 }
 0x70c   : > { %v2774_v26 = vperm.slane %v2766_v24, %v6257_v47 }
 0x70d   : > { %v2751_v27 = vrot.slane %v2746_v21, 4  ;;  %v2754_v30 = vsel %vm1587_vm0, %v2746_v21, %v2753_v46  ;;  %v2764_v17 = vsel %vm1587_vm0, %v2763_v15, %v2738_v8  ;;  %v2630_v1 = vpop.f32.mrf.mxu3  ;;  %v2687_v19 = vpop.f32.mrf.mxu2 }
 0x70e   : > { %v2762_v39 = vperm.slane %v2754_v30, %v6257_v47  ;;  %v2770_v36 = vperm.slane %v2764_v17, %v6257_v47  ;;  %v2781_v42 = vrot.slane %v2774_v26, 4 }
 0x70f   : > { %v2752_v44 = vsel %vm1587_vm0, %v2751_v27, %v2734_v16  ;;  %v2649_v35 = vpop.f32.mrf.mxu0  ;;  %v2666_v13 = vpop.f32.mrf.mxu1 }
 0x710   : > { %v2758_v25 = vperm.slane %v2752_v44, %v6257_v47  ;;  %v2777_v49 = vrot.slane %v2762_v39, 4  ;;  %v2779_v50 = vrot.slane %v2770_v36, 4  ;;  %v2782_v51 = vsel %vm1587_vm0, 0.0, %v2781_v42 }
 0x711   : > { %v2855_v37 = vrot.slane %v2782_v51, 4  ;;  %v2850_v54 = vsel %vm1587_vm0, %v2781_v42, %v2770_v36  ;;  %v2785_v58 = vrot.slane %v2666_v13, 4 }
 0x712   : > { %v2775_v48 = vrot.slane %v2758_v25, 4  ;;  %v2778_v45 = vsel %vm1587_vm0, 0.0, %v2777_v49  ;;  %v2780_v7 = vsel %vm1587_vm0, 0.0, %v2779_v50  ;;  %v2854_v57 = vperm.slane %v2850_v54, %v6248_v33 }
 0x713   : > { %v2844_v55 = vrot.slane %v2778_v45, 4  ;;  %v2856_v32 = vsel %vm1587_vm0, %v2855_v37, %v2780_v7  ;;  %v2839_v29 = vsel %vm1587_vm0, %v2777_v49, %v2758_v25 }
 0x714   : > { %v2860_v11 = vperm.slane %v2856_v32, %v6248_v33  ;;  %v2776_v56 = vsel %vm1587_vm0, 0.0, %v2775_v48  ;;  %v2875_v31 = vrot.slane %v2854_v57, 4  ;;  %v2843_v62 = vperm.slane %v2839_v29, %v6248_v33 }
 0x715   : > { %v2845_v12 = vsel %vm1587_vm0, %v2844_v55, %v2776_v56 }
 0x716   : > { %v2704_v41 = vpop.f32.mrf.mxu3  ;;  %v2849_v38 = vperm.slane %v2845_v12, %v6248_v33  ;;  %v2873_v3 = vrot.slane %v2860_v11, 4  ;;  %v2876_v21 = vsel %vm1587_vm0, %v2860_v11, %v2875_v31  ;;  %v2863_v26 = vrot.slane %v2843_v62, 4 }
 0x717   : > { %v2783_v60 = vrot.slane %v2704_v41, 4  ;;  %v2786_v61 = vsel %vm1587_vm0, %v2704_v41, %v2785_v58  ;;  %v2668_v43 = vpop.f32.mrf.mxu1  ;;  %v2723_v40 = vpop.f32.mrf.mxu0  ;;  %v2884_v44 = vperm.slane %v2876_v21, %v6257_v47  ;;  %v4859_v21 = vld [vmem:[%s6040_s13 + $0x38] sm:$0xff] }
 0x718   : > { %v2794_v0 = vperm.slane %v2786_v61, %v6248_v33  ;;  %v2795_v2 = vrot.slane %v2723_v40, 4  ;;  %v2798_v22 = vsel %vm1587_vm0, %v2723_v40, %v2797_v5  ;;  %v2861_v8 = vrot.slane %v2849_v38, 4  ;;  %3048 = vmatpush.bf16.msrb.mxu1 %v4859_v21  ;;  %v4620_v21 = vld [vmem:[%s6054_s11 + $0xd8] sm:$0xf0] }
 0x719   : > { %v2784_v20 = vsel %vm1587_vm0, %v2783_v60, %v2666_v13  ;;  %v2806_v4 = vperm.slane %v2798_v22, %v6248_v33  ;;  %v2874_v18 = vsel %vm1587_vm0, %v2873_v3, %v2854_v57  ;;  %v2864_v54 = vsel %vm1587_vm0, %v2849_v38, %v2863_v26  ;;  %v4855_v26 = vld [vmem:[%s6040_s13 + $0x18] sm:$0xff] }
 0x71a   : > { %v2790_v63 = vperm.slane %v2784_v20, %v6248_v33  ;;  %v2821_v6 = vrot.slane %v2794_v0, 4  ;;  %v2796_v52 = vsel %vm1587_vm0, %v2795_v2, %v6681_v53  ;;  %v2862_v16 = vsel %vm1587_vm0, %v2861_v8, %v2843_v62 }
 0x71b   : > { %v2802_v9 = vperm.slane %v2796_v52, %v6248_v33  ;;  %v2819_v59 = vrot.slane %v2806_v4, 4  ;;  %v2868_v27 = vperm.slane %v2862_v16, %v6257_v47  ;;  %v2880_v39 = vperm.slane %v2874_v18, %v6257_v47 }
 0x71c   : > { %v2809_v10 = vrot.slane %v2790_v63, 4  ;;  %v2822_v14 = vsel %vm1587_vm0, %v2806_v4, %v2821_v6  ;;  %v2872_v29 = vperm.slane %v2864_v54, %v6257_v47  ;;  %v2889_v5 = vrot.slane %v2884_v44, 4 }
 0x71d   : > { %v2807_v23 = vrot.slane %v2802_v9, 4  ;;  %v2820_v34 = vsel %vm1587_vm0, %v2819_v59, %v2794_v0  ;;  %v2830_v46 = vperm.slane %v2822_v14, %v6257_v47  ;;  %v2885_v49 = vrot.slane %v2880_v39, 4 }
 0x71e   : > { %v2810_v53 = vsel %vm1587_vm0, %v2802_v9, %v2809_v10  ;;  %v2826_v15 = vperm.slane %v2820_v34, %v6257_v47  ;;  %v2706_v24 = vpop.f32.mrf.mxu3  ;;  %v2891_v20 = vrot.slane %v2872_v29, 4  ;;  %v2890_v62 = vsel %vm1587_vm0, %v2889_v5, %v2872_v29 }
 0x71f   : > { %v2808_v30 = vsel %vm1587_vm0, %v2807_v23, %v2790_v63  ;;  %v2818_v17 = vperm.slane %v2810_v53, %v6257_v47  ;;  %v2837_v1 = vrot.slane %v2830_v46, 4  ;;  %v2725_v19 = vpop.f32.mrf.mxu0  ;;  %v6743_v55 = vsel %vm1587_vm0, %v2885_v49, %v2868_v27  ;;  %v4858_v53 = vld [vmem:[%s6040_s13 + $0x30] sm:$0xff]  ;;  %v4856_v24 = vld [vmem:[%s6040_s13 + $0x20] sm:$0xff] }
 0x720   : > { %v2814_v36 = vperm.slane %v2808_v30, %v6257_v47  ;;  %v2835_v42 = vrot.slane %v2826_v15, 4  ;;  %v2892_v10 = vsel %vm1587_vm0, %v2884_v44, %v2891_v20  ;;  %3049 = vmatpush.bf16.msrb.mxu1 %v4858_v53  ;;  %v4853_v30 = vld [vmem:[%s6040_s13 + $0x8] sm:$0xff]  ;;  %v4628_v20 = vld [vmem:[%s6054_s11 + $0xf0] sm:$0xf0] }
 0x721   : > { %v2833_v35 = vrot.slane %v2818_v17, 4  ;;  %v2838_v13 = vsel %vm1587_vm0, 0.0, %v2837_v1  ;;  %v2904_v25 = vsel %vm1587_vm0, %v2837_v1, %v2826_v15  ;;  %v4857_v15 = vld [vmem:[%s6040_s13 + $0x28] sm:$0xff]  ;;  %v4852_v17 = vld [vmem:[%s6040_s13] sm:$0xff] }
 0x722   : > { %v2831_v50 = vrot.slane %v2814_v36, 4  ;;  %v2836_v51 = vsel %vm1587_vm0, 0.0, %v2835_v42  ;;  %v2908_v37 = vperm.slane %v2904_v25, %v6248_v33  ;;  %v2909_v48 = vrot.slane %v2838_v13, 4 }
 0x723   : > { %v2834_v45 = vsel %vm1587_vm0, 0.0, %v2833_v35  ;;  %v2893_v7 = vsel %vm1587_vm0, %v2833_v35, %v2814_v36 }
 0x724   : > { %v2898_v32 = vrot.slane %v2834_v45, 4  ;;  %v2910_v11 = vsel %vm1587_vm0, %v2909_v48, %v2836_v51  ;;  %v2929_v56 = vrot.slane %v2908_v37, 4  ;;  %v2832_v57 = vsel %vm1587_vm0, 0.0, %v2831_v50  ;;  %3050 = vmatpush.bf16.msrb.mxu1 %v4857_v15  ;;  %v4594_v15 = vld [vmem:[%s6054_s11 + $0xa0] sm:$0xf] }
 0x725   : > { %v2914_v58 = vperm.slane %v2910_v11, %v6248_v33  ;;  %v2897_v12 = vperm.slane %v2893_v7, %v6248_v33 }
 0x726   : > { %v2899_v41 = vsel %vm1587_vm0, %v2898_v32, %v2832_v57 }
 0x727   : > { %v2903_v38 = vperm.slane %v2899_v41, %v6248_v33  ;;  %v2917_v60 = vrot.slane %v2897_v12, 4  ;;  %v2930_v61 = vsel %vm1587_vm0, %v2914_v58, %v2929_v56  ;;  %v2927_v43 = vrot.slane %v2914_v58, 4  ;;  %v5186_v56 = vld [vmem:[#allocation2] sm:$0xff] }
 0x728   : > { %v2938_v40 = vperm.slane %v2930_v61, %v6257_v47  ;;  %v2887_v33 = vrot.slane %v2868_v27, 4  ;;  %3051 = vmatpush.bf16.msrb.mxu1 %v4856_v24  ;;  %v4854_v27 = vld [vmem:[%s6040_s13 + $0x10] sm:$0xff]  ;;  %s7204_s13 = scalar_lea.vmem [#allocation9], %s6032_s15 }
 0x729   : > { %v2918_v0 = vsel %vm1587_vm0, %v2903_v38, %v2917_v60  ;;  %v2915_v2 = vrot.slane %v2903_v38, 4  ;;  %v2928_v22 = vsel %vm1587_vm0, %v2927_v43, %v2908_v37  ;;  %v5108_v54 = vld [vmem:[%s7204_s13] ss:$0 sm:$0xff]  ;;  %v4882_v24 = vld [vmem:[%s6054_s11 + $0xac] sm:$0xf0] }
 0x72a   : > { %v2926_v3 = vperm.slane %v2918_v0, %v6257_v47  ;;  %v2943_v31 = vrot.slane %v2938_v40, 4  ;;  %v2934_v4 = vperm.slane %v2928_v22, %v6257_v47  ;;  %v2888_v34 = vsel %vm1587_vm0, %v2880_v39, %v2887_v33  ;;  %v4890_v22 = vld [vmem:[%s6054_s11 + $0xec] sm:$0xf0] }
 0x72b   : > { %v2916_v63 = vsel %vm1587_vm0, %v2915_v2, %v2897_v12  ;;  %v5187_v12 = vld [vmem:[#allocation2 + $0x8] sm:$0xff]  ;;  %v4626_v2 = vld [vmem:[%s6054_s11 + $0xe0] sm:$0xf] }
 0x72c   : > { %v2944_v6 = vsel %vm1587_vm0, %v2943_v31, %v2926_v3  ;;  %v2945_v52 = vrot.slane %v2926_v3, 4  ;;  %v2922_v8 = vperm.slane %v2916_v63, %v6257_v47  ;;  %v2939_v9 = vrot.slane %v2934_v4, 4  ;;  %3052 = vmatpush.bf16.msrb.mxu1 %v4855_v26  ;;  %v4888_v3 = vld [vmem:[%s6054_s11 + $0xe4] sm:$0xf] }
 0x72d   : > { %v5096_v59 = vpack.i.bf16 %v2944_v6, %v2890_v62  ;;  %v4627_v31 = vor.u32 %v4890_v22, %v4626_v2  ;;  %v4891_v62 = vld [vmem:[%s6054_s11 + $0xf4] sm:$0xf0]  ;;  %v4631_v33 = vor.u32 %v4888_v3, %v4628_v20  ;;  %v4889_v6 = vld [vmem:[%s6054_s11 + $0xec] sm:$0xf]  ;;  %v4880_v26 = vld [vmem:[%s6054_s11 + $0xa4] sm:$0xf] }
 0x72e   : > { %v2946_v14 = vsel %vm1587_vm0, %v2938_v40, %v2945_v52  ;;  %v2941_v16 = vrot.slane %v2922_v8, 4  ;;  %v2940_v18 = vsel %vm1587_vm0, %v2939_v9, %v2922_v8  ;;  %v4636_v52 = vld [vmem:[%s6054_s11 + $0xf8] sm:$0xf0]  ;;  %v4610_v9 = vld [vmem:[%s6054_s11 + $0xc0] sm:$0xf] }
 0x72f   : > { %5097 = vrot.lane.b32.xlu2 %v5096_v59, %s5657_s9  ;;  %v5101_v23 = vpack.i.bf16 %v2946_v14, %v2892_v10  ;;  %3319 = vmatpush.bf16.msrb.mxu2 %v4627_v31  ;;  %v4639_v8 = vor.u32 %v4889_v6, %v4636_v52  ;;  %v4886_v59 = vld [vmem:[%s6054_s11 + $0xcc] sm:$0xf0]  ;;  %v4884_v10 = vld [vmem:[%s6054_s11 + $0xc4] sm:$0xf]  ;;  %v4572_v3 = vld [vmem:[%s6054_s11 + $0x78] sm:$0xf0] }
 0x730   : > { %v2942_v47 = vsel %vm1587_vm0, %v2934_v4, %v2941_v16  ;;  %3053 = vmatpush.bf16.msrb.mxu1 %v4854_v27  ;;  %v4634_v4 = vld [vmem:[%s6054_s11 + $0xe8] sm:$0xf]  ;;  %3333 = vmatpush.bf16.msra.mxu3 %v4631_v33  ;;  %v4611_v14 = vor.u32 %v4886_v59, %v4610_v9  ;;  %v4612_v16 = vld [vmem:[%s6054_s11 + $0xd0] sm:$0xf0]  ;;  %v4595_v27 = vor.u32 %v4882_v24, %v4594_v15  ;;  %v4546_v31 = vld [vmem:[%s6054_s11 + $0x40] sm:$0xf] }
 0x731   : > { %5102 = vrot.lane.b32.xlu0 %v5101_v23, %s5656_s5  ;;  %v5091_v46 = vpack.i.bf16 %v2942_v47, %v2888_v34  ;;  %v4635_v63 = vor.u32 %v4891_v62, %v4634_v4  ;;  %v4887_v23 = vld [vmem:[%s6054_s11 + $0xd4] sm:$0xf0]  ;;  %v4615_v34 = vor.u32 %v4884_v10, %v4612_v16  ;;  %v4870_v4 = vld [vmem:[%s6054_s11 + $0x4c] sm:$0xf0]  ;;  %v4868_v62 = vld [vmem:[%s6054_s11 + $0x44] sm:$0xf] }
 0x732   : > { %v4548_v33 = vld [vmem:[%s6054_s11 + $0x50] sm:$0xf0]  ;;  %v4554_v6 = vld [vmem:[%s6054_s11 + $0x48] sm:$0xf]  ;;  %v4871_v52 = vld [vmem:[%s6054_s11 + $0x54] sm:$0xf0] }
 0x733   : > { %5092 = vrot.lane.b32.xlu1 %v5091_v46, %s5655_s8  ;;  %3347 = vmatpush.bf16.msrb.mxu0 %v4635_v63  ;;  %v4885_v46 = vld [vmem:[%s6054_s11 + $0xcc] sm:$0xf]  ;;  %v4547_v63 = vor.u32 %v4870_v4, %v4546_v31  ;;  %v4551_v9 = vor.u32 %v4868_v62, %v4548_v33  ;;  %v4555_v59 = vor.u32 %v4871_v52, %v4554_v6  ;;  %v4556_v10 = vld [vmem:[%s6054_s11 + $0x58] sm:$0xf0]  ;;  %v4866_v16 = vld [vmem:[%s6054_s11 + $0x2c] sm:$0xf0] }
 0x734   : > { %3054 = vmatpush.bf16.msrb.mxu1 %v4853_v30  ;;  %3320 = vmatpush.bf16.msrb.mxu2 %v4611_v14  ;;  %v4623_v53 = vor.u32 %v4885_v46, %v4620_v21  ;;  %v4596_v30 = vld [vmem:[%s6054_s11 + $0xb0] sm:$0xf0]  ;;  %v4530_v14 = vld [vmem:[%s6054_s11 + $0x20] sm:$0xf]  ;;  %v4867_v21 = vld [vmem:[%s6054_s11 + $0x34] sm:$0xf0] }
 0x735   : > { %3334 = vmatpush.bf16.msra.mxu3 %v4615_v34  ;;  %v4532_v34 = vld [vmem:[%s6054_s11 + $0x30] sm:$0xf0]  ;;  %v4540_v15 = vld [vmem:[%s6054_s11 + $0x38] sm:$0xf0]  ;;  %v6879_v62 = vld [vmem:[%s6090_s22] sm:$0xf] }
 0x736   : > { %v4915_v33 = vld [vmem:[%s6056_s24 + $0xb8] sm:$0xff]  ;;  %v3154_v6 = vperm.slane %v6879_v62, 3  ;;  %v4914_v52 = vld [vmem:[%s6056_s24 + $0xb0] sm:$0xff]  ;;  %s7221_s22 = scalar_lea.vmem [#allocation17], %s6032_s15 }
 0x738   : > { %3055 = vmatpush.bf16.msrb.mxu1 %v4852_v17  ;;  %v4602_v17 = vld [vmem:[%s6054_s11 + $0xa8] sm:$0xf]  ;;  %3321 = vmatpush.bf16.msrb.mxu2 %v4595_v27  ;;  %v4514_v27 = vld [vmem:[%s6054_s11] sm:$0xf] }
 0x73c   : > { %3361 = vmatpush.bf16.msra.mxu1 %v4639_v8  ;;  %v4869_v8 = vld [vmem:[%s6054_s11 + $0x4c] sm:$0xf] }
 0x740   : > { %3362 = vmatpush.bf16.msra.mxu1 %v4623_v53  ;;  %v4865_v53 = vld [vmem:[%s6054_s11 + $0x2c] sm:$0xf] }
 0x789   : > { %v5098_v1 = vpop.permute.xlu2 %5097 }
 0x78a   : > { %v5100_v44 = vunpack.i.h.bf16 %v5098_v1  ;;  %v5099_v35 = vunpack.i.l.bf16 %v5098_v1  ;;  %v4883_v1 = vld [vmem:[%s6054_s11 + $0xb4] sm:$0xf0] }
 0x7a3   : > { %v5103_v19 = vpop.permute.xlu0 %5102 }
 0x7a4   : > { %v5105_v13 = vunpack.i.h.bf16 %v5103_v19  ;;  %v5104_v25 = vunpack.i.l.bf16 %v5103_v19  ;;  %v4599_v19 = vor.u32 %v4880_v26, %v4596_v30  ;;  %v4531_v26 = vor.u32 %v4866_v16, %v4530_v14  ;;  %v4899_v16 = vld [vmem:[%s6056_s24 + $0x38] sm:$0xff] }
 0x7a5   : > { %v5093_v39 = vpop.permute.xlu1 %5092 }
 0x7a6   : > { %v5095_v36 = vunpack.i.h.bf16 %v5093_v39  ;;  %v5094_v42 = vunpack.i.l.bf16 %v5093_v39  ;;  %v4603_v39 = vor.u32 %v4883_v1, %v4602_v17  ;;  %3335 = vmatpush.bf16.msra.mxu3 %v4599_v19  ;;  %v4862_v1 = vld [vmem:[%s6054_s11 + $0xc] sm:$0xf0]  ;;  %v4860_v19 = vld [vmem:[%s6054_s11 + $0x4] sm:$0xf] }
 0x7a8   : > { %v2971_v49 = vsel %vm2311_vm1, %v6743_v55, %v5094_v42  ;;  %v2972_v50 = vsel %vm2311_vm1, %v2940_v18, %v5095_v36  ;;  %v4618_v18 = vld [vmem:[%s6054_s11 + $0xc8] sm:$0xf]  ;;  %v4881_v36 = vld [vmem:[%s6054_s11 + $0xac] sm:$0xf]  ;;  %v4604_v42 = vld [vmem:[%s6054_s11 + $0xb8] sm:$0xf0] }
 0x7a9   : > { %v2974_v51 = vsel %vm2973_vm5, %v2971_v49, %v5099_v35  ;;  %v2975_v37 = vsel %vm2973_vm5, %v2972_v50, %v5100_v44  ;;  %v4619_v47 = vor.u32 %v4887_v23, %v4618_v18  ;;  %v4607_v44 = vor.u32 %v4881_v36, %v4604_v42  ;;  %v4578_v35 = vld [vmem:[%s6054_s11 + $0x80] sm:$0xf]  ;;  %v4580_v50 = vld [vmem:[%s6054_s11 + $0x90] sm:$0xf0]  ;;  %v4864_v23 = vld [vmem:[%s6054_s11 + $0x24] sm:$0xf] }
 0x7aa   : > { %v2977_v48 = vsel %vm2976_vm6, %v2974_v51, %v5104_v25  ;;  %v2978_v45 = vsel %vm2976_vm6, %v2975_v37, %v5105_v13  ;;  %v4878_v13 = vld [vmem:[%s6054_s11 + $0x8c] sm:$0xf0]  ;;  %v4876_v25 = vld [vmem:[%s6054_s11 + $0x84] sm:$0xf]  ;;  %v4586_v51 = vld [vmem:[%s6054_s11 + $0x88] sm:$0xf]  ;;  %v4559_v18 = vor.u32 %v4869_v8, %v4556_v10  ;;  %v4535_v30 = vor.u32 %v4864_v23, %v4532_v34 }
 0x7ab   : > { %v2979_v7 = vpack.c.bf16 %v2978_v45, %v2977_v48  ;;  %3348 = vmatpush.bf16.msrb.mxu0 %v4619_v47  ;;  %3363 = vmatpush.bf16.msra.mxu1 %v4607_v44  ;;  %v4579_v49 = vor.u32 %v4878_v13, %v4578_v35  ;;  %v4879_v37 = vld [vmem:[%s6054_s11 + $0x94] sm:$0xf0]  ;;  %v4583_v45 = vor.u32 %v4876_v25, %v4580_v50  ;;  %v4538_v47 = vld [vmem:[%s6054_s11 + $0x28] sm:$0xf]  ;;  %v4524_v50 = vld [vmem:[%s6054_s11 + $0x18] sm:$0xf0] }
 0x7ac   : > { %v4539_v17 = vor.u32 %v4867_v21, %v4538_v47  ;;  %v4543_v44 = vor.u32 %v4865_v53, %v4540_v15  ;;  %v4522_v35 = vld [vmem:[%s6054_s11 + $0x8] sm:$0xf]  ;;  %v4863_v13 = vld [vmem:[%s6054_s11 + $0x14] sm:$0xf0]  ;;  %v4922_v8 = vld [vmem:[%s6056_s24 + $0xf0] sm:$0xff]  ;;  %v3151_v23 = vperm.slane %v6879_v62, 0 }
 0x7ad   : > { %3056 = vmatmul.bf16.vlgmr.msrb.gmra.mxu1 %v2979_v7  ;;  %v4587_v7 = vor.u32 %v4879_v37, %v4586_v51  ;;  %3322 = vmatpush.bf16.msrb.mxu2 %v4579_v49  ;;  %v4861_v49 = vld [vmem:[%s6054_s11 + $0xc] sm:$0xf]  ;;  %v4515_v51 = vor.u32 %v4862_v1, %v4514_v27  ;;  %v3152_v34 = vperm.slane %v6879_v62, 1 }
 0x7ae   : > { %3336 = vmatpush.bf16.msra.mxu3 %v4583_v45  ;;  %v4523_v45 = vor.u32 %v4863_v13, %v4522_v35  ;;  %v4913_v21 = vld [vmem:[%s6056_s24 + $0xa8] sm:$0xff] }
 0x7af   : > { %3349 = vmatpush.bf16.msrb.mxu0 %v4603_v39  ;;  %v4516_v39 = vld [vmem:[%s6054_s11 + $0x10] sm:$0xf0]  ;;  %v4921_v53 = vld [vmem:[%s6056_s24 + $0xe8] sm:$0xff] }
 0x7b3   : > { %3350 = vmatpush.bf16.msrb.mxu0 %v4587_v7  ;;  %v4527_v7 = vor.u32 %v4861_v49, %v4524_v50  ;;  %v4897_v50 = vld [vmem:[%s6056_s24 + $0x28] sm:$0xff] }
 0x82a   : > { %v3057_v32 = vpop.f32.mrf.mxu1 }
 0x82b   : > { %v3058_v11 = vadd.f32 %v5108_v54, %v3057_v32  ;;  %v4588_v32 = vld [vmem:[%s6054_s11 + $0x98] sm:$0xf0] }
 0x82d   : > { %v6783_v57 = vadd.f32 %v5186_v56, %v3058_v11  ;;  %v4562_v11 = vld [vmem:[%s6054_s11 + $0x60] sm:$0xf] }
 0x82f   : > { %3066 = vadd.xlane.f32.xlu1 %v6783_v57 }
 0x832   : > { %v3059_v58 = vpop.f32.mrf.mxu1 }
 0x833   : > { %v3060_v55 = vadd.f32 %v5108_v54, %v3059_v58  ;;  %v4877_v54 = vld [vmem:[%s6054_s11 + $0x8c] sm:$0xf] }
 0x834   : > { %v4591_v58 = vor.u32 %v4877_v54, %v4588_v32 }
 0x835   : > { %v6786_v29 = vadd.f32 %v5187_v12, %v3060_v55  ;;  %v4874_v55 = vld [vmem:[%s6054_s11 + $0x6c] sm:$0xf0]  ;;  %v4872_v12 = vld [vmem:[%s6054_s11 + $0x64] sm:$0xf] }
 0x836   : > { %3364 = vmatpush.bf16.msra.mxu1 %v4591_v58 }
 0x837   : > { %3068 = vadd.xlane.f32.xlu0 %v6786_v29 }
 0x8a2   : > { %v3067_v5 = vpop.xlane.xlu1 %3066 }
 0x8a3   : > { %v3070_v41 = vmul.f32 %v3067_v5, %v6150_v28  ;;  %v4564_v5 = vld [vmem:[%s6054_s11 + $0x70] sm:$0xf0] }
 0x8a5   : > { %v6791_v38 = vsub.f32 %v6783_v57, %v3070_v41  ;;  %v4563_v41 = vor.u32 %v4874_v55, %v4562_v11 }
 0x8a7   : > { %v3074_v60 = vmul.f32 %v6791_v38, %v6791_v38  ;;  %3323 = vmatpush.bf16.msrb.mxu2 %v4563_v41 }
 0x8a9   : > { %3076 = vadd.xlane.f32.xlu2 %v3074_v60  ;;  %v4567_v60 = vor.u32 %v4872_v12, %v4564_v5 }
 0x8aa   : > { %v3069_v61 = vpop.xlane.xlu0 %3068 }
 0x8ab   : > { %v3071_v43 = vmul.f32 %v3069_v61, %v6150_v28  ;;  %v4570_v61 = vld [vmem:[%s6054_s11 + $0x68] sm:$0xf]  ;;  %3337 = vmatpush.bf16.msra.mxu3 %v4567_v60  ;;  %3324 = vmatpush.bf16.msrb.mxu2 %v4547_v63  ;;  %v4923_v63 = vld [vmem:[%s6056_s24 + $0xf8] sm:$0xff] }
 0x8ad   : > { %v6797_v40 = vsub.f32 %v6786_v29, %v3071_v43  ;;  %v4875_v43 = vld [vmem:[%s6054_s11 + $0x74] sm:$0xf0] }
 0x8ae   : > { %v4571_v22 = vor.u32 %v4875_v43, %v4570_v61 }
 0x8af   : > { %v3075_v0 = vmul.f32 %v6797_v40, %v6797_v40  ;;  %3338 = vmatpush.bf16.msra.mxu3 %v4551_v9  ;;  %3325 = vmatpush.bf16.msrb.mxu2 %v4531_v26 }
 0x8b0   : > { %3351 = vmatpush.bf16.msrb.mxu0 %v4571_v22 }
 0x8b1   : > { %3078 = vadd.xlane.f32.xlu1 %v3075_v0  ;;  %v4873_v0 = vld [vmem:[%s6054_s11 + $0x6c] sm:$0xf]  ;;  %s7205_s11 = scalar_lea.vmem [#allocation11], %s6032_s15  ;;  %s7222_s15 = sld [smem:[#allocation34_spill]] }
 0x8b2   : > { %v4575_v20 = vor.u32 %v4873_v0, %v4572_v3  ;;  %v5109_v61 = vld [vmem:[%s7205_s11] ss:$0 sm:$0xff] }
 0x8b3   : > { %3339 = vmatpush.bf16.msra.mxu3 %v4535_v30  ;;  %3326 = vmatpush.bf16.msrb.mxu2 %v4515_v51  ;;  %v5110_v3 = vld [vmem:[%s7206_s21] ss:$0 sm:$0xff]  ;;  %v4898_v30 = vld [vmem:[%s6056_s24 + $0x30] sm:$0xff]  ;;  %v4905_v51 = vld [vmem:[%s6056_s24 + $0x68] sm:$0xff] }
 0x8b4   : > { %3365 = vmatpush.bf16.msra.mxu1 %v4575_v20  ;;  %3352 = vmatpush.bf16.msrb.mxu0 %v4555_v59 }
 0x8b7   : > { %3807 = vmatpush.bf16.msra.mxu2 %v4899_v16  ;;  %p4776_p5 = scmp.ne.s32.totalorder %s7222_s15, 3 }
 0x8b8   : > { %3366 = vmatpush.bf16.msra.mxu1 %v4559_v18  ;;  %3353 = vmatpush.bf16.msrb.mxu0 %v4539_v17  ;;  %v4907_v18 = vld [vmem:[%s6056_s24 + $0x78] sm:$0xff]  ;;  %v4906_v17 = vld [vmem:[%s6056_s24 + $0x70] sm:$0xff] }
 0x8bb   : > { %3808 = vmatpush.bf16.msra.mxu2 %v4898_v30 }
 0x8bc   : > { %3367 = vmatpush.bf16.msra.mxu1 %v4543_v44  ;;  %3354 = vmatpush.bf16.msrb.mxu0 %v4523_v45 }
 0x8bf   : > { %3809 = vmatpush.bf16.msra.mxu2 %v4897_v50 }
 0x8c0   : > { %3368 = vmatpush.bf16.msra.mxu1 %v4527_v7  ;;  %3835 = vmatpush.bf16.msra.mxu0 %v4915_v33 }
 0x8c4   : > { %3849 = vmatpush.bf16.msrb.mxu1 %v4923_v63  ;;  %3836 = vmatpush.bf16.msra.mxu0 %v4914_v52  ;;  %v4894_v52 = vld [vmem:[%s6056_s24 + $0x10] sm:$0xff] }
 0x8c8   : > { %3850 = vmatpush.bf16.msrb.mxu1 %v4922_v8  ;;  %3837 = vmatpush.bf16.msra.mxu0 %v4913_v21  ;;  %v4902_v8 = vld [vmem:[%s6056_s24 + $0x50] sm:$0xff] }
 0x8cc   : > { %3851 = vmatpush.bf16.msrb.mxu1 %v4921_v53 }
 0x91c   : > { %v3077_v48 = vpop.xlane.xlu2 %3076 }
 0x91d   : > { %v3080_v56 = vmul.f32 %v3077_v48, %v6150_v28  ;;  %v4519_v48 = vor.u32 %v4860_v19, %v4516_v39  ;;  %v4912_v39 = vld [vmem:[%s6056_s24 + $0xa0] sm:$0xff] }
 0x91e   : > { %3838 = vmatpush.bf16.msra.mxu0 %v4912_v39 }
 0x91f   : > { %v6841_v2 = vadd.f32 1e-05, %v3080_v56  ;;  %3340 = vmatpush.bf16.msra.mxu3 %v4519_v48 }
 0x921   : > { %5150 = vrsqrt.f32 %v6841_v2  ;;  %vm3090_vm8 = vweird.f32 %v6841_v2 }
 0x923   : > { %3821 = vmatpush.bf16.msrb.mxu3 %v4907_v18 }
 0x924   : > { %v3079_v46 = vpop.xlane.xlu1 %3078 }
 0x925   : > { %v3081_v24 = vmul.f32 %v3079_v46, %v6150_v28 }
 0x927   : > { %v5151_v36 = vpop.eup %5150  ;;  %v3083_v42 = vadd.f32 1e-05, %v3081_v24  ;;  %3822 = vmatpush.bf16.msrb.mxu3 %v4906_v17 }
 0x928   : > { %v3085_v25 = vmul.f32 %v5151_v36, %v6841_v2  ;;  %vm3091_vm7 = vweird.f32 %v5151_v36 }
 0x929   : > { %5152 = vrsqrt.f32 %v3083_v42  ;;  %vm3092_vm9 = vmor %vm3090_vm8, %vm3091_vm7  ;;  %vm3100_vm11 = vweird.f32 %v3083_v42 }
 0x92a   : > { %v3086_v37 = vmul.f32 %v5151_v36, %v3085_v25 }
 0x92b   : > { %3823 = vmatpush.bf16.msrb.mxu3 %v4905_v51 }
 0x92c   : > { %v3087_v54 = vmul.f32 0.5, %v3086_v37 }
 0x92e   : > { %v3088_v32 = vsub.f32 1.5, %v3087_v54  ;;  %v4911_v54 = vld [vmem:[%s6056_s24 + $0x98] sm:$0xff] }
 0x92f   : > { %v5153_v11 = vpop.eup %5152  ;;  %3839 = vmatpush.bf16.msra.mxu0 %v4911_v54 }
 0x930   : > { %v3089_v56 = vmul.f32 %v5151_v36, %v3088_v32  ;;  %v3095_v58 = vmul.f32 %v5153_v11, %v3083_v42  ;;  %vm3101_vm10 = vweird.f32 %v5153_v11  ;;  %v4919_v32 = vld [vmem:[%s6056_s24 + $0xd8] sm:$0xff] }
 0x931   : > { %vm3102_vm12 = vmor %vm3100_vm11, %vm3101_vm10 }
 0x932   : > { %v3096_v55 = vmul.f32 %v5153_v11, %v3095_v58  ;;  %v3093_v12 = vsel %vm3092_vm9, %v5151_v36, %v3089_v56  ;;  %v4920_v36 = vld [vmem:[%s6056_s24 + $0xe0] sm:$0xff] }
 0x933   : > { %v3104_v60 = vmul.f32 %v3093_v12, %v6791_v38  ;;  %3852 = vmatpush.bf16.msrb.mxu1 %v4920_v36  ;;  %v4904_v12 = vld [vmem:[%s6056_s24 + $0x60] sm:$0xff] }
 0x934   : > { %v3097_v5 = vmul.f32 0.5, %v3096_v55  ;;  %v4896_v55 = vld [vmem:[%s6056_s24 + $0x20] sm:$0xff]  ;;  %3824 = vmatpush.bf16.msrb.mxu3 %v4904_v12 }
 0x935   : > { %v3109_v2 = vmul.f32 %v5109_v61, %v3104_v60  ;;  %3810 = vmatpush.bf16.msra.mxu2 %v4896_v55 }
 0x936   : > { %v3098_v41 = vsub.f32 1.5, %v3097_v5 }
 0x937   : > { %v3114_v20 = vadd.f32 %v5110_v3, %v3109_v2  ;;  %3853 = vmatpush.bf16.msrb.mxu1 %v4919_v32  ;;  %v4895_v2 = vld [vmem:[%s6056_s24 + $0x18] sm:$0xff] }
 0x938   : > { %v3099_v43 = vmul.f32 %v5153_v11, %v3098_v41 }
 0x939   : > { %3811 = vmatpush.bf16.msra.mxu2 %v4895_v2 }
 0x93a   : > { %v3103_v0 = vsel %vm3102_vm12, %v5153_v11, %v3099_v43 }
 0x93b   : > { %v3105_v22 = vmul.f32 %v3103_v0, %v6797_v40  ;;  %v3153_v40 = vperm.slane %v6879_v62, 2  ;;  %v4910_v0 = vld [vmem:[%s6056_s24 + $0x90] sm:$0xff]  ;;  %v4901_v62 = vld [vmem:[%s6056_s24 + $0x48] sm:$0xff] }
 0x93c   : > { %3840 = vmatpush.bf16.msra.mxu0 %v4910_v0 }
 0x93d   : > { %v3110_v31 = vmul.f32 %v5109_v61, %v3105_v22  ;;  %v4918_v22 = vld [vmem:[%s6056_s24 + $0xd0] sm:$0xff]  ;;  %3812 = vmatpush.bf16.msra.mxu2 %v4894_v52 }
 0x93e   : > { %3854 = vmatpush.bf16.msrb.mxu1 %v4918_v22 }
 0x93f   : > { %v3115_v4 = vadd.f32 %v5110_v3, %v3110_v31  ;;  %v4903_v3 = vld [vmem:[%s6056_s24 + $0x58] sm:$0xff] }
 0x940   : > { %3825 = vmatpush.bf16.msrb.mxu3 %v4903_v3 }
 0x941   : > { %v3116_v38 = vpack.c.bf16 %v3115_v4, %v3114_v20 }
 0x943   : > { %3327 = vmatmul.bf16.vlgmr.msrb.gmra.mxu2 %v3116_v38  ;;  %3341 = vmatmul.bf16.vlgmr.msra.gmra.mxu3 %v3116_v38 }
 0x944   : > { %3355 = vmatmul.bf16.vlgmr.msrb.gmra.mxu0 %v3116_v38  ;;  %3369 = vmatmul.bf16.vlgmr.msra.gmra.mxu1 %v3116_v38  ;;  %v4909_v38 = vld [vmem:[%s6056_s24 + $0x88] sm:$0xff] }
 0x945   : > { %3841 = vmatpush.bf16.msra.mxu0 %v4909_v38  ;;  %3826 = vmatpush.bf16.msrb.mxu3 %v4902_v8 }
 0x949   : > { %3827 = vmatpush.bf16.msrb.mxu3 %v4901_v62 }
 0x9c1   : > { %v3356_v9 = vpop.f32.mrf.mxu0  ;;  %v3370_v59 = vpop.f32.mrf.mxu1 }
 0x9c2   : > { %v6887_v10 = vadd.f32 %v3356_v9, %v3153_v40  ;;  %v6889_v14 = vadd.f32 %v3370_v59, %v3154_v6 }
 0x9c4   : > { %v4642_v47 = vmul.f32 -1.702, %v6887_v10  ;;  %v4643_v46 = vmul.f32 -1.702, %v6889_v14 }
 0x9c6   : > { %v3395_v15 = vmul.f32 1.442695, %v4642_v47  ;;  %v3397_v24 = vmul.f32 1.442695, %v4643_v46  ;;  %v3328_v26 = vpop.f32.mrf.mxu2  ;;  %v3342_v27 = vpop.f32.mrf.mxu3  ;;  %v4908_v47 = vld [vmem:[%s6056_s24 + $0x80] sm:$0xff] }
 0x9c7   : > { %v6901_v1 = vadd.f32 %v3328_v26, %v3151_v23  ;;  %v6905_v19 = vadd.f32 %v3342_v27, %v3152_v34  ;;  %v4916_v46 = vld [vmem:[%s6056_s24 + $0xc0] sm:$0xff]  ;;  %3842 = vmatpush.bf16.msra.mxu0 %v4908_v47  ;;  %v4893_v27 = vld [vmem:[%s6056_s24 + $0x8] sm:$0xff] }
 0x9c8   : > { %5154 = vpow2.f32 %v3395_v15  ;;  %3813 = vmatpush.bf16.msra.mxu2 %v4893_v27 }
 0x9c9   : > { %5156 = vpow2.f32 %v3397_v24  ;;  %v4640_v42 = vmul.f32 -1.702, %v6901_v1  ;;  %v4641_v44 = vmul.f32 -1.702, %v6905_v19  ;;  %v3358_v35 = vpop.f32.mrf.mxu0  ;;  %v3372_v13 = vpop.f32.mrf.mxu1 }
 0x9ca   : > { %v6911_v25 = vadd.f32 %v3358_v35, %v3153_v40  ;;  %v6913_v49 = vadd.f32 %v3372_v13, %v3154_v6  ;;  %v4917_v40 = vld [vmem:[%s6056_s24 + $0xc8] sm:$0xff]  ;;  %v4900_v35 = vld [vmem:[%s6056_s24 + $0x40] sm:$0xff] }
 0x9cb   : > { %v3391_v37 = vmul.f32 1.442695, %v4640_v42  ;;  %v3393_v48 = vmul.f32 1.442695, %v4641_v44  ;;  %3855 = vmatpush.bf16.msrb.mxu1 %v4917_v40  ;;  %v4892_v44 = vld [vmem:[%s6056_s24] sm:$0xff]  ;;  %3828 = vmatpush.bf16.msrb.mxu3 %v4900_v35 }
 0x9cc   : > { %v4646_v45 = vmul.f32 -1.702, %v6911_v25  ;;  %v4647_v7 = vmul.f32 -1.702, %v6913_v49  ;;  %3814 = vmatpush.bf16.msra.mxu2 %v4892_v44 }
 0x9cd   : > { %5158 = vpow2.f32 %v3391_v37 }
 0x9ce   : > { %v5155_v11 = vpop.eup %5154  ;;  %v3403_v56 = vmul.f32 1.442695, %v4646_v45  ;;  %v3330_v58 = vpop.f32.mrf.mxu2  ;;  %5160 = vpow2.f32 %v3393_v48  ;;  %v3405_v60 = vmul.f32 1.442695, %v4647_v7 }
 0x9cf   : > { %v5157_v5 = vpop.eup %5156  ;;  %v6923_v41 = vadd.f32 1.0, %v5155_v11  ;;  %v6925_v61 = vadd.f32 %v3330_v58, %v3151_v23  ;;  %v3344_v63 = vpop.f32.mrf.mxu3  ;;  %3856 = vmatpush.bf16.msrb.mxu1 %v4916_v46 }
 0x9d0   : > { %v6927_v43 = vadd.f32 1.0, %v5157_v5  ;;  %5162 = vpow2.f32 %v3403_v56  ;;  %v6951_v23 = vadd.f32 %v3344_v63, %v3152_v34 }
 0x9d1   : > { %5164 = vrcp.f32 %v6923_v41  ;;  %v4644_v20 = vmul.f32 -1.702, %v6925_v61  ;;  %v3454_v42 = vand.u32 2147483647, %v6923_v41  ;;  %v3456_v13 = vand.u32 2147483648, %v6923_v41 }
 0x9d2   : > { %5166 = vrcp.f32 %v6927_v43  ;;  %v4645_v30 = vmul.f32 -1.702, %v6951_v23  ;;  %v3469_v50 = vand.u32 2147483647, %v6927_v43  ;;  %v3471_v51 = vand.u32 2147483648, %v6927_v43 }
 0x9d3   : > { %v5159_v31 = vpop.eup %5158  ;;  %5168 = vpow2.f32 %v3405_v60  ;;  %v3399_v59 = vmul.f32 1.442695, %v4644_v20  ;;  %vm3450_vm14 = vweird.f32 %v6923_v41  ;;  %vm6984_vm15 = vcmp.eq.f32.partialorder %v3454_v42, 8.507059e+37 }
 0x9d4   : > { %v6936_v4 = vadd.f32 1.0, %v5159_v31  ;;  %v5161_v33 = vpop.eup %5160  ;;  %v3401_v37 = vmul.f32 1.442695, %v4645_v30  ;;  %vm3465_vm0 = vweird.f32 %v6927_v43  ;;  %v3457_v56 = vor.u32 1.1754944e-38, %v3456_v13 }
 0x9d5   : > { %v6957_v24 = vadd.f32 1.0, %v5161_v33  ;;  %vm6989_vm1 = vcmp.eq.f32.partialorder %v3469_v50, 8.507059e+37  ;;  %v3472_v55 = vor.u32 1.1754944e-38, %v3471_v51 }
 0x9d6   : > { %v5163_v6 = vpop.eup %5162  ;;  %5170 = vrcp.f32 %v6936_v4  ;;  %v3426_v38 = vand.u32 2147483648, %v6936_v4  ;;  %v3424_v51 = vand.u32 2147483647, %v6936_v4 }
 0x9d7   : > { %v6942_v9 = vpop.eup %5164  ;;  %v6959_v26 = vadd.f32 1.0, %v5163_v6  ;;  %5172 = vpow2.f32 %v3399_v59 }
 0x9d8   : > { %v6944_v16 = vpop.eup %5166  ;;  %v3446_v18 = vmul.f32 %v6942_v9, %v6923_v41  ;;  %vm3451_vm13 = vweird.f32 %v6942_v9 }
 0x9d9   : > { %v5169_v21 = vpop.eup %5168  ;;  %v3461_v53 = vmul.f32 %v6944_v16, %v6927_v43  ;;  %5174 = vrcp.f32 %v6959_v26  ;;  %vm6996_vm2 = vmor %vm3450_vm14, %vm3451_vm13  ;;  %vm3466_vm3 = vweird.f32 %v6944_v16  ;;  %v3514_v41 = vand.u32 2147483647, %v6959_v26 }
 0x9da   : > { %v3447_v15 = vsub.f32 1.0, %v3446_v18  ;;  %v6963_v34 = vadd.f32 1.0, %v5169_v21  ;;  %5176 = vrcp.f32 %v6957_v24  ;;  %vm3510_vm4 = vweird.f32 %v6959_v26  ;;  %vm7021_vm6 = vmor %vm3465_vm0, %vm3466_vm3 }
 0x9db   : > { %v3462_v39 = vsub.f32 1.0, %v3461_v53  ;;  %v3516_v33 = vand.u32 2147483648, %v6959_v26  ;;  %vm7026_vm8 = vcmp.eq.f32.partialorder %v3514_v41, 8.507059e+37  ;;  %vm3420_vm13 = vweird.f32 %v6936_v4 }
 0x9dc   : > { %v3448_v17 = vmul.f32 %v6942_v9, %v3447_v15  ;;  %v6968_v36 = vpop.eup %5170  ;;  %5178 = vrcp.f32 %v6963_v34  ;;  %v3531_v43 = vand.u32 2147483648, %v6963_v34  ;;  %v3529_v27 = vand.u32 2147483647, %v6963_v34 }
 0x9dd   : > { %v5173_v48 = vpop.eup %5172  ;;  %v3463_v7 = vmul.f32 %v6944_v16, %v3462_v39  ;;  %v3416_v54 = vmul.f32 %v6968_v36, %v6936_v4  ;;  %5180 = vpow2.f32 %v3401_v37  ;;  %vm3421_vm7 = vweird.f32 %v6968_v36 }
 0x9de   : > { %v3449_v45 = vadd.f32 %v6942_v9, %v3448_v17  ;;  %v7002_v0 = vadd.f32 1.0, %v5173_v48  ;;  %v3517_v53 = vor.u32 1.1754944e-38, %v3516_v33  ;;  %vm3525_vm11 = vweird.f32 %v6963_v34 }
 0x9df   : > { %v5175_v32 = vpop.eup %5174  ;;  %v3464_v3 = vadd.f32 %v6944_v16, %v3463_v7  ;;  %v3417_v31 = vsub.f32 1.0, %v3416_v54  ;;  %v3532_v50 = vor.u32 1.1754944e-38, %v3531_v43  ;;  %vm3530_vm14 = vcmp.eq.f32.partialorder %v3529_v27, 8.507059e+37 }
 0x9e0   : > { %v3506_v12 = vmul.f32 %v5175_v32, %v6959_v26  ;;  %v6994_v5 = vpop.eup %5176  ;;  %v3453_v2 = vsel %vm6996_vm2, %v6942_v9, %v3449_v45  ;;  %vm3511_vm5 = vweird.f32 %v5175_v32  ;;  %5182 = vrcp.f32 %v7002_v0 }
 0x9e1   : > { %v3431_v40 = vmul.f32 %v6994_v5, %v6957_v24  ;;  %v3458_v52 = vsel %vm6984_vm15, %v3457_v56, %v3453_v2  ;;  %v3468_v18 = vsel %vm7021_vm6, %v6944_v16, %v3464_v3  ;;  %v3418_v47 = vmul.f32 %v6968_v36, %v3417_v31  ;;  %vm3512_vm9 = vmor %vm3510_vm4, %vm3511_vm5 }
 0x9e2   : > { %v5179_v22 = vpop.eup %5178  ;;  %v3507_v20 = vsub.f32 1.0, %v3506_v12  ;;  %v3537_v16 = vmul.f32 %v3458_v52, %v6887_v10  ;;  %v3473_v39 = vsel %vm6989_vm1, %v3472_v55, %v3468_v18  ;;  %vm7056_vm15 = vmor %vm3420_vm13, %vm3421_vm7  ;;  %v3427_v4 = vor.u32 1.1754944e-38, %v3426_v38 }
 0x9e3   : > { %v3521_v63 = vmul.f32 %v5179_v22, %v6963_v34  ;;  %v5181_v21 = vpop.eup %5180  ;;  %vm3526_vm10 = vweird.f32 %v5179_v22  ;;  %v3432_v62 = vsub.f32 1.0, %v3431_v40  ;;  %v3419_v35 = vadd.f32 %v6968_v36, %v3418_v47 }
 0x9e4   : > { %v3508_v6 = vmul.f32 %v5175_v32, %v3507_v20  ;;  %v7039_v17 = vadd.f32 1.0, %v5181_v21  ;;  %vm3527_vm12 = vmor %vm3525_vm11, %vm3526_vm10  ;;  %v3538_v7 = vmul.f32 %v3473_v39, %v6889_v14  ;;  %v3486_v56 = vand.u32 2147483648, %v7002_v0  ;;  %v5111_v21 = vld [vmem:[%s7221_s22] ss:$0 sm:$0xff] }
 0x9e5   : > { %v3522_v59 = vsub.f32 1.0, %v3521_v63  ;;  %v3433_v37 = vmul.f32 %v6994_v5, %v3432_v62  ;;  %v3423_v11 = vsel %vm7056_vm15, %v6968_v36, %v3419_v35  ;;  %v3484_v14 = vand.u32 2147483647, %v7002_v0 }
 0x9e6   : > { %v3509_v46 = vadd.f32 %v5175_v32, %v3508_v6  ;;  %v5183_v44 = vpop.eup %5182  ;;  %5184 = vrcp.f32 %v7039_v17  ;;  %vm3425_vm1 = vcmp.eq.f32.partialorder %v3424_v51, 8.507059e+37  ;;  %vm3436_vm2 = vweird.f32 %v6994_v5 }
 0x9e7   : > { %v3523_v15 = vmul.f32 %v5179_v22, %v3522_v59  ;;  %v3476_v10 = vmul.f32 %v5183_v44, %v7002_v0  ;;  %vm3481_vm0 = vweird.f32 %v5183_v44  ;;  %v3434_v60 = vadd.f32 %v6994_v5, %v3433_v37 }
 0x9e8   : > { %v3513_v30 = vsel %vm3512_vm9, %v5175_v32, %v3509_v46  ;;  %vm3480_vm3 = vweird.f32 %v7002_v0  ;;  %vm3435_vm4 = vweird.f32 %v6957_v24  ;;  %v3487_v2 = vor.u32 1.1754944e-38, %v3486_v56 }
 0x9e9   : > { %v3518_v26 = vsel %vm7026_vm8, %v3517_v53, %v3513_v30  ;;  %v3524_v42 = vadd.f32 %v5179_v22, %v3523_v15  ;;  %v3477_v32 = vsub.f32 1.0, %v3476_v10  ;;  %vm3482_vm5 = vmor %vm3480_vm3, %vm3481_vm0  ;;  %v3439_v31 = vand.u32 2147483647, %v6957_v24 }
 0x9ea   : > { %v3541_v13 = vmul.f32 %v3518_v26, %v6911_v25  ;;  %vm7072_vm6 = vmor %vm3435_vm4, %vm3436_vm2  ;;  %vm3485_vm7 = vcmp.eq.f32.partialorder %v3484_v14, 8.507059e+37  ;;  %v3501_v40 = vand.u32 2147483648, %v7039_v17  ;;  %v3499_v8 = vand.u32 2147483647, %v7039_v17 }
 0x9eb   : > { %v3528_v34 = vsel %vm3527_vm12, %v5179_v22, %v3524_v42  ;;  %v3478_v55 = vmul.f32 %v5183_v44, %v3477_v32  ;;  %v3441_v22 = vand.u32 2147483648, %v6957_v24  ;;  %v3438_v33 = vsel %vm7072_vm6, %v6994_v5, %v3434_v60 }
 0x9ec   : > { %v3545_v48 = vpack.c.bf16 %v3541_v13, %v3537_v16  ;;  %v3533_v45 = vsel %vm3530_vm14, %v3532_v50, %v3528_v34  ;;  %v5185_v12 = vpop.eup %5184  ;;  %vm3440_vm9 = vcmp.eq.f32.partialorder %v3439_v31, 8.507059e+37  ;;  %vm3495_vm10 = vweird.f32 %v7039_v17 }
 0x9ed   : > { %v3542_v54 = vmul.f32 %v3533_v45, %v6913_v49  ;;  %v3428_v49 = vsel %vm3425_vm1, %v3427_v4, %v3423_v11  ;;  %v3479_v41 = vadd.f32 %v5183_v44, %v3478_v55  ;;  %v3491_v36 = vmul.f32 %v5185_v12, %v7039_v17 }
 0x9ee   : > { %3843 = vmatmul.bf16.vlgmr.msra.gmra.mxu0 %v3545_v48  ;;  %v3535_v0 = vmul.f32 %v3428_v49, %v6901_v1  ;;  %vm3496_vm8 = vweird.f32 %v5185_v12  ;;  %v3442_v9 = vor.u32 1.1754944e-38, %v3441_v22  ;;  %v3502_v18 = vor.u32 1.1754944e-38, %v3501_v40 }
 0x9ef   : > { %v3546_v58 = vpack.c.bf16 %v3542_v54, %v3538_v7  ;;  %v3483_v20 = vsel %vm3482_vm5, %v5183_v44, %v3479_v41  ;;  %v3492_v38 = vsub.f32 1.0, %v3491_v36  ;;  %vm3497_vm11 = vmor %vm3495_vm10, %vm3496_vm8  ;;  %vm3500_vm12 = vcmp.eq.f32.partialorder %v3499_v8, 8.507059e+37 }
 0x9f0   : > { %v3488_v63 = vsel %vm3485_vm7, %v3487_v2, %v3483_v20  ;;  %v3443_v1 = vsel %vm3440_vm9, %v3442_v9, %v3438_v33 }
 0x9f1   : > { %3857 = vmatmul.bf16.vlgmr.msrb.gmra.mxu1 %v3546_v58  ;;  %v3539_v6 = vmul.f32 %v3488_v63, %v6925_v61  ;;  %v3493_v52 = vmul.f32 %v5185_v12, %v3492_v38  ;;  %v3536_v61 = vmul.f32 %v3443_v1, %v6905_v19 }
 0x9f3   : > { %v3543_v24 = vpack.c.bf16 %v3539_v6, %v3535_v0  ;;  %v3494_v59 = vadd.f32 %v5185_v12, %v3493_v52 }
 0x9f5   : > { %v3498_v5 = vsel %vm3497_vm11, %v5185_v12, %v3494_v59  ;;  %3815 = vmatmul.bf16.vlgmr.msra.gmra.mxu2 %v3543_v24 }
 0x9f6   : > { %v3503_v47 = vsel %vm3500_vm12, %v3502_v18, %v3498_v5 }
 0x9f7   : > { %v3540_v46 = vmul.f32 %v3503_v47, %v6951_v23 }
 0x9f9   : > { %v3544_v43 = vpack.c.bf16 %v3540_v46, %v3536_v61 }
 0x9fb   : > { %3829 = vmatmul.bf16.vlgmr.msrb.gmra.mxu3 %v3544_v43 }
 0xa6b   : > { %v3844_v27 = vpop.f32.mrf.mxu0 }
 0xa6e   : > { %v3858_v17 = vpop.f32.mrf.mxu1 }
 0xa73   : > { %v3846_v23 = vpop.f32.mrf.mxu0 }
 0xa76   : > { %v3860_v50 = vpop.f32.mrf.mxu1 }
 0xa78   : > { %v3816_v53 = vpop.f32.mrf.mxu2 }
 0xa79   : > { %v3817_v15 = vadd.f32 %v5111_v21, %v3816_v53 }
 0xa7e   : > { %v3830_v62 = vpop.f32.mrf.mxu3 }
 0xa7f   : > { %v3831_v30 = vadd.f32 %v3830_v62, %v3817_v15 }
 0xa80   : > { %v3818_v16 = vpop.f32.mrf.mxu2 }
 0xa81   : > { %v3845_v39 = vadd.f32 %v3844_v27, %v3831_v30  ;;  %v3819_v42 = vadd.f32 %v5111_v21, %v3818_v16 }
 0xa83   : > { %v3859_v26 = vadd.f32 %v3858_v17, %v3845_v39 }
 0xa85   : > { %v3863_v44 = vadd.f32 %v3859_v26, %v6783_v57 }
 0xa86   : > { %v3832_v35 = vpop.f32.mrf.mxu3 }
 0xa87   : > { %3865 = vst [vmem:[#allocation2] sm:$0xff] %v3863_v44  ;;  %v3833_v19 = vadd.f32 %v3832_v35, %v3819_v42 }
 0xa89   : > { %v3847_v13 = vadd.f32 %v3846_v23, %v3833_v19 }
 0xa8b   : > { %v3861_v34 = vadd.f32 %v3860_v50, %v3847_v13  ;;  %3870 = sbr.rel (%p4776_p5) target bundleno = 3125 (0xc35), region = 160 }
 0xa8d   : > { %v3864_v10 = vadd.f32 %v3861_v34, %v6786_v29 }
 0xa8f   : > { %3866 = vst [vmem:[#allocation2 + $0x8] sm:$0xff] %v3864_v10 }
 0xa90   : > { %v3875_v51 = vrot.slane %v3864_v10, 7  ;;  %vm3876_vm13 = vcmask 1041409   ;;  %vm3879_vm14 = vcmask 1041408   ;;  %v4931_v58 = vld [vmem:[#allocation21 + $0x38] sm:$0xff]  ;;  %v4930_v55 = vld [vmem:[#allocation21 + $0x30] sm:$0xff]  ;;  %v4929_v14 = vld [vmem:[#allocation21 + $0x28] sm:$0xff] }
 0xa91   : > { %4002 = vmatpush.bf16.msra.mxu0 %v4931_v58  ;;  %v4928_v12 = vld [vmem:[#allocation21 + $0x20] sm:$0xff]  ;;  %v4927_v60 = vld [vmem:[#allocation21 + $0x18] sm:$0xff]  ;;  %v4926_v49 = vld [vmem:[#allocation21 + $0x10] sm:$0xff] }
 0xa92   : > { %v3877_v37 = vsel %vm3876_vm13, %v3875_v51, %v3863_v44  ;;  %v4925_v41 = vld [vmem:[#allocation21 + $0x8] sm:$0xff]  ;;  %v4924_v2 = vld [vmem:[#allocation21] sm:$0xff]  ;;  %v5188_v40 = vld [vmem:[#allocation18] ss:$0 sm:$0xff] }
 0xa93   : > { %v3880_v48 = vsel %vm3879_vm14, %v3877_v37, 0.0  ;;  %v5189_v9 = vld [vmem:[#allocation20] ss:$0 sm:$0xff] }
 0xa94   : > { %3881 = vadd.xlane.f32.xlu0 %v3880_v48 }
 0xa95   : > { %4003 = vmatpush.bf16.msra.mxu0 %v4930_v55 }
 0xa99   : > { %4004 = vmatpush.bf16.msra.mxu0 %v4929_v14 }
 0xa9d   : > { %4005 = vmatpush.bf16.msra.mxu0 %v4928_v12 }
 0xaa1   : > { %4006 = vmatpush.bf16.msra.mxu0 %v4927_v60 }
 0xaa5   : > { %4007 = vmatpush.bf16.msra.mxu0 %v4926_v49 }
 0xaa9   : > { %4008 = vmatpush.bf16.msra.mxu0 %v4925_v41 }
 0xaad   : > { %4009 = vmatpush.bf16.msra.mxu0 %v4924_v2 }
 0xb07   : > { %v3882_v57 = vpop.xlane.xlu0 %3881 }
 0xb08   : > { %v3883_v45 = vmul.f32 %v3882_v57, %v6150_v28 }
 0xb0a   : > { %v3885_v7 = vrot.slane %v3883_v45, 1  ;;  %v3888_v25 = vsub.f32 %v3863_v44, %v3883_v45 }
 0xb0c   : > { %v3889_v54 = vsub.f32 %v3864_v10, %v3885_v7  ;;  %v3890_v11 = vmul.f32 %v3888_v25, %v3888_v25 }
 0xb0e   : > { %v3891_v32 = vmul.f32 %v3889_v54, %v3889_v54 }
 0xb10   : > { %v3894_v29 = vrot.slane %v3891_v32, 7 }
 0xb12   : > { %v3895_v4 = vsel %vm3876_vm13, %v3894_v29, %v3890_v11 }
 0xb13   : > { %v3897_v56 = vsel %vm3879_vm14, %v3895_v4, 0.0 }
 0xb14   : > { %3898 = vadd.xlane.f32.xlu0 %v3897_v56 }
 0xb87   : > { %v3899_v36 = vpop.xlane.xlu0 %3898 }
 0xb88   : > { %v3900_v22 = vmul.f32 %v3899_v36, %v6150_v28 }
 0xb8a   : > { %v3901_v3 = vadd.f32 1e-05, %v3900_v22 }
 0xb8c   : > { %5190 = vrsqrt.f32 %v3901_v3  ;;  %vm3908_vm0 = vweird.f32 %v3901_v3 }
 0xb92   : > { %v5191_v31 = vpop.eup %5190 }
 0xb93   : > { %v3903_v20 = vmul.f32 %v5191_v31, %v3901_v3  ;;  %vm3909_vm15 = vweird.f32 %v5191_v31 }
 0xb94   : > { %vm3910_vm1 = vmor %vm3908_vm0, %vm3909_vm15 }
 0xb95   : > { %v3904_v38 = vmul.f32 %v5191_v31, %v3903_v20 }
 0xb97   : > { %v3905_v0 = vmul.f32 0.5, %v3904_v38 }
 0xb99   : > { %v3906_v33 = vsub.f32 1.5, %v3905_v0 }
 0xb9b   : > { %v3907_v63 = vmul.f32 %v5191_v31, %v3906_v33 }
 0xb9d   : > { %v3911_v6 = vsel %vm3910_vm1, %v5191_v31, %v3907_v63 }
 0xb9e   : > { %v3913_v52 = vrot.slane %v3911_v6, 1  ;;  %v3916_v8 = vmul.f32 %v3911_v6, %v3888_v25 }
 0xba0   : > { %v3917_v28 = vmul.f32 %v3913_v52, %v3889_v54  ;;  %v3921_v24 = vmul.f32 %v5188_v40, %v3916_v8 }
 0xba2   : > { %v3922_v59 = vmul.f32 %v5188_v40, %v3917_v28  ;;  %v3926_v1 = vadd.f32 %v5189_v9, %v3921_v24 }
 0xba4   : > { %v3927_v18 = vadd.f32 %v5189_v9, %v3922_v59  ;;  %v3928_v5 = vpack.c.bf16 %v3926_v1, %v3926_v1 }
 0xba6   : > { %v3929_v47 = vpack.c.bf16 %v3927_v18, %v3927_v18  ;;  %v3948_v46 = vunpack.c.l.b16 %v3928_v5 }
 0xba8   : > { %v3949_v61 = vunpack.c.l.b16 %v3929_v47 }
 0xbaa   : > { %v3950_v43 = vrot.slane %v3949_v61, 7 }
 0xbac   : > { %v3951_v21 = vsel %vm3876_vm13, %v3950_v43, %v3948_v46 }
 0xbad   : > { %v3952_v53 = vpack.c.b16 %v3951_v21, %v3951_v21 }
 0xbaf   : > { %4010 = vmatmul.bf16.vlgmr.msra.gmra.mxu0 %v3952_v53 }
 0xc2c   : > { %v4011_v15 = vpop.f32.mrf.mxu0 }
 0xc2d   : > { %4015 = vst [vmem:[#allocation23] sm:$0x3] %v4011_v15 }
 0xc34   : > { %v4013_v27 = vpop.f32.mrf.mxu0 }
 0xc35 PF: > { %s7223_s24 = sld [smem:[#allocation34_spill]]  ;;  %s5660_s27 = smov [#allocation23]  }
 0xc36   : > { %s4022_s23 = sshll.u32 %s5660_s27, 4  ;;  %s7224_s25 = sld [smem:[#allocation53_spill]]  ;;  %s4023_s23 = int_to_ptr.vmem [resolvable:$true] %s4022_s23 }
 0xc3b   : > { %p5017_p8 = scmp.eq.s32.totalorder %s7223_s24, 3 }
 0xc3c   : > { %s4024_s0 = sshll.u32 %s7224_s25, 4  ;;  %s4025_s0 = int_to_ptr.hbm [resolvable:$true] %s4024_s0 }
 0xc3d   : > { %4967 = dma.vmem_to_hbm [thread:$0]  (%p5017_p8), %s4023_s23, 32, %s4025_s0, [#allocation5]  }
 0xc3e   : > { %5625 = dma.done.wait (%p5017_p8), [#allocation5], 32  }
 0xc3f   : > { %5627 = vsyncadd (%p5017_p8), [#allocation5], 4294967264 }
 0xc40 PF: > { %s7225_s27 = sld [smem:[#allocation35_spill]] }
 0xc41   : > { %s7226_s2 = sld [smem:[#allocation32_spill]] }
 0xc42   : > { %s7227_s25 = sld [smem:[#allocation33_spill]] }
 0xc43   : > { %s7228_s26 = sld [smem:[#allocation36_spill]] }
 0xc46   : > { %p44_p9 = scmp.ge.s32.totalorder %s7225_s27, 6  }
 0xc48   :  { %46 = sbr.rel (!%p44_p9) target bundleno = 29 (0x1d), region = 263 }
 0xc4d   :  { %4038 = vsyncpa [#allocation4], 1 }
 0xc4e   :  { %4040 = vsyncpa [#allocation4 + $0x1], 1 }
 0xc4f   :  { %4041 = vsyncpa [#allocation7], 1 }
 0xc50   :  { %4043 = vsyncpa [#allocation7 + $0x1], 1 }
 0xc51   :  { %4044 = vsyncpa [#allocation10], 1 }
 0xc52   :  { %4046 = vsyncpa [#allocation10 + $0x1], 1 }
 0xc53   :  { %4047 = vsyncpa [#allocation13], 1 }
 0xc54   :  { %4049 = vsyncpa [#allocation13 + $0x1], 1 }
 0xc55   :  { %4050 = vsyncpa [#allocation16], 1 }
 0xc56   :  { %4052 = vsyncpa [#allocation16 + $0x1], 1 }
 0xc57   :  { %4053 = vsyncpa [#allocation19], 1 }
 0xc58   :  { %4054 = vsyncpa [#allocation22], 1 }
 0xc59   :  { %4055 = vsyncpa [#allocation5], 1 }
 0xc5a   :  { %4057 = vsyncpa [#allocation5 + $0x1], 1 }

</bundles_post_ra>
